<compile_context>
chip_gen: v7x
topology: tpu7x:2x2x1
jax: 0.10.0
libtpu: 0.0.40
codegen_flags: <defaults>
</compile_context>

<pallas_src>
import numpy as np
import jax
import jax.numpy as jnp
from jax import lax
from jax.experimental import pallas as pl
from jax.experimental.pallas import tpu as pltpu

# --------------------------------------------------------------------------
# Configuration (small, structure-preserving)
# --------------------------------------------------------------------------
B = 2                        # batch
H0 = W0 = 70                 # input spatial size (channels = 1)
K1, S1 = 10, 3               # conv1 kernel / stride
K2, S2 = 7, 2                # conv2 kernel / stride
OH1 = (H0 - K1) // S1 + 1    # 21
OW1 = (W0 - K1) // S1 + 1    # 21
OH2 = (OH1 - K2) // S2 + 1   # 8
OW2 = (OW1 - K2) // S2 + 1   # 8
FEAT = OH2 * OW2             # 64   (original 7828)
HID = FEAT // 2              # 32   (original 3914)
OUT = 2
G = 2 * B                    # images per forward pass (both branches)

OH1P = 24                    # OH1 (21) padded to a multiple of 8 (per-image block)
ROWS1 = G * OH1P             # 96   rows per kernel-row block after conv1 gather
Y2_ROWS = OH2 * 8            # 64   conv2 output rows, layout i*8 + g (g < G valid)


# --------------------------------------------------------------------------
# Host-side operator construction (all selection matrices precomputed here)
# --------------------------------------------------------------------------
def _conv1_gather(branch):
    """(K1*ROWS1, B*H0) 0/1 gather: x_branch[b, S1*i+p, :] -> row p*ROWS1 + g*OH1P + i,
    with g = branch*B + b.  Rows for i in [OH1, OH1P) stay zero (padding)."""
    r = np.zeros((K1 * ROWS1, B * H0), np.float32)
    for p in range(K1):
        for b in range(B):
            g = branch * B + b
            for i in range(OH1):
                r[p * ROWS1 + g * OH1P + i, b * H0 + S1 * i + p] = 1.0
    return jnp.asarray(r)


def _conv2_gather():
    """(K2*Y2_ROWS, ROWS1) 0/1 gather: y1[g*OH1P + S2*i + p, :] -> row
    p*Y2_ROWS + i*8 + g  (flatten-friendly (i, g) layout; slots g in [G, 8) unused)."""
    r = np.zeros((K2 * Y2_ROWS, ROWS1), np.float32)
    for p in range(K2):
        for i in range(OH2):
            for g in range(G):
                r[p * Y2_ROWS + i * 8 + g, g * OH1P + S2 * i + p] = 1.0
    return jnp.asarray(r)


def _width_mats(w, w_in, ow, stride):
    """(k, w_in, ow) width transforms with A[p, stride*j + q, j] = w[p, q]."""
    k = int(w.shape[0])
    wn = np.asarray(w, np.float32)
    a = np.zeros((k, w_in, ow), np.float32)
    cols = np.arange(ow)
    for p in range(k):
        for q in range(k):
            a[p, stride * cols + q, cols] = wn[p, q]
    return jnp.asarray(a)


# --------------------------------------------------------------------------
# Fused Siamese forward kernel (single pallas_call, everything in VMEM)
# --------------------------------------------------------------------------
def _siamese_kernel(x1_ref, x2_ref, r1a_ref, r1b_ref, a1_ref, b1_ref,
                    r2_ref, a2_ref, b2_ref, wl_ref, bl_ref, wo_ref, bo_ref,
                    out_ref):
    f32 = jnp.float32

    # ---- conv1 + ReLU -----------------------------------------------------
    # One row-gather matmul per branch (both batch elements handled by the
    # block-diagonal host matrix), then K1 accumulating width transforms on
    # 8-aligned row slices.  Only `acc1` stays live across the unrolled loop.
    xsel1 = (jnp.dot(r1a_ref[...], x1_ref[...], preferred_element_type=f32) +
             jnp.dot(r1b_ref[...], x2_ref[...], preferred_element_type=f32))
    acc1 = jnp.zeros((ROWS1, OW1), f32)
    for p in range(K1):                                      # static unroll
        acc1 = acc1 + jnp.dot(xsel1[p * ROWS1:(p + 1) * ROWS1, :],
                              a1_ref[p], preferred_element_type=f32)
    y1 = jnp.maximum(acc1 + b1_ref[...], 0.0)                # (ROWS1, OW1), rows g*24+i

    # ---- conv2 + ReLU -----------------------------------------------------
    # Gather rows of y1 with output layout i*8 + g so the flatten below only
    # needs 8-aligned row slices (no selector matmuls).
    xsel2 = jnp.dot(r2_ref[...], y1, preferred_element_type=f32)   # (K2*Y2_ROWS, OW1)
    acc2 = jnp.zeros((Y2_ROWS, OW2), f32)
    for p in range(K2):
        acc2 = acc2 + jnp.dot(xsel2[p * Y2_ROWS:(p + 1) * Y2_ROWS, :],
                              a2_ref[p], preferred_element_type=f32)
    y2 = jnp.maximum(acc2 + b2_ref[...], 0.0)                # (Y2_ROWS, OW2), rows i*8+g

    # ---- flatten + liner (ReLU; the second ReLU in forward_one is a no-op) --
    # lin[g, h] = sum_i sum_j y2[i*8+g, j] * Wl[h, i*OW2 + j]
    lin = jnp.zeros((8, HID), f32)
    for i in range(OH2):
        lin = lin + jnp.dot(y2[i * 8:(i + 1) * 8, :], wl_ref[i],
                            preferred_element_type=f32)
    lin = jnp.maximum(lin + bl_ref[...], 0.0)                # rows 0..G-1 valid

    # ---- Siamese head: |o1 - o2| -> Linear -> sigmoid -----------------------
    d = jnp.abs(lin[0:B, :] - lin[B:2 * B, :])               # (B, HID)
    logits = jnp.dot(d, wo_ref[...], preferred_element_type=f32) + bo_ref[...]
    out_ref[...] = jax.nn.sigmoid(logits)                    # (B, OUT)


_VMEM = pl.BlockSpec(memory_space=pltpu.MemorySpace.VMEM)


@jax.jit
def siamese_forward(params, x1, x2):
    """x1, x2: (B, 1, H0, W0) -> (B, 2), matching Siamese.forward."""
    x1f = x1.reshape(B * H0, W0)          # free reshapes, no concat / copy
    x2f = x2.reshape(B * H0, W0)
    return pl.pallas_call(
        _siamese_kernel,
        out_shape=jax.ShapeDtypeStruct((B, OUT), jnp.float32),
        in_specs=[_VMEM] * 13,
        out_specs=_VMEM,
    )(x1f, x2f, params["r1a"], params["r1b"], params["a1"], params["b1"],
      params["r2"], params["a2"], params["b2"],
      params["wlb"], params["bl"], params["wo"], params["bo"])


# --------------------------------------------------------------------------
# Parameters (PyTorch-shaped, then repacked for the kernel on the host)
# --------------------------------------------------------------------------
def init_params(key):
    ks = jax.random.split(key, 8)

    def uni(kk, shape, bound):
        return jax.random.uniform(kk, shape, jnp.float32, -bound, bound)

    # PyTorch default init: U(-1/sqrt(fan_in), 1/sqrt(fan_in))
    w1 = uni(ks[0], (K1, K1), 1.0 / K1)
    b1 = uni(ks[1], (), 1.0 / K1)
    w2 = uni(ks[2], (K2, K2), 1.0 / K2)
    b2 = uni(ks[3], (), 1.0 / K2)
    wl = uni(ks[4], (HID, FEAT), 1.0 / np.sqrt(FEAT))
    bl = uni(ks[5], (HID,), 1.0 / np.sqrt(FEAT))
    wo = uni(ks[6], (OUT, HID), 1.0 / np.sqrt(HID))
    bo = uni(ks[7], (OUT,), 1.0 / np.sqrt(HID))

    params = dict(
        r1a=_conv1_gather(0),                       # branch 1 (x1) row gather
        r1b=_conv1_gather(1),                       # branch 2 (x2) row gather
        a1=_width_mats(np.asarray(w1), W0, OW1, S1),
        b1=jnp.asarray(np.asarray(b1).reshape(1, 1)),
        r2=_conv2_gather(),
        a2=_width_mats(np.asarray(w2), OW1, OW2, S2),
        b2=jnp.asarray(np.asarray(b2).reshape(1, 1)),
        # liner weight reshaped for the layout-based flatten: (OH2, OW2, HID)
        wlb=jnp.asarray(np.asarray(wl).T.reshape(OH2, OW2, HID)),
        bl=bl[None, :],
        wo=wo.T, bo=bo[None, :],
    )
    raw = (w1, b1, w2, b2, wl, bl, wo, bo)
    return params, raw


# --------------------------------------------------------------------------
# Pure-JAX reference of Siamese.forward (for validation)
# --------------------------------------------------------------------------
def reference_forward(raw, x1, x2):
    w1, b1, w2, b2, wl, bl, wo, bo = raw
    hp = lax.Precision.HIGHEST

    def conv(x, w, b, s):
        y = lax.conv_general_dilated(
            x, w[None, None, :, :], window_strides=(s, s), padding="VALID",
            dimension_numbers=("NCHW", "OIHW", "NCHW"), precision=hp)
        return jax.nn.relu(y + b)

    def one(x):
        y = conv(x, w1, b1, S1)
        y = conv(y, w2, b2, S2)
        y = y.reshape(y.shape[0], -1)
        return jax.nn.relu(jax.nn.relu(jnp.dot(y, wl.T, precision=hp) + bl))

    o1, o2 = one(x1), one(x2)
    return jax.nn.sigmoid(jnp.dot(jnp.abs(o1 - o2), wo.T, precision=hp) + bo)


# --------------------------------------------------------------------------
if __name__ == "__main__":
    key = jax.random.PRNGKey(0)
    kp, ka, kb = jax.random.split(key, 3)
    params, raw = init_params(kp)
    x1 = jax.random.normal(ka, (B, 1, H0, W0), jnp.float32)
    x2 = jax.random.normal(kb, (B, 1, H0, W0), jnp.float32)

    out = jax.block_until_ready(siamese_forward(params, x1, x2))
    assert out.shape == (B, OUT)
    assert bool(jnp.all(jnp.isfinite(out)))

    ref = reference_forward(raw, x1, x2)
    # Tightened from 1e-2; remaining slack only covers MXU low-precision-pass
    # rounding differences between the matmul decomposition and lax.conv.
    assert bool(jnp.allclose(out, ref, rtol=3e-3, atol=3e-3)), (out, ref)
    print("KERNEL_OK")
</pallas_src>

<mosaic_0001>
module attributes {stable_mosaic.version = 11 : i64} {
  func.func @_siamese_kernel(%arg0: memref<140x70xf32, #tpu.memory_space<vmem>>, %arg1: memref<140x70xf32, #tpu.memory_space<vmem>>, %arg2: memref<960x140xf32, #tpu.memory_space<vmem>>, %arg3: memref<960x140xf32, #tpu.memory_space<vmem>>, %arg4: memref<10x70x21xf32, #tpu.memory_space<vmem>>, %arg5: memref<1x1xf32, #tpu.memory_space<vmem>>, %arg6: memref<448x96xf32, #tpu.memory_space<vmem>>, %arg7: memref<7x21x8xf32, #tpu.memory_space<vmem>>, %arg8: memref<1x1xf32, #tpu.memory_space<vmem>>, %arg9: memref<8x8x32xf32, #tpu.memory_space<vmem>>, %arg10: memref<1x32xf32, #tpu.memory_space<vmem>>, %arg11: memref<32x2xf32, #tpu.memory_space<vmem>>, %arg12: memref<1x2xf32, #tpu.memory_space<vmem>>, %arg13: memref<2x2xf32, #tpu.memory_space<vmem>>) attributes {dimension_semantics = [], scalar_prefetch = 0 : i64, scratch_operands = 0 : i64, tpu.core_type = #tpu.core_type<tc>} {
    %c0 = arith.constant 0 : index
    %c0_0 = arith.constant 0 : index
    %0 = vector.load %arg2[%c0, %c0_0] : memref<960x140xf32, #tpu.memory_space<vmem>>, vector<960x140xf32>
    %c0_1 = arith.constant 0 : index
    %c0_2 = arith.constant 0 : index
    %1 = vector.load %arg0[%c0_1, %c0_2] : memref<140x70xf32, #tpu.memory_space<vmem>>, vector<140x70xf32>
    %cst = arith.constant dense<0.000000e+00> : vector<960x70xf32>
    %2 = tpu.matmul %0, %1, %cst {dimension_numbers = #tpu.dot_dimension_numbers<[1], [0], [0], [1], [0, 0, 1, 1], [], []>} : vector<960x140xf32>, vector<140x70xf32>, vector<960x70xf32> -> vector<960x70xf32>
    %c0_3 = arith.constant 0 : index
    %c0_4 = arith.constant 0 : index
    %3 = vector.load %arg3[%c0_3, %c0_4] : memref<960x140xf32, #tpu.memory_space<vmem>>, vector<960x140xf32>
    %c0_5 = arith.constant 0 : index
    %c0_6 = arith.constant 0 : index
    %4 = vector.load %arg1[%c0_5, %c0_6] : memref<140x70xf32, #tpu.memory_space<vmem>>, vector<140x70xf32>
    %cst_7 = arith.constant dense<0.000000e+00> : vector<960x70xf32>
    %5 = tpu.matmul %3, %4, %cst_7 {dimension_numbers = #tpu.dot_dimension_numbers<[1], [0], [0], [1], [0, 0, 1, 1], [], []>} : vector<960x140xf32>, vector<140x70xf32>, vector<960x70xf32> -> vector<960x70xf32>
    %6 = arith.addf %2, %5 : vector<960x70xf32>
    %cst_8 = arith.constant 0.000000e+00 : f32
    %7 = vector.broadcast %cst_8 : f32 to vector<96x21xf32>
    %8 = vector.extract_strided_slice %6 {offsets = [0, 0], sizes = [96, 70], strides = [1, 1]} : vector<960x70xf32> to vector<96x70xf32>
    %c0_9 = arith.constant 0 : index
    %c0_10 = arith.constant 0 : index
    %c0_11 = arith.constant 0 : index
    %9 = vector.load %arg4[%c0_9, %c0_10, %c0_11] : memref<10x70x21xf32, #tpu.memory_space<vmem>>, vector<1x70x21xf32>
    %10 = vector.shape_cast %9 : vector<1x70x21xf32> to vector<70x21xf32>
    %cst_12 = arith.constant dense<0.000000e+00> : vector<96x21xf32>
    %11 = tpu.matmul %8, %10, %cst_12 {dimension_numbers = #tpu.dot_dimension_numbers<[1], [0], [0], [1], [0, 0, 1, 1], [], []>} : vector<96x70xf32>, vector<70x21xf32>, vector<96x21xf32> -> vector<96x21xf32>
    %12 = arith.addf %7, %11 : vector<96x21xf32>
    %13 = vector.extract_strided_slice %6 {offsets = [96, 0], sizes = [96, 70], strides = [1, 1]} : vector<960x70xf32> to vector<96x70xf32>
    %c1 = arith.constant 1 : index
    %c0_13 = arith.constant 0 : index
    %c0_14 = arith.constant 0 : index
    %14 = vector.load %arg4[%c1, %c0_13, %c0_14] : memref<10x70x21xf32, #tpu.memory_space<vmem>>, vector<1x70x21xf32>
    %15 = vector.shape_cast %14 : vector<1x70x21xf32> to vector<70x21xf32>
    %cst_15 = arith.constant dense<0.000000e+00> : vector<96x21xf32>
    %16 = tpu.matmul %13, %15, %cst_15 {dimension_numbers = #tpu.dot_dimension_numbers<[1], [0], [0], [1], [0, 0, 1, 1], [], []>} : vector<96x70xf32>, vector<70x21xf32>, vector<96x21xf32> -> vector<96x21xf32>
    %17 = arith.addf %12, %16 : vector<96x21xf32>
    %18 = vector.extract_strided_slice %6 {offsets = [192, 0], sizes = [96, 70], strides = [1, 1]} : vector<960x70xf32> to vector<96x70xf32>
    %c2 = arith.constant 2 : index
    %c0_16 = arith.constant 0 : index
    %c0_17 = arith.constant 0 : index
    %19 = vector.load %arg4[%c2, %c0_16, %c0_17] : memref<10x70x21xf32, #tpu.memory_space<vmem>>, vector<1x70x21xf32>
    %20 = vector.shape_cast %19 : vector<1x70x21xf32> to vector<70x21xf32>
    %cst_18 = arith.constant dense<0.000000e+00> : vector<96x21xf32>
    %21 = tpu.matmul %18, %20, %cst_18 {dimension_numbers = #tpu.dot_dimension_numbers<[1], [0], [0], [1], [0, 0, 1, 1], [], []>} : vector<96x70xf32>, vector<70x21xf32>, vector<96x21xf32> -> vector<96x21xf32>
    %22 = arith.addf %17, %21 : vector<96x21xf32>
    %23 = vector.extract_strided_slice %6 {offsets = [288, 0], sizes = [96, 70], strides = [1, 1]} : vector<960x70xf32> to vector<96x70xf32>
    %c3 = arith.constant 3 : index
    %c0_19 = arith.constant 0 : index
    %c0_20 = arith.constant 0 : index
    %24 = vector.load %arg4[%c3, %c0_19, %c0_20] : memref<10x70x21xf32, #tpu.memory_space<vmem>>, vector<1x70x21xf32>
    %25 = vector.shape_cast %24 : vector<1x70x21xf32> to vector<70x21xf32>
    %cst_21 = arith.constant dense<0.000000e+00> : vector<96x21xf32>
    %26 = tpu.matmul %23, %25, %cst_21 {dimension_numbers = #tpu.dot_dimension_numbers<[1], [0], [0], [1], [0, 0, 1, 1], [], []>} : vector<96x70xf32>, vector<70x21xf32>, vector<96x21xf32> -> vector<96x21xf32>
    %27 = arith.addf %22, %26 : vector<96x21xf32>
    %28 = vector.extract_strided_slice %6 {offsets = [384, 0], sizes = [96, 70], strides = [1, 1]} : vector<960x70xf32> to vector<96x70xf32>
    %c4 = arith.constant 4 : index
    %c0_22 = arith.constant 0 : index
    %c0_23 = arith.constant 0 : index
    %29 = vector.load %arg4[%c4, %c0_22, %c0_23] : memref<10x70x21xf32, #tpu.memory_space<vmem>>, vector<1x70x21xf32>
    %30 = vector.shape_cast %29 : vector<1x70x21xf32> to vector<70x21xf32>
    %cst_24 = arith.constant dense<0.000000e+00> : vector<96x21xf32>
    %31 = tpu.matmul %28, %30, %cst_24 {dimension_numbers = #tpu.dot_dimension_numbers<[1], [0], [0], [1], [0, 0, 1, 1], [], []>} : vector<96x70xf32>, vector<70x21xf32>, vector<96x21xf32> -> vector<96x21xf32>
    %32 = arith.addf %27, %31 : vector<96x21xf32>
    %33 = vector.extract_strided_slice %6 {offsets = [480, 0], sizes = [96, 70], strides = [1, 1]} : vector<960x70xf32> to vector<96x70xf32>
    %c5 = arith.constant 5 : index
    %c0_25 = arith.constant 0 : index
    %c0_26 = arith.constant 0 : index
    %34 = vector.load %arg4[%c5, %c0_25, %c0_26] : memref<10x70x21xf32, #tpu.memory_space<vmem>>, vector<1x70x21xf32>
    %35 = vector.shape_cast %34 : vector<1x70x21xf32> to vector<70x21xf32>
    %cst_27 = arith.constant dense<0.000000e+00> : vector<96x21xf32>
    %36 = tpu.matmul %33, %35, %cst_27 {dimension_numbers = #tpu.dot_dimension_numbers<[1], [0], [0], [1], [0, 0, 1, 1], [], []>} : vector<96x70xf32>, vector<70x21xf32>, vector<96x21xf32> -> vector<96x21xf32>
    %37 = arith.addf %32, %36 : vector<96x21xf32>
    %38 = vector.extract_strided_slice %6 {offsets = [576, 0], sizes = [96, 70], strides = [1, 1]} : vector<960x70xf32> to vector<96x70xf32>
    %c6 = arith.constant 6 : index
    %c0_28 = arith.constant 0 : index
    %c0_29 = arith.constant 0 : index
    %39 = vector.load %arg4[%c6, %c0_28, %c0_29] : memref<10x70x21xf32, #tpu.memory_space<vmem>>, vector<1x70x21xf32>
    %40 = vector.shape_cast %39 : vector<1x70x21xf32> to vector<70x21xf32>
    %cst_30 = arith.constant dense<0.000000e+00> : vector<96x21xf32>
    %41 = tpu.matmul %38, %40, %cst_30 {dimension_numbers = #tpu.dot_dimension_numbers<[1], [0], [0], [1], [0, 0, 1, 1], [], []>} : vector<96x70xf32>, vector<70x21xf32>, vector<96x21xf32> -> vector<96x21xf32>
    %42 = arith.addf %37, %41 : vector<96x21xf32>
    %43 = vector.extract_strided_slice %6 {offsets = [672, 0], sizes = [96, 70], strides = [1, 1]} : vector<960x70xf32> to vector<96x70xf32>
    %c7 = arith.constant 7 : index
    %c0_31 = arith.constant 0 : index
    %c0_32 = arith.constant 0 : index
    %44 = vector.load %arg4[%c7, %c0_31, %c0_32] : memref<10x70x21xf32, #tpu.memory_space<vmem>>, vector<1x70x21xf32>
    %45 = vector.shape_cast %44 : vector<1x70x21xf32> to vector<70x21xf32>
    %cst_33 = arith.constant dense<0.000000e+00> : vector<96x21xf32>
    %46 = tpu.matmul %43, %45, %cst_33 {dimension_numbers = #tpu.dot_dimension_numbers<[1], [0], [0], [1], [0, 0, 1, 1], [], []>} : vector<96x70xf32>, vector<70x21xf32>, vector<96x21xf32> -> vector<96x21xf32>
    %47 = arith.addf %42, %46 : vector<96x21xf32>
    %48 = vector.extract_strided_slice %6 {offsets = [768, 0], sizes = [96, 70], strides = [1, 1]} : vector<960x70xf32> to vector<96x70xf32>
    %c8 = arith.constant 8 : index
    %c0_34 = arith.constant 0 : index
    %c0_35 = arith.constant 0 : index
    %49 = vector.load %arg4[%c8, %c0_34, %c0_35] : memref<10x70x21xf32, #tpu.memory_space<vmem>>, vector<1x70x21xf32>
    %50 = vector.shape_cast %49 : vector<1x70x21xf32> to vector<70x21xf32>
    %cst_36 = arith.constant dense<0.000000e+00> : vector<96x21xf32>
    %51 = tpu.matmul %48, %50, %cst_36 {dimension_numbers = #tpu.dot_dimension_numbers<[1], [0], [0], [1], [0, 0, 1, 1], [], []>} : vector<96x70xf32>, vector<70x21xf32>, vector<96x21xf32> -> vector<96x21xf32>
    %52 = arith.addf %47, %51 : vector<96x21xf32>
    %53 = vector.extract_strided_slice %6 {offsets = [864, 0], sizes = [96, 70], strides = [1, 1]} : vector<960x70xf32> to vector<96x70xf32>
    %c9 = arith.constant 9 : index
    %c0_37 = arith.constant 0 : index
    %c0_38 = arith.constant 0 : index
    %54 = vector.load %arg4[%c9, %c0_37, %c0_38] : memref<10x70x21xf32, #tpu.memory_space<vmem>>, vector<1x70x21xf32>
    %55 = vector.shape_cast %54 : vector<1x70x21xf32> to vector<70x21xf32>
    %cst_39 = arith.constant dense<0.000000e+00> : vector<96x21xf32>
    %56 = tpu.matmul %53, %55, %cst_39 {dimension_numbers = #tpu.dot_dimension_numbers<[1], [0], [0], [1], [0, 0, 1, 1], [], []>} : vector<96x70xf32>, vector<70x21xf32>, vector<96x21xf32> -> vector<96x21xf32>
    %57 = arith.addf %52, %56 : vector<96x21xf32>
    %c0_40 = arith.constant 0 : index
    %c0_41 = arith.constant 0 : index
    %58 = vector.load %arg5[%c0_40, %c0_41] : memref<1x1xf32, #tpu.memory_space<vmem>>, vector<1x1xf32>
    %59 = vector.broadcast %58 : vector<1x1xf32> to vector<96x21xf32>
    %60 = arith.addf %57, %59 : vector<96x21xf32>
    %cst_42 = arith.constant 0.000000e+00 : f32
    %61 = vector.broadcast %cst_42 : f32 to vector<96x21xf32>
    %62 = arith.maximumf %60, %61 : vector<96x21xf32>
    %c0_43 = arith.constant 0 : index
    %c0_44 = arith.constant 0 : index
    %63 = vector.load %arg6[%c0_43, %c0_44] : memref<448x96xf32, #tpu.memory_space<vmem>>, vector<448x96xf32>
    %cst_45 = arith.constant dense<0.000000e+00> : vector<448x21xf32>
    %64 = tpu.matmul %63, %62, %cst_45 {dimension_numbers = #tpu.dot_dimension_numbers<[1], [0], [0], [1], [0, 0, 1, 1], [], []>} : vector<448x96xf32>, vector<96x21xf32>, vector<448x21xf32> -> vector<448x21xf32>
    %cst_46 = arith.constant 0.000000e+00 : f32
    %65 = vector.broadcast %cst_46 : f32 to vector<64x8xf32>
    %66 = vector.extract_strided_slice %64 {offsets = [0, 0], sizes = [64, 21], strides = [1, 1]} : vector<448x21xf32> to vector<64x21xf32>
    %c0_47 = arith.constant 0 : index
    %c0_48 = arith.constant 0 : index
    %c0_49 = arith.constant 0 : index
    %67 = vector.load %arg7[%c0_47, %c0_48, %c0_49] : memref<7x21x8xf32, #tpu.memory_space<vmem>>, vector<1x21x8xf32>
    %68 = vector.shape_cast %67 : vector<1x21x8xf32> to vector<21x8xf32>
    %cst_50 = arith.constant dense<0.000000e+00> : vector<64x8xf32>
    %69 = tpu.matmul %66, %68, %cst_50 {dimension_numbers = #tpu.dot_dimension_numbers<[1], [0], [0], [1], [0, 0, 1, 1], [], []>} : vector<64x21xf32>, vector<21x8xf32>, vector<64x8xf32> -> vector<64x8xf32>
    %70 = arith.addf %65, %69 : vector<64x8xf32>
    %71 = vector.extract_strided_slice %64 {offsets = [64, 0], sizes = [64, 21], strides = [1, 1]} : vector<448x21xf32> to vector<64x21xf32>
    %c1_51 = arith.constant 1 : index
    %c0_52 = arith.constant 0 : index
    %c0_53 = arith.constant 0 : index
    %72 = vector.load %arg7[%c1_51, %c0_52, %c0_53] : memref<7x21x8xf32, #tpu.memory_space<vmem>>, vector<1x21x8xf32>
    %73 = vector.shape_cast %72 : vector<1x21x8xf32> to vector<21x8xf32>
    %cst_54 = arith.constant dense<0.000000e+00> : vector<64x8xf32>
    %74 = tpu.matmul %71, %73, %cst_54 {dimension_numbers = #tpu.dot_dimension_numbers<[1], [0], [0], [1], [0, 0, 1, 1], [], []>} : vector<64x21xf32>, vector<21x8xf32>, vector<64x8xf32> -> vector<64x8xf32>
    %75 = arith.addf %70, %74 : vector<64x8xf32>
    %76 = vector.extract_strided_slice %64 {offsets = [128, 0], sizes = [64, 21], strides = [1, 1]} : vector<448x21xf32> to vector<64x21xf32>
    %c2_55 = arith.constant 2 : index
    %c0_56 = arith.constant 0 : index
    %c0_57 = arith.constant 0 : index
    %77 = vector.load %arg7[%c2_55, %c0_56, %c0_57] : memref<7x21x8xf32, #tpu.memory_space<vmem>>, vector<1x21x8xf32>
    %78 = vector.shape_cast %77 : vector<1x21x8xf32> to vector<21x8xf32>
    %cst_58 = arith.constant dense<0.000000e+00> : vector<64x8xf32>
    %79 = tpu.matmul %76, %78, %cst_58 {dimension_numbers = #tpu.dot_dimension_numbers<[1], [0], [0], [1], [0, 0, 1, 1], [], []>} : vector<64x21xf32>, vector<21x8xf32>, vector<64x8xf32> -> vector<64x8xf32>
    %80 = arith.addf %75, %79 : vector<64x8xf32>
    %81 = vector.extract_strided_slice %64 {offsets = [192, 0], sizes = [64, 21], strides = [1, 1]} : vector<448x21xf32> to vector<64x21xf32>
    %c3_59 = arith.constant 3 : index
    %c0_60 = arith.constant 0 : index
    %c0_61 = arith.constant 0 : index
    %82 = vector.load %arg7[%c3_59, %c0_60, %c0_61] : memref<7x21x8xf32, #tpu.memory_space<vmem>>, vector<1x21x8xf32>
    %83 = vector.shape_cast %82 : vector<1x21x8xf32> to vector<21x8xf32>
    %cst_62 = arith.constant dense<0.000000e+00> : vector<64x8xf32>
    %84 = tpu.matmul %81, %83, %cst_62 {dimension_numbers = #tpu.dot_dimension_numbers<[1], [0], [0], [1], [0, 0, 1, 1], [], []>} : vector<64x21xf32>, vector<21x8xf32>, vector<64x8xf32> -> vector<64x8xf32>
    %85 = arith.addf %80, %84 : vector<64x8xf32>
    %86 = vector.extract_strided_slice %64 {offsets = [256, 0], sizes = [64, 21], strides = [1, 1]} : vector<448x21xf32> to vector<64x21xf32>
    %c4_63 = arith.constant 4 : index
    %c0_64 = arith.constant 0 : index
    %c0_65 = arith.constant 0 : index
    %87 = vector.load %arg7[%c4_63, %c0_64, %c0_65] : memref<7x21x8xf32, #tpu.memory_space<vmem>>, vector<1x21x8xf32>
    %88 = vector.shape_cast %87 : vector<1x21x8xf32> to vector<21x8xf32>
    %cst_66 = arith.constant dense<0.000000e+00> : vector<64x8xf32>
    %89 = tpu.matmul %86, %88, %cst_66 {dimension_numbers = #tpu.dot_dimension_numbers<[1], [0], [0], [1], [0, 0, 1, 1], [], []>} : vector<64x21xf32>, vector<21x8xf32>, vector<64x8xf32> -> vector<64x8xf32>
    %90 = arith.addf %85, %89 : vector<64x8xf32>
    %91 = vector.extract_strided_slice %64 {offsets = [320, 0], sizes = [64, 21], strides = [1, 1]} : vector<448x21xf32> to vector<64x21xf32>
    %c5_67 = arith.constant 5 : index
    %c0_68 = arith.constant 0 : index
    %c0_69 = arith.constant 0 : index
    %92 = vector.load %arg7[%c5_67, %c0_68, %c0_69] : memref<7x21x8xf32, #tpu.memory_space<vmem>>, vector<1x21x8xf32>
    %93 = vector.shape_cast %92 : vector<1x21x8xf32> to vector<21x8xf32>
    %cst_70 = arith.constant dense<0.000000e+00> : vector<64x8xf32>
    %94 = tpu.matmul %91, %93, %cst_70 {dimension_numbers = #tpu.dot_dimension_numbers<[1], [0], [0], [1], [0, 0, 1, 1], [], []>} : vector<64x21xf32>, vector<21x8xf32>, vector<64x8xf32> -> vector<64x8xf32>
    %95 = arith.addf %90, %94 : vector<64x8xf32>
    %96 = vector.extract_strided_slice %64 {offsets = [384, 0], sizes = [64, 21], strides = [1, 1]} : vector<448x21xf32> to vector<64x21xf32>
    %c6_71 = arith.constant 6 : index
    %c0_72 = arith.constant 0 : index
    %c0_73 = arith.constant 0 : index
    %97 = vector.load %arg7[%c6_71, %c0_72, %c0_73] : memref<7x21x8xf32, #tpu.memory_space<vmem>>, vector<1x21x8xf32>
    %98 = vector.shape_cast %97 : vector<1x21x8xf32> to vector<21x8xf32>
    %cst_74 = arith.constant dense<0.000000e+00> : vector<64x8xf32>
    %99 = tpu.matmul %96, %98, %cst_74 {dimension_numbers = #tpu.dot_dimension_numbers<[1], [0], [0], [1], [0, 0, 1, 1], [], []>} : vector<64x21xf32>, vector<21x8xf32>, vector<64x8xf32> -> vector<64x8xf32>
    %100 = arith.addf %95, %99 : vector<64x8xf32>
    %c0_75 = arith.constant 0 : index
    %c0_76 = arith.constant 0 : index
    %101 = vector.load %arg8[%c0_75, %c0_76] : memref<1x1xf32, #tpu.memory_space<vmem>>, vector<1x1xf32>
    %102 = vector.broadcast %101 : vector<1x1xf32> to vector<64x8xf32>
    %103 = arith.addf %100, %102 : vector<64x8xf32>
    %cst_77 = arith.constant 0.000000e+00 : f32
    %104 = vector.broadcast %cst_77 : f32 to vector<64x8xf32>
    %105 = arith.maximumf %103, %104 : vector<64x8xf32>
    %cst_78 = arith.constant 0.000000e+00 : f32
    %106 = vector.broadcast %cst_78 : f32 to vector<8x32xf32>
    %107 = vector.extract_strided_slice %105 {offsets = [0, 0], sizes = [8, 8], strides = [1, 1]} : vector<64x8xf32> to vector<8x8xf32>
    %c0_79 = arith.constant 0 : index
    %c0_80 = arith.constant 0 : index
    %c0_81 = arith.constant 0 : index
    %108 = vector.load %arg9[%c0_79, %c0_80, %c0_81] : memref<8x8x32xf32, #tpu.memory_space<vmem>>, vector<1x8x32xf32>
    %109 = vector.shape_cast %108 : vector<1x8x32xf32> to vector<8x32xf32>
    %cst_82 = arith.constant dense<0.000000e+00> : vector<8x32xf32>
    %110 = tpu.matmul %107, %109, %cst_82 {dimension_numbers = #tpu.dot_dimension_numbers<[1], [0], [0], [1], [0, 0, 1, 1], [], []>} : vector<8x8xf32>, vector<8x32xf32>, vector<8x32xf32> -> vector<8x32xf32>
    %111 = arith.addf %106, %110 : vector<8x32xf32>
    %112 = vector.extract_strided_slice %105 {offsets = [8, 0], sizes = [8, 8], strides = [1, 1]} : vector<64x8xf32> to vector<8x8xf32>
    %c1_83 = arith.constant 1 : index
    %c0_84 = arith.constant 0 : index
    %c0_85 = arith.constant 0 : index
    %113 = vector.load %arg9[%c1_83, %c0_84, %c0_85] : memref<8x8x32xf32, #tpu.memory_space<vmem>>, vector<1x8x32xf32>
    %114 = vector.shape_cast %113 : vector<1x8x32xf32> to vector<8x32xf32>
    %cst_86 = arith.constant dense<0.000000e+00> : vector<8x32xf32>
    %115 = tpu.matmul %112, %114, %cst_86 {dimension_numbers = #tpu.dot_dimension_numbers<[1], [0], [0], [1], [0, 0, 1, 1], [], []>} : vector<8x8xf32>, vector<8x32xf32>, vector<8x32xf32> -> vector<8x32xf32>
    %116 = arith.addf %111, %115 : vector<8x32xf32>
    %117 = vector.extract_strided_slice %105 {offsets = [16, 0], sizes = [8, 8], strides = [1, 1]} : vector<64x8xf32> to vector<8x8xf32>
    %c2_87 = arith.constant 2 : index
    %c0_88 = arith.constant 0 : index
    %c0_89 = arith.constant 0 : index
    %118 = vector.load %arg9[%c2_87, %c0_88, %c0_89] : memref<8x8x32xf32, #tpu.memory_space<vmem>>, vector<1x8x32xf32>
    %119 = vector.shape_cast %118 : vector<1x8x32xf32> to vector<8x32xf32>
    %cst_90 = arith.constant dense<0.000000e+00> : vector<8x32xf32>
    %120 = tpu.matmul %117, %119, %cst_90 {dimension_numbers = #tpu.dot_dimension_numbers<[1], [0], [0], [1], [0, 0, 1, 1], [], []>} : vector<8x8xf32>, vector<8x32xf32>, vector<8x32xf32> -> vector<8x32xf32>
    %121 = arith.addf %116, %120 : vector<8x32xf32>
    %122 = vector.extract_strided_slice %105 {offsets = [24, 0], sizes = [8, 8], strides = [1, 1]} : vector<64x8xf32> to vector<8x8xf32>
    %c3_91 = arith.constant 3 : index
    %c0_92 = arith.constant 0 : index
    %c0_93 = arith.constant 0 : index
    %123 = vector.load %arg9[%c3_91, %c0_92, %c0_93] : memref<8x8x32xf32, #tpu.memory_space<vmem>>, vector<1x8x32xf32>
    %124 = vector.shape_cast %123 : vector<1x8x32xf32> to vector<8x32xf32>
    %cst_94 = arith.constant dense<0.000000e+00> : vector<8x32xf32>
    %125 = tpu.matmul %122, %124, %cst_94 {dimension_numbers = #tpu.dot_dimension_numbers<[1], [0], [0], [1], [0, 0, 1, 1], [], []>} : vector<8x8xf32>, vector<8x32xf32>, vector<8x32xf32> -> vector<8x32xf32>
    %126 = arith.addf %121, %125 : vector<8x32xf32>
    %127 = vector.extract_strided_slice %105 {offsets = [32, 0], sizes = [8, 8], strides = [1, 1]} : vector<64x8xf32> to vector<8x8xf32>
    %c4_95 = arith.constant 4 : index
    %c0_96 = arith.constant 0 : index
    %c0_97 = arith.constant 0 : index
    %128 = vector.load %arg9[%c4_95, %c0_96, %c0_97] : memref<8x8x32xf32, #tpu.memory_space<vmem>>, vector<1x8x32xf32>
    %129 = vector.shape_cast %128 : vector<1x8x32xf32> to vector<8x32xf32>
    %cst_98 = arith.constant dense<0.000000e+00> : vector<8x32xf32>
    %130 = tpu.matmul %127, %129, %cst_98 {dimension_numbers = #tpu.dot_dimension_numbers<[1], [0], [0], [1], [0, 0, 1, 1], [], []>} : vector<8x8xf32>, vector<8x32xf32>, vector<8x32xf32> -> vector<8x32xf32>
    %131 = arith.addf %126, %130 : vector<8x32xf32>
    %132 = vector.extract_strided_slice %105 {offsets = [40, 0], sizes = [8, 8], strides = [1, 1]} : vector<64x8xf32> to vector<8x8xf32>
    %c5_99 = arith.constant 5 : index
    %c0_100 = arith.constant 0 : index
    %c0_101 = arith.constant 0 : index
    %133 = vector.load %arg9[%c5_99, %c0_100, %c0_101] : memref<8x8x32xf32, #tpu.memory_space<vmem>>, vector<1x8x32xf32>
    %134 = vector.shape_cast %133 : vector<1x8x32xf32> to vector<8x32xf32>
    %cst_102 = arith.constant dense<0.000000e+00> : vector<8x32xf32>
    %135 = tpu.matmul %132, %134, %cst_102 {dimension_numbers = #tpu.dot_dimension_numbers<[1], [0], [0], [1], [0, 0, 1, 1], [], []>} : vector<8x8xf32>, vector<8x32xf32>, vector<8x32xf32> -> vector<8x32xf32>
    %136 = arith.addf %131, %135 : vector<8x32xf32>
    %137 = vector.extract_strided_slice %105 {offsets = [48, 0], sizes = [8, 8], strides = [1, 1]} : vector<64x8xf32> to vector<8x8xf32>
    %c6_103 = arith.constant 6 : index
    %c0_104 = arith.constant 0 : index
    %c0_105 = arith.constant 0 : index
    %138 = vector.load %arg9[%c6_103, %c0_104, %c0_105] : memref<8x8x32xf32, #tpu.memory_space<vmem>>, vector<1x8x32xf32>
    %139 = vector.shape_cast %138 : vector<1x8x32xf32> to vector<8x32xf32>
    %cst_106 = arith.constant dense<0.000000e+00> : vector<8x32xf32>
    %140 = tpu.matmul %137, %139, %cst_106 {dimension_numbers = #tpu.dot_dimension_numbers<[1], [0], [0], [1], [0, 0, 1, 1], [], []>} : vector<8x8xf32>, vector<8x32xf32>, vector<8x32xf32> -> vector<8x32xf32>
    %141 = arith.addf %136, %140 : vector<8x32xf32>
    %142 = vector.extract_strided_slice %105 {offsets = [56, 0], sizes = [8, 8], strides = [1, 1]} : vector<64x8xf32> to vector<8x8xf32>
    %c7_107 = arith.constant 7 : index
    %c0_108 = arith.constant 0 : index
    %c0_109 = arith.constant 0 : index
    %143 = vector.load %arg9[%c7_107, %c0_108, %c0_109] : memref<8x8x32xf32, #tpu.memory_space<vmem>>, vector<1x8x32xf32>
    %144 = vector.shape_cast %143 : vector<1x8x32xf32> to vector<8x32xf32>
    %cst_110 = arith.constant dense<0.000000e+00> : vector<8x32xf32>
    %145 = tpu.matmul %142, %144, %cst_110 {dimension_numbers = #tpu.dot_dimension_numbers<[1], [0], [0], [1], [0, 0, 1, 1], [], []>} : vector<8x8xf32>, vector<8x32xf32>, vector<8x32xf32> -> vector<8x32xf32>
    %146 = arith.addf %141, %145 : vector<8x32xf32>
    %c0_111 = arith.constant 0 : index
    %c0_112 = arith.constant 0 : index
    %147 = vector.load %arg10[%c0_111, %c0_112] : memref<1x32xf32, #tpu.memory_space<vmem>>, vector<1x32xf32>
    %148 = vector.broadcast %147 : vector<1x32xf32> to vector<8x32xf32>
    %149 = arith.addf %146, %148 : vector<8x32xf32>
    %cst_113 = arith.constant 0.000000e+00 : f32
    %150 = vector.broadcast %cst_113 : f32 to vector<8x32xf32>
    %151 = arith.maximumf %149, %150 : vector<8x32xf32>
    %152 = vector.extract_strided_slice %151 {offsets = [0, 0], sizes = [2, 32], strides = [1, 1]} : vector<8x32xf32> to vector<2x32xf32>
    %153 = vector.extract_strided_slice %151 {offsets = [2, 0], sizes = [2, 32], strides = [1, 1]} : vector<8x32xf32> to vector<2x32xf32>
    %154 = arith.subf %152, %153 : vector<2x32xf32>
    %155 = math.absf %154 : vector<2x32xf32>
    %c0_114 = arith.constant 0 : index
    %c0_115 = arith.constant 0 : index
    %156 = vector.load %arg11[%c0_114, %c0_115] : memref<32x2xf32, #tpu.memory_space<vmem>>, vector<32x2xf32>
    %cst_116 = arith.constant dense<0.000000e+00> : vector<2x2xf32>
    %157 = tpu.matmul %155, %156, %cst_116 {dimension_numbers = #tpu.dot_dimension_numbers<[1], [0], [0], [1], [0, 0, 1, 1], [], []>} : vector<2x32xf32>, vector<32x2xf32>, vector<2x2xf32> -> vector<2x2xf32>
    %c0_117 = arith.constant 0 : index
    %c0_118 = arith.constant 0 : index
    %158 = vector.load %arg12[%c0_117, %c0_118] : memref<1x2xf32, #tpu.memory_space<vmem>>, vector<1x2xf32>
    %159 = vector.broadcast %158 : vector<1x2xf32> to vector<2x2xf32>
    %160 = arith.addf %157, %159 : vector<2x2xf32>
    %161 = arith.negf %160 : vector<2x2xf32>
    %162 = math.exp %161 : vector<2x2xf32>
    %cst_119 = arith.constant 1.000000e+00 : f32
    %163 = vector.broadcast %cst_119 : f32 to vector<2x2xf32>
    %164 = arith.addf %163, %162 : vector<2x2xf32>
    %165 = arith.divf %163, %164 : vector<2x2xf32>
    %c0_120 = arith.constant 0 : index
    %c0_121 = arith.constant 0 : index
    %166 = vector.load %arg13[%c0_120, %c0_121] : memref<2x2xf32, #tpu.memory_space<vmem>>, vector<2x2xf32>
    tpu.vector_store %arg13[%c0_120, %c0_121], %165 {strides = array<i32>} : memref<2x2xf32, #tpu.memory_space<vmem>>, vector<2x2xf32>,
    return
  }
}

</mosaic_0001>

<bundles_post_ra>
// kernel: siamese_forward.1
= control target key start
LH: loop header
LB: loop body
LE: loop exit
PB: predicated region body
PF: predicated region fallthrough
CT: control target
= control target key end

     0   :  { %s12108_s0 = inlined_call_operand.vmem [shape: f32[140,70], index: 0, kind: input, shape index: {}]   ;;  %s12109_s1 = inlined_call_operand.vmem [shape: f32[140,70], index: 1, kind: input, shape index: {}]   ;;  %s12110_s2 = inlined_call_operand.vmem [shape: f32[960,140], index: 2, kind: input, shape index: {}]   ;;  %s12111_s3 = inlined_call_operand.vmem [shape: f32[960,140], index: 3, kind: input, shape index: {}]   ;;  %s12112_s4 = inlined_call_operand.vmem [shape: f32[10,70,21], index: 4, kind: input, shape index: {}]   ;;  %s12113_s5 = inlined_call_operand.<no memory space> [shape: f32[1,1], index: 5, kind: input, shape index: {}]   ;;  %s12114_s6 = inlined_call_operand.vmem [shape: f32[448,96], index: 6, kind: input, shape index: {}]   ;;  %s12115_s7 = inlined_call_operand.vmem [shape: f32[7,21,8], index: 7, kind: input, shape index: {}]   ;;  %s12116_s9 = inlined_call_operand.vmem [shape: f32[8,8,32], index: 9, kind: input, shape index: {}]   ;;  %s12117_s10 = inlined_call_operand.vmem [shape: f32[1,32], index: 10, kind: input, shape index: {}]   ;;  %s12118_s11 = inlined_call_operand.vmem [shape: f32[32,2], index: 11, kind: input, shape index: {}]   ;;  %s12119_s12 = inlined_call_operand.vmem [shape: f32[1,2], index: 12, kind: input, shape index: {}]   ;;  %s12120_s13 = inlined_call_operand.hbm [shape: f32[2,2], index: 13, kind: output, shape index: {}]   ;;  %s12121_s8 = inlined_call_operand.<no memory space> [shape: f32[1,1], index: 8, kind: input, shape index: {}]  }
   0x1   :  { %v18_v0 = vstv %s12113_s5  ;;  %v20_v1 = vstv %s12121_s8 }
   0x2   :  { %19 = vst [vmem:[#allocation2] sm:$0x1] %v18_v0  ;;  %21 = vst [vmem:[#allocation3] sm:$0x1] %v20_v1 }
   0x3   :  { %v547_v2 = vld [vmem:[%s12109_s1] sm:$0xff]  ;;  %v548_v3 = vld [vmem:[%s12109_s1 + $0x8] sm:$0xff]  ;;  %v549_v4 = vld [vmem:[%s12109_s1 + $0x10] sm:$0xff]  ;;  %v9108_v5 = vmov 0.0|0.0   ;;  %vm565_vm0 = vcmask 97280   ;;  %vm926_vm1 = vcmask 1043456  }
   0x4   :  { %8442 = vmatprep.subr.bf16.mxu0 %v9108_v5  ;;  %v8443_v6 = vpack.c.bf16 %v548_v3, %v547_v2  ;;  %v550_v7 = vld [vmem:[%s12109_s1 + $0x18] sm:$0xff]  ;;  %8716 = vmatprep.subr.bf16.mxu1 %v9108_v5  ;;  %v551_v9 = vld [vmem:[%s12109_s1 + $0x20] sm:$0xff]  ;;  %v552_v10 = vld [vmem:[%s12109_s1 + $0x28] sm:$0xff] }
   0x5   :  { %v8446_v8 = vpack.c.bf16 %v550_v7, %v549_v4  ;;  %v308_v11 = vld [vmem:[%s12111_s3 + $0x8] sm:$0xff]  ;;  %v8449_v12 = vpack.c.bf16 %v552_v10, %v551_v9  ;;  %v553_v13 = vld [vmem:[%s12109_s1 + $0x30] sm:$0xff]  ;;  %v554_v14 = vld [vmem:[%s12109_s1 + $0x38] sm:$0xff] }
   0x6   :  { %8444 = vmatpush1.bf16.msra.mxu0 %v8443_v6  ;;  %8725 = vmatpush1.bf16.msra.mxu1 %v8443_v6  ;;  %v8452_v15 = vpack.c.bf16 %v554_v14, %v553_v13  ;;  %v555_v16 = vld [vmem:[%s12109_s1 + $0x40] sm:$0xff]  ;;  %v556_v17 = vld [vmem:[%s12109_s1 + $0x48] sm:$0xff]  ;;  %v557_v19 = vld [vmem:[%s12109_s1 + $0x50] sm:$0xff] }
   0x7   :  { %8445 = vmatprep.subr.bf16.mxu0 %v9108_v5  ;;  %8717 = vmatprep.subr.bf16.mxu1 %v9108_v5  ;;  %v8455_v18 = vpack.c.bf16 %v556_v17, %v555_v16  ;;  %v558_v20 = vld [vmem:[%s12109_s1 + $0x58] sm:$0xff]  ;;  %v559_v22 = vld [vmem:[%s12109_s1 + $0x60] sm:$0xff]  ;;  %v560_v23 = vld [vmem:[%s12109_s1 + $0x68] sm:$0xff] }
   0x8   :  { %6811 = vmatprep.mubr.msk.f32.mxu0 %vm565_vm0, %v308_v11  ;;  %v8458_v21 = vpack.c.bf16 %v558_v20, %v557_v19  ;;  %v8461_v24 = vpack.c.bf16 %v560_v23, %v559_v22  ;;  %v561_v25 = vld [vmem:[%s12109_s1 + $0x70] sm:$0xff]  ;;  %v562_v26 = vld [vmem:[%s12109_s1 + $0x78] sm:$0xff]  ;;  %v563_v28 = vld [vmem:[%s12109_s1 + $0x80] sm:$0xff] }
   0x9   :  { %v8464_v27 = vpack.c.bf16 %v562_v26, %v561_v25  ;;  %v564_v29 = vld [vmem:[%s12109_s1 + $0x88] sm:$0xf] }
   0xa   :  { %8447 = vmatpush1.bf16.msra.mxu0 %v8446_v8  ;;  %8726 = vmatpush1.bf16.msra.mxu1 %v8446_v8 }
   0xb   :  { %8448 = vmatprep.subr.bf16.mxu0 %v9108_v5  ;;  %8718 = vmatprep.subr.bf16.mxu1 %v9108_v5 }
   0xe   :  { %8450 = vmatpush1.bf16.msra.mxu0 %v8449_v12  ;;  %8727 = vmatpush1.bf16.msra.mxu1 %v8449_v12 }
   0xf   :  { %8451 = vmatprep.subr.bf16.mxu0 %v9108_v5  ;;  %8719 = vmatprep.subr.bf16.mxu1 %v9108_v5 }
  0x12   :  { %8453 = vmatpush1.bf16.msra.mxu0 %v8452_v15  ;;  %8728 = vmatpush1.bf16.msra.mxu1 %v8452_v15 }
  0x13   :  { %8454 = vmatprep.subr.bf16.mxu0 %v9108_v5  ;;  %8720 = vmatprep.subr.bf16.mxu1 %v9108_v5 }
  0x16   :  { %8456 = vmatpush1.bf16.msra.mxu0 %v8455_v18  ;;  %8729 = vmatpush1.bf16.msra.mxu1 %v8455_v18 }
  0x17   :  { %8457 = vmatprep.subr.bf16.mxu0 %v9108_v5  ;;  %8721 = vmatprep.subr.bf16.mxu1 %v9108_v5 }
  0x1a   :  { %8459 = vmatpush1.bf16.msra.mxu0 %v8458_v21  ;;  %8730 = vmatpush1.bf16.msra.mxu1 %v8458_v21 }
  0x1b   :  { %8460 = vmatprep.subr.bf16.mxu0 %v9108_v5  ;;  %8722 = vmatprep.subr.bf16.mxu1 %v9108_v5 }
  0x1e   :  { %8462 = vmatpush1.bf16.msra.mxu0 %v8461_v24  ;;  %8731 = vmatpush1.bf16.msra.mxu1 %v8461_v24 }
  0x1f   :  { %8463 = vmatprep.subr.bf16.mxu0 %v9108_v5  ;;  %8723 = vmatprep.subr.bf16.mxu1 %v9108_v5 }
  0x20   :  { %22 = vsyncpa [#allocation5], 0  ;;  %v8467_v30 = vpack.c.bf16 %v564_v29, %v563_v28  ;;  %vm9109_vm2 = vmmov 1   ;;  %v289_v32 = vld [vmem:[%s12108_s0] sm:$0xff]  ;;  %v290_v33 = vld [vmem:[%s12108_s0 + $0x8] sm:$0xff]  ;;  %vm2679_vm4 = vcmask 1045504  }
  0x21   :  { %vm9265_vm3 = vmpackc.low %vm926_vm1, %vm9109_vm2  ;;  %v307_v34 = vld [vmem:[%s12111_s3] sm:$0xff]  ;;  %v8471_v35 = vpack.c.bf16 %v290_v33, %v289_v32  ;;  %v310_v36 = vld [vmem:[%s12111_s3 + $0x18] sm:$0xff]  ;;  %vm2642_vm5 = vcmask 572416   ;;  %vm4550_vm6 = vcmask 785408   ;;  %vm5096_vm7 = vcmask 1044480  }
  0x22   :  { %8465 = vmatpush1.bf16.msra.mxu0 %v8464_v27  ;;  %8732 = vmatpush1.bf16.msra.mxu1 %v8464_v27  ;;  %v291_v37 = vld [vmem:[%s12108_s0 + $0x10] sm:$0xff]  ;;  %v292_v38 = vld [vmem:[%s12108_s0 + $0x18] sm:$0xff]  ;;  %v312_v41 = vld [vmem:[%s12111_s3 + $0x28] sm:$0xff]  ;;  %vm5071_vm8 = vcmask 171008   ;;  %vm9112_vm9 = vmmov 0   ;;  %vm6086_vm10 = vcmask 64512  }
  0x23   :  { %8466 = vmatprep.subr.bf16.mxu0 %v9108_v5  ;;  %8724 = vmatprep.subr.bf16.mxu1 %v9108_v5  ;;  %v309_v39 = vld [vmem:[%s12111_s3 + $0x10] sm:$0xff]  ;;  %v8474_v40 = vpack.c.bf16 %v292_v38, %v291_v37  ;;  %v293_v42 = vld [vmem:[%s12108_s0 + $0x20] sm:$0xff]  ;;  %v294_v43 = vld [vmem:[%s12108_s0 + $0x28] sm:$0xff]  ;;  %vm6714_vm11 = vcmask 261120   ;;  %vm6794_vm12 = vcmask 9216  }
  0x24   :  { %v311_v44 = vld [vmem:[%s12111_s3 + $0x20] sm:$0xff]  ;;  %v8477_v45 = vpack.c.bf16 %v294_v43, %v293_v42  ;;  %v314_v46 = vld [vmem:[%s12111_s3 + $0x38] sm:$0xff]  ;;  %v295_v47 = vld [vmem:[%s12108_s0 + $0x30] sm:$0xff] }
  0x25   :  { %v296_v48 = vld [vmem:[%s12108_s0 + $0x38] sm:$0xff]  ;;  %v313_v49 = vld [vmem:[%s12111_s3 + $0x30] sm:$0xff]  ;;  %v316_v51 = vld [vmem:[%s12111_s3 + $0x48] sm:$0xff] }
  0x26   :  { %8469 = vmatpush1.bf16.msk.msra.mxu0 %vm9265_vm3, %v8467_v30  ;;  %8733 = vmatpush1.bf16.msk.msra.mxu1 %vm9265_vm3, %v8467_v30  ;;  %v8480_v50 = vpack.c.bf16 %v296_v48, %v295_v47  ;;  %v297_v52 = vld [vmem:[%s12108_s0 + $0x40] sm:$0xff]  ;;  %v298_v53 = vld [vmem:[%s12108_s0 + $0x48] sm:$0xff]  ;;  %v318_v56 = vld [vmem:[%s12111_s3 + $0x58] sm:$0xff] }
  0x27   :  { %8470 = vmatprep.subr.bf16.mxu0 %v9108_v5  ;;  %v315_v54 = vld [vmem:[%s12111_s3 + $0x40] sm:$0xff]  ;;  %v8483_v55 = vpack.c.bf16 %v298_v53, %v297_v52  ;;  %v299_v57 = vld [vmem:[%s12108_s0 + $0x50] sm:$0xff]  ;;  %v300_v58 = vld [vmem:[%s12108_s0 + $0x58] sm:$0xff] }
  0x28   :  { %v317_v59 = vld [vmem:[%s12111_s3 + $0x50] sm:$0xff]  ;;  %v8486_v60 = vpack.c.bf16 %v300_v58, %v299_v57  ;;  %v320_v61 = vld [vmem:[%s12111_s3 + $0x68] sm:$0xff]  ;;  %v319_v62 = vld [vmem:[%s12111_s3 + $0x60] sm:$0xff] }
  0x29   :  { %995 = vmatmul.mubr.f32.vlgmr.msra.gmra.mrb[0].mxu0 %v307_v34  ;;  %v322_v63 = vld [vmem:[%s12111_s3 + $0x78] sm:$0xff]  ;;  %v321_v0 = vld [vmem:[%s12111_s3 + $0x70] sm:$0xff]  ;;  %v324_v1 = vld [vmem:[%s12111_s3 + $0x88] sm:$0xff] }
  0x2a   :  { %8472 = vmatpush1.bf16.msra.mxu0 %v8471_v35  ;;  %6812 = vmatprep.mubr.msk.f32.mxu0 %vm565_vm0, %v310_v36  ;;  %v323_v2 = vld [vmem:[%s12111_s3 + $0x80] sm:$0xff]  ;;  %v326_v3 = vld [vmem:[%s12111_s3 + $0x98] sm:$0xff]  ;;  %v325_v4 = vld [vmem:[%s12111_s3 + $0x90] sm:$0xff] }
  0x2b   :  { %8473 = vmatprep.subr.bf16.mxu0 %v9108_v5  ;;  %v328_v6 = vld [vmem:[%s12111_s3 + $0xa8] sm:$0xff]  ;;  %v327_v7 = vld [vmem:[%s12111_s3 + $0xa0] sm:$0xff]  ;;  %v330_v8 = vld [vmem:[%s12111_s3 + $0xb8] sm:$0xff] }
  0x2c   :  { %v301_v9 = vld [vmem:[%s12108_s0 + $0x60] sm:$0xff]  ;;  %v302_v10 = vld [vmem:[%s12108_s0 + $0x68] sm:$0xff]  ;;  %v329_v11 = vld [vmem:[%s12111_s3 + $0xb0] sm:$0xff] }
  0x2d   :  { %1000 = vmatmul.mubr.f32.gmra.mrb[2].mxu0 %v309_v39  ;;  %v8489_v12 = vpack.c.bf16 %v302_v10, %v301_v9  ;;  %v332_v13 = vld [vmem:[%s12111_s3 + $0xc8] sm:$0xff]  ;;  %v331_v14 = vld [vmem:[%s12111_s3 + $0xc0] sm:$0xff]  ;;  %v334_v15 = vld [vmem:[%s12111_s3 + $0xd8] sm:$0xff] }
  0x2e   :  { %6813 = vmatprep.mubr.msk.f32.mxu0 %vm565_vm0, %v312_v41  ;;  %8475 = vmatpush1.bf16.msra.mxu0 %v8474_v40  ;;  %v333_v16 = vld [vmem:[%s12111_s3 + $0xd0] sm:$0xff]  ;;  %v336_v17 = vld [vmem:[%s12111_s3 + $0xe8] sm:$0xff]  ;;  %v335_v18 = vld [vmem:[%s12111_s3 + $0xe0] sm:$0xff] }
  0x2f   :  { %8476 = vmatprep.subr.bf16.mxu0 %v9108_v5  ;;  %v338_v19 = vld [vmem:[%s12111_s3 + $0xf8] sm:$0xff]  ;;  %v337_v20 = vld [vmem:[%s12111_s3 + $0xf0] sm:$0xff]  ;;  %v340_v21 = vld [vmem:[%s12111_s3 + $0x108] sm:$0xff] }
  0x30   :  { %v339_v22 = vld [vmem:[%s12111_s3 + $0x100] sm:$0xff]  ;;  %v342_v23 = vld [vmem:[%s12111_s3 + $0x118] sm:$0xff]  ;;  %v341_v24 = vld [vmem:[%s12111_s3 + $0x110] sm:$0xff] }
  0x31   :  { %1005 = vmatmul.mubr.f32.gmra.mrb[4].mxu0 %v311_v44  ;;  %v344_v25 = vld [vmem:[%s12111_s3 + $0x128] sm:$0xff]  ;;  %v303_v26 = vld [vmem:[%s12108_s0 + $0x70] sm:$0xff]  ;;  %v304_v27 = vld [vmem:[%s12108_s0 + $0x78] sm:$0xff] }
  0x32   :  { %6814 = vmatprep.mubr.msk.f32.mxu0 %vm565_vm0, %v314_v46  ;;  %8478 = vmatpush1.bf16.msra.mxu0 %v8477_v45  ;;  %v343_v28 = vld [vmem:[%s12111_s3 + $0x120] sm:$0xff]  ;;  %v8492_v29 = vpack.c.bf16 %v304_v27, %v303_v26  ;;  %v346_v30 = vld [vmem:[%s12111_s3 + $0x138] sm:$0xff]  ;;  %v345_v32 = vld [vmem:[%s12111_s3 + $0x130] sm:$0xff] }
  0x33   :  { %8479 = vmatprep.subr.bf16.mxu0 %v9108_v5  ;;  %v348_v33 = vld [vmem:[%s12111_s3 + $0x148] sm:$0xff]  ;;  %v347_v34 = vld [vmem:[%s12111_s3 + $0x140] sm:$0xff]  ;;  %v350_v35 = vld [vmem:[%s12111_s3 + $0x158] sm:$0xff] }
  0x34   :  { %v349_v36 = vld [vmem:[%s12111_s3 + $0x150] sm:$0xff]  ;;  %v352_v37 = vld [vmem:[%s12111_s3 + $0x168] sm:$0xff]  ;;  %v351_v38 = vld [vmem:[%s12111_s3 + $0x160] sm:$0xff] }
  0x35   :  { %1010 = vmatmul.mubr.f32.gmra.mrb[6].mxu0 %v313_v49  ;;  %v354_v39 = vld [vmem:[%s12111_s3 + $0x178] sm:$0xff]  ;;  %v353_v40 = vld [vmem:[%s12111_s3 + $0x170] sm:$0xff]  ;;  %v356_v41 = vld [vmem:[%s12111_s3 + $0x188] sm:$0xff] }
  0x36   :  { %6815 = vmatprep.mubr.msk.f32.mxu0 %vm565_vm0, %v316_v51  ;;  %8481 = vmatpush1.bf16.msra.mxu0 %v8480_v50  ;;  %v355_v42 = vld [vmem:[%s12111_s3 + $0x180] sm:$0xff]  ;;  %v358_v43 = vld [vmem:[%s12111_s3 + $0x198] sm:$0xff]  ;;  %v306_v45 = vld [vmem:[%s12108_s0 + $0x88] sm:$0xf] }
  0x37   :  { %8482 = vmatprep.subr.bf16.mxu0 %v9108_v5  ;;  %v305_v44 = vld [vmem:[%s12108_s0 + $0x80] sm:$0xff]  ;;  %v357_v46 = vld [vmem:[%s12111_s3 + $0x190] sm:$0xff]  ;;  %v360_v48 = vld [vmem:[%s12111_s3 + $0x1a8] sm:$0xff] }
  0x38   :  { %v8495_v47 = vpack.c.bf16 %v306_v45, %v305_v44  ;;  %v359_v49 = vld [vmem:[%s12111_s3 + $0x1a0] sm:$0xff]  ;;  %v362_v50 = vld [vmem:[%s12111_s3 + $0x1b8] sm:$0xff]  ;;  %v361_v51 = vld [vmem:[%s12111_s3 + $0x1b0] sm:$0xff] }
  0x39   :  { %1015 = vmatmul.mubr.f32.gmra.mrb[8].mxu0 %v315_v54  ;;  %v364_v31 = vld [vmem:[%s12111_s3 + $0x1c8] sm:$0xff]  ;;  %v363_v52 = vld [vmem:[%s12111_s3 + $0x1c0] sm:$0xff]  ;;  %v366_v53 = vld [vmem:[%s12111_s3 + $0x1d8] sm:$0xff] }
  0x3a   :  { %6816 = vmatprep.mubr.msk.f32.mxu0 %vm565_vm0, %v318_v56  ;;  %8484 = vmatpush1.bf16.msra.mxu0 %v8483_v55  ;;  %v365_v54 = vld [vmem:[%s12111_s3 + $0x1d0] sm:$0xff]  ;;  %v368_v55 = vld [vmem:[%s12111_s3 + $0x1e8] sm:$0xff]  ;;  %v367_v56 = vld [vmem:[%s12111_s3 + $0x1e0] sm:$0xff] }
  0x3b   :  { %8485 = vmatprep.subr.bf16.mxu0 %v9108_v5  ;;  %v370_v57 = vld [vmem:[%s12111_s3 + $0x1f8] sm:$0xff]  ;;  %v369_v58 = vld [vmem:[%s12111_s3 + $0x1f0] sm:$0xff]  ;;  %v383_v9 = vld [vmem:[%s12111_s3 + $0x260] sm:$0xff] }
  0x3c   :  { %v386_v10 = vld [vmem:[%s12111_s3 + $0x278] sm:$0xff]  ;;  %v439_v26 = vld [vmem:[%s12111_s3 + $0x420] sm:$0xff]  ;;  %v393_v27 = vld [vmem:[%s12111_s3 + $0x2b0] sm:$0xff] }
  0x3d   :  { %1020 = vmatmul.mubr.f32.gmra.mrb[10].mxu0 %v317_v59  ;;  %v372_v59 = vld [vmem:[%s12111_s3 + $0x208] sm:$0xff]  ;;  %v401_v44 = vld [vmem:[%s12111_s3 + $0x2f0] sm:$0xff] }
  0x3e   :  { %6817 = vmatprep.mubr.msk.f32.mxu0 %vm565_vm0, %v320_v61  ;;  %8487 = vmatpush1.bf16.msra.mxu0 %v8486_v60  ;;  %v371_v60 = vld [vmem:[%s12111_s3 + $0x200] sm:$0xff]  ;;  %v374_v61 = vld [vmem:[%s12111_s3 + $0x218] sm:$0xff]  ;;  %v404_v45 = vld [vmem:[%s12111_s3 + $0x308] sm:$0xff] }
  0x3f   :  { %8488 = vmatprep.subr.bf16.mxu0 %v9108_v5 }
  0x41   :  { %1025 = vmatmul.mubr.f32.gmra.mrb[12].mxu0 %v319_v62  ;;  %v373_v62 = vld [vmem:[%s12111_s3 + $0x210] sm:$0xff] }
  0x42   :  { %6818 = vmatprep.mubr.msk.f32.mxu0 %vm565_vm0, %v322_v63  ;;  %8490 = vmatpush1.bf16.msra.mxu0 %v8489_v12  ;;  %v376_v63 = vld [vmem:[%s12111_s3 + $0x228] sm:$0xff] }
  0x43   :  { %8491 = vmatprep.subr.bf16.mxu0 %v9108_v5  ;;  %v388_v12 = vld [vmem:[%s12111_s3 + $0x288] sm:$0xff] }
  0x45   :  { %1030 = vmatmul.mubr.f32.gmra.mrb[14].mxu0 %v321_v0  ;;  %v375_v0 = vld [vmem:[%s12111_s3 + $0x220] sm:$0xff] }
  0x46   :  { %6819 = vmatprep.mubr.msk.f32.mxu0 %vm565_vm0, %v324_v1  ;;  %8493 = vmatpush1.bf16.msra.mxu0 %v8492_v29  ;;  %v378_v1 = vld [vmem:[%s12111_s3 + $0x238] sm:$0xff] }
  0x47   :  { %8494 = vmatprep.subr.bf16.mxu0 %v9108_v5  ;;  %v442_v29 = vld [vmem:[%s12111_s3 + $0x438] sm:$0xff] }
  0x49   :  { %1035 = vmatmul.mubr.f32.gmra.mrb[16].mxu0 %v323_v2  ;;  %v377_v2 = vld [vmem:[%s12111_s3 + $0x230] sm:$0xff] }
  0x4a   :  { %6820 = vmatprep.mubr.msk.f32.mxu0 %vm565_vm0, %v326_v3  ;;  %8497 = vmatpush1.bf16.msk.msra.mxu0 %vm9265_vm3, %v8495_v47  ;;  %v380_v3 = vld [vmem:[%s12111_s3 + $0x248] sm:$0xff]  ;;  %v449_v47 = vld [vmem:[%s12111_s3 + $0x470] sm:$0xff] }
  0x4d   :  { %1040 = vmatmul.mubr.f32.gmra.mrb[18].mxu0 %v325_v4  ;;  %v379_v4 = vld [vmem:[%s12111_s3 + $0x240] sm:$0xff] }
  0x4e   :  { %6821 = vmatprep.mubr.msk.f32.mxu0 %vm565_vm0, %v328_v6  ;;  %v382_v6 = vld [vmem:[%s12111_s3 + $0x258] sm:$0xff] }
  0x51   :  { %1045 = vmatmul.mubr.f32.gmra.mrb[20].mxu0 %v327_v7  ;;  %v381_v7 = vld [vmem:[%s12111_s3 + $0x250] sm:$0xff] }
  0x52   :  { %6822 = vmatprep.mubr.msk.f32.mxu0 %vm565_vm0, %v330_v8  ;;  %v384_v8 = vld [vmem:[%s12111_s3 + $0x268] sm:$0xff] }
  0x55   :  { %1050 = vmatmul.mubr.f32.gmra.mrb[22].mxu0 %v329_v11  ;;  %v385_v11 = vld [vmem:[%s12111_s3 + $0x270] sm:$0xff] }
  0x56   :  { %6823 = vmatprep.mubr.msk.f32.mxu0 %vm565_vm0, %v332_v13  ;;  %v434_v13 = vld [vmem:[%s12111_s3 + $0x3f8] sm:$0xff] }
  0x57   :  { %6874 = vmatprep.mubr.msk.f32.mxu1 %vm565_vm0, %v434_v13  ;;  %v420_v13 = vld [vmem:[%s12111_s3 + $0x388] sm:$0xff] }
  0x59   :  { %1055 = vmatmul.mubr.f32.gmra.mrb[24].mxu0 %v331_v14  ;;  %v433_v14 = vld [vmem:[%s12111_s3 + $0x3f0] sm:$0xff] }
  0x5a   :  { %6824 = vmatprep.mubr.msk.f32.mxu0 %vm565_vm0, %v334_v15  ;;  %v387_v15 = vld [vmem:[%s12111_s3 + $0x280] sm:$0xff]  ;;  %1310 = vmatmul.mubr.f32.vlgmr.msra.gmra.mrb[0].mxu1 %v433_v14  ;;  %v466_v14 = vld [vmem:[%s12111_s3 + $0x4f8] sm:$0xff] }
  0x5d   :  { %1060 = vmatmul.mubr.f32.gmra.mrb[26].mxu0 %v333_v16  ;;  %v390_v16 = vld [vmem:[%s12111_s3 + $0x298] sm:$0xff] }
  0x5e   :  { %6825 = vmatprep.mubr.msk.f32.mxu0 %vm565_vm0, %v336_v17  ;;  %v436_v17 = vld [vmem:[%s12111_s3 + $0x408] sm:$0xff] }
  0x5f   :  { %6875 = vmatprep.mubr.msk.f32.mxu1 %vm565_vm0, %v436_v17  ;;  %v422_v17 = vld [vmem:[%s12111_s3 + $0x398] sm:$0xff] }
  0x61   :  { %1065 = vmatmul.mubr.f32.gmra.mrb[28].mxu0 %v335_v18  ;;  %v435_v18 = vld [vmem:[%s12111_s3 + $0x400] sm:$0xff] }
  0x62   :  { %6826 = vmatprep.mubr.msk.f32.mxu0 %vm565_vm0, %v338_v19  ;;  %v389_v19 = vld [vmem:[%s12111_s3 + $0x290] sm:$0xff]  ;;  %1315 = vmatmul.mubr.f32.gmra.mrb[2].mxu1 %v435_v18  ;;  %v468_v18 = vld [vmem:[%s12111_s3 + $0x508] sm:$0xff] }
  0x65   :  { %1070 = vmatmul.mubr.f32.gmra.mrb[30].mxu0 %v337_v20  ;;  %v392_v20 = vld [vmem:[%s12111_s3 + $0x2a8] sm:$0xff] }
  0x66   :  { %6827 = vmatprep.mubr.msk.f32.mxu0 %vm565_vm0, %v340_v21  ;;  %v438_v21 = vld [vmem:[%s12111_s3 + $0x418] sm:$0xff] }
  0x67   :  { %6876 = vmatprep.mubr.msk.f32.mxu1 %vm565_vm0, %v438_v21  ;;  %v424_v21 = vld [vmem:[%s12111_s3 + $0x3a8] sm:$0xff] }
  0x69   :  { %1075 = vmatmul.mubr.f32.gmra.mrb[32].mxu0 %v339_v22  ;;  %v437_v22 = vld [vmem:[%s12111_s3 + $0x410] sm:$0xff] }
  0x6a   :  { %6828 = vmatprep.mubr.msk.f32.mxu0 %vm565_vm0, %v342_v23  ;;  %v391_v23 = vld [vmem:[%s12111_s3 + $0x2a0] sm:$0xff]  ;;  %1320 = vmatmul.mubr.f32.gmra.mrb[4].mxu1 %v437_v22  ;;  %v470_v22 = vld [vmem:[%s12111_s3 + $0x518] sm:$0xff] }
  0x6d   :  { %1080 = vmatmul.mubr.f32.gmra.mrb[34].mxu0 %v341_v24  ;;  %v394_v24 = vld [vmem:[%s12111_s3 + $0x2b8] sm:$0xff] }
  0x6e   :  { %6829 = vmatprep.mubr.msk.f32.mxu0 %vm565_vm0, %v344_v25  ;;  %v440_v25 = vld [vmem:[%s12111_s3 + $0x428] sm:$0xff] }
  0x6f   :  { %6877 = vmatprep.mubr.msk.f32.mxu1 %vm565_vm0, %v440_v25  ;;  %v426_v25 = vld [vmem:[%s12111_s3 + $0x3b8] sm:$0xff] }
  0x70   :  { %1325 = vmatmul.mubr.f32.gmra.mrb[6].mxu1 %v439_v26  ;;  %v472_v26 = vld [vmem:[%s12111_s3 + $0x528] sm:$0xff] }
  0x71   :  { %1085 = vmatmul.mubr.f32.gmra.mrb[36].mxu0 %v343_v28  ;;  %v396_v28 = vld [vmem:[%s12111_s3 + $0x2c8] sm:$0xff]  ;;  %6878 = vmatprep.mubr.msk.f32.mxu1 %vm565_vm0, %v442_v29 }
  0x72   :  { %6830 = vmatprep.mubr.msk.f32.mxu0 %vm565_vm0, %v346_v30  ;;  %v441_v30 = vld [vmem:[%s12111_s3 + $0x430] sm:$0xff]  ;;  %v428_v29 = vld [vmem:[%s12111_s3 + $0x3c8] sm:$0xff] }
  0x74   :  { %1330 = vmatmul.mubr.f32.gmra.mrb[8].mxu1 %v441_v30  ;;  %v474_v30 = vld [vmem:[%s12111_s3 + $0x538] sm:$0xff] }
  0x75   :  { %1090 = vmatmul.mubr.f32.gmra.mrb[38].mxu0 %v345_v32  ;;  %v395_v32 = vld [vmem:[%s12111_s3 + $0x2c0] sm:$0xff] }
  0x76   :  { %6831 = vmatprep.mubr.msk.f32.mxu0 %vm565_vm0, %v348_v33  ;;  %v398_v33 = vld [vmem:[%s12111_s3 + $0x2d8] sm:$0xff] }
  0x79   :  { %1095 = vmatmul.mubr.f32.gmra.mrb[40].mxu0 %v347_v34  ;;  %v444_v34 = vld [vmem:[%s12111_s3 + $0x448] sm:$0xff] }
  0x7a   :  { %6832 = vmatprep.mubr.msk.f32.mxu0 %vm565_vm0, %v350_v35  ;;  %v443_v35 = vld [vmem:[%s12111_s3 + $0x440] sm:$0xff]  ;;  %6879 = vmatprep.mubr.msk.f32.mxu1 %vm565_vm0, %v444_v34  ;;  %v430_v34 = vld [vmem:[%s12111_s3 + $0x3d8] sm:$0xff] }
  0x7b   :  { %1335 = vmatmul.mubr.f32.gmra.mrb[10].mxu1 %v443_v35  ;;  %v476_v35 = vld [vmem:[%s12111_s3 + $0x548] sm:$0xff] }
  0x7d   :  { %1100 = vmatmul.mubr.f32.gmra.mrb[42].mxu0 %v349_v36  ;;  %v397_v36 = vld [vmem:[%s12111_s3 + $0x2d0] sm:$0xff] }
  0x7e   :  { %6833 = vmatprep.mubr.msk.f32.mxu0 %vm565_vm0, %v352_v37  ;;  %v400_v37 = vld [vmem:[%s12111_s3 + $0x2e8] sm:$0xff] }
  0x81   :  { %1105 = vmatmul.mubr.f32.gmra.mrb[44].mxu0 %v351_v38  ;;  %v446_v38 = vld [vmem:[%s12111_s3 + $0x458] sm:$0xff] }
  0x82   :  { %6834 = vmatprep.mubr.msk.f32.mxu0 %vm565_vm0, %v354_v39  ;;  %v445_v39 = vld [vmem:[%s12111_s3 + $0x450] sm:$0xff]  ;;  %6880 = vmatprep.mubr.msk.f32.mxu1 %vm565_vm0, %v446_v38  ;;  %v432_v38 = vld [vmem:[%s12111_s3 + $0x3e8] sm:$0xff] }
  0x83   :  { %1340 = vmatmul.mubr.f32.gmra.mrb[12].mxu1 %v445_v39  ;;  %v478_v39 = vld [vmem:[%s12111_s3 + $0x558] sm:$0xff] }
  0x85   :  { %1110 = vmatmul.mubr.f32.gmra.mrb[46].mxu0 %v353_v40  ;;  %v399_v40 = vld [vmem:[%s12111_s3 + $0x2e0] sm:$0xff] }
  0x86   :  { %6835 = vmatprep.mubr.msk.f32.mxu0 %vm565_vm0, %v356_v41  ;;  %v402_v41 = vld [vmem:[%s12111_s3 + $0x2f8] sm:$0xff] }
  0x89   :  { %1115 = vmatmul.mubr.f32.gmra.mrb[48].mxu0 %v355_v42  ;;  %v448_v42 = vld [vmem:[%s12111_s3 + $0x468] sm:$0xff] }
  0x8a   :  { %6836 = vmatprep.mubr.msk.f32.mxu0 %vm565_vm0, %v358_v43  ;;  %v447_v43 = vld [vmem:[%s12111_s3 + $0x460] sm:$0xff]  ;;  %6881 = vmatprep.mubr.msk.f32.mxu1 %vm565_vm0, %v448_v42  ;;  %v50_v42 = vld [vmem:[%s12110_s2 + $0x8] sm:$0xff] }
  0x8b   :  { %1345 = vmatmul.mubr.f32.gmra.mrb[14].mxu1 %v447_v43  ;;  %v480_v43 = vld [vmem:[%s12111_s3 + $0x568] sm:$0xff] }
  0x8d   :  { %1120 = vmatmul.mubr.f32.gmra.mrb[50].mxu0 %v357_v46  ;;  %v450_v46 = vld [vmem:[%s12111_s3 + $0x478] sm:$0xff] }
  0x8e   :  { %6837 = vmatprep.mubr.msk.f32.mxu0 %vm565_vm0, %v360_v48  ;;  %v403_v48 = vld [vmem:[%s12111_s3 + $0x300] sm:$0xff]  ;;  %6882 = vmatprep.mubr.msk.f32.mxu1 %vm565_vm0, %v450_v46  ;;  %v52_v46 = vld [vmem:[%s12110_s2 + $0x18] sm:$0xff] }
  0x8f   :  { %1350 = vmatmul.mubr.f32.gmra.mrb[16].mxu1 %v449_v47  ;;  %v482_v47 = vld [vmem:[%s12111_s3 + $0x578] sm:$0xff] }
  0x91   :  { %1125 = vmatmul.mubr.f32.gmra.mrb[52].mxu0 %v359_v49  ;;  %v406_v49 = vld [vmem:[%s12111_s3 + $0x318] sm:$0xff] }
  0x92   :  { %6838 = vmatprep.mubr.msk.f32.mxu0 %vm565_vm0, %v362_v50  ;;  %v452_v50 = vld [vmem:[%s12111_s3 + $0x488] sm:$0xff] }
  0x93   :  { %6883 = vmatprep.mubr.msk.f32.mxu1 %vm565_vm0, %v452_v50  ;;  %v54_v50 = vld [vmem:[%s12110_s2 + $0x28] sm:$0xff] }
  0x95   :  { %1130 = vmatmul.mubr.f32.gmra.mrb[54].mxu0 %v361_v51  ;;  %v451_v51 = vld [vmem:[%s12111_s3 + $0x480] sm:$0xff] }
  0x96   :  { %6839 = vmatprep.mubr.msk.f32.mxu0 %vm565_vm0, %v364_v31  ;;  %v405_v31 = vld [vmem:[%s12111_s3 + $0x310] sm:$0xff]  ;;  %1355 = vmatmul.mubr.f32.gmra.mrb[18].mxu1 %v451_v51  ;;  %v484_v51 = vld [vmem:[%s12111_s3 + $0x588] sm:$0xff] }
  0x99   :  { %1135 = vmatmul.mubr.f32.gmra.mrb[56].mxu0 %v363_v52  ;;  %v408_v52 = vld [vmem:[%s12111_s3 + $0x328] sm:$0xff] }
  0x9a   :  { %6840 = vmatprep.mubr.msk.f32.mxu0 %vm565_vm0, %v366_v53  ;;  %v454_v53 = vld [vmem:[%s12111_s3 + $0x498] sm:$0xff] }
  0x9b   :  { %6884 = vmatprep.mubr.msk.f32.mxu1 %vm565_vm0, %v454_v53  ;;  %v56_v53 = vld [vmem:[%s12110_s2 + $0x38] sm:$0xff] }
  0x9d   :  { %1140 = vmatmul.mubr.f32.gmra.mrb[58].mxu0 %v365_v54  ;;  %v453_v54 = vld [vmem:[%s12111_s3 + $0x490] sm:$0xff] }
  0x9e   :  { %6841 = vmatprep.mubr.msk.f32.mxu0 %vm565_vm0, %v368_v55  ;;  %v407_v55 = vld [vmem:[%s12111_s3 + $0x320] sm:$0xff]  ;;  %1360 = vmatmul.mubr.f32.gmra.mrb[20].mxu1 %v453_v54  ;;  %v486_v54 = vld [vmem:[%s12111_s3 + $0x598] sm:$0xff] }
  0xa1   :  { %1145 = vmatmul.mubr.f32.gmra.mrb[60].mxu0 %v367_v56  ;;  %v410_v56 = vld [vmem:[%s12111_s3 + $0x338] sm:$0xff] }
  0xa2   :  { %6842 = vmatprep.mubr.msk.f32.mxu0 %vm565_vm0, %v370_v57  ;;  %v456_v57 = vld [vmem:[%s12111_s3 + $0x4a8] sm:$0xff] }
  0xa3   :  { %6885 = vmatprep.mubr.msk.f32.mxu1 %vm565_vm0, %v456_v57  ;;  %v58_v57 = vld [vmem:[%s12110_s2 + $0x48] sm:$0xff] }
  0xa5   :  { %1150 = vmatmul.mubr.f32.gmra.mrb[62].mxu0 %v369_v58  ;;  %v455_v58 = vld [vmem:[%s12111_s3 + $0x4a0] sm:$0xff] }
  0xa6   :  { %6843 = vmatprep.mubr.msk.f32.mxu0 %vm565_vm0, %v372_v59  ;;  %v409_v59 = vld [vmem:[%s12111_s3 + $0x330] sm:$0xff]  ;;  %1365 = vmatmul.mubr.f32.gmra.mrb[22].mxu1 %v455_v58  ;;  %v488_v58 = vld [vmem:[%s12111_s3 + $0x5a8] sm:$0xff] }
  0xa9   :  { %1155 = vmatmul.mubr.f32.gmra.mrb[64].mxu0 %v371_v60  ;;  %v412_v60 = vld [vmem:[%s12111_s3 + $0x348] sm:$0xff] }
  0xaa   :  { %6844 = vmatprep.mubr.msk.f32.mxu0 %vm565_vm0, %v374_v61  ;;  %v458_v61 = vld [vmem:[%s12111_s3 + $0x4b8] sm:$0xff] }
  0xab   :  { %6886 = vmatprep.mubr.msk.f32.mxu1 %vm565_vm0, %v458_v61  ;;  %v60_v61 = vld [vmem:[%s12110_s2 + $0x58] sm:$0xff] }
  0xad   :  { %1160 = vmatmul.mubr.f32.gmra.mrb[66].mxu0 %v373_v62  ;;  %v457_v62 = vld [vmem:[%s12111_s3 + $0x4b0] sm:$0xff] }
  0xae   :  { %6845 = vmatprep.mubr.msk.f32.mxu0 %vm565_vm0, %v376_v63  ;;  %v411_v63 = vld [vmem:[%s12111_s3 + $0x340] sm:$0xff]  ;;  %1370 = vmatmul.mubr.f32.gmra.mrb[24].mxu1 %v457_v62  ;;  %v490_v62 = vld [vmem:[%s12111_s3 + $0x5b8] sm:$0xff] }
  0xb1   :  { %1165 = vmatmul.mubr.f32.gmra.mrb[68].mxu0 %v375_v0  ;;  %v414_v0 = vld [vmem:[%s12111_s3 + $0x358] sm:$0xff] }
  0xb2   :  { %6846 = vmatprep.mubr.msk.f32.mxu0 %vm565_vm0, %v378_v1  ;;  %v460_v1 = vld [vmem:[%s12111_s3 + $0x4c8] sm:$0xff] }
  0xb3   :  { %6887 = vmatprep.mubr.msk.f32.mxu1 %vm565_vm0, %v460_v1  ;;  %v62_v1 = vld [vmem:[%s12110_s2 + $0x68] sm:$0xff] }
  0xb5   :  { %1170 = vmatmul.mubr.f32.gmra.mrb[70].mxu0 %v377_v2  ;;  %v459_v2 = vld [vmem:[%s12111_s3 + $0x4c0] sm:$0xff] }
  0xb6   :  { %6847 = vmatprep.mubr.msk.f32.mxu0 %vm565_vm0, %v380_v3  ;;  %v413_v3 = vld [vmem:[%s12111_s3 + $0x350] sm:$0xff]  ;;  %1375 = vmatmul.mubr.f32.gmra.mrb[26].mxu1 %v459_v2  ;;  %v492_v2 = vld [vmem:[%s12111_s3 + $0x5c8] sm:$0xff] }
  0xb9   :  { %1175 = vmatmul.mubr.f32.gmra.mrb[72].mxu0 %v379_v4  ;;  %v416_v4 = vld [vmem:[%s12111_s3 + $0x368] sm:$0xff] }
  0xba   :  { %6848 = vmatprep.mubr.msk.f32.mxu0 %vm565_vm0, %v382_v6  ;;  %v462_v6 = vld [vmem:[%s12111_s3 + $0x4d8] sm:$0xff] }
  0xbb   :  { %6888 = vmatprep.mubr.msk.f32.mxu1 %vm565_vm0, %v462_v6  ;;  %v64_v6 = vld [vmem:[%s12110_s2 + $0x78] sm:$0xff] }
  0xbd   :  { %1180 = vmatmul.mubr.f32.gmra.mrb[74].mxu0 %v381_v7  ;;  %v461_v7 = vld [vmem:[%s12111_s3 + $0x4d0] sm:$0xff] }
  0xbe   :  { %6849 = vmatprep.mubr.msk.f32.mxu0 %vm565_vm0, %v384_v8  ;;  %v415_v8 = vld [vmem:[%s12111_s3 + $0x360] sm:$0xff]  ;;  %1380 = vmatmul.mubr.f32.gmra.mrb[28].mxu1 %v461_v7  ;;  %v494_v7 = vld [vmem:[%s12111_s3 + $0x5d8] sm:$0xff] }
  0xc1   :  { %1185 = vmatmul.mubr.f32.gmra.mrb[76].mxu0 %v383_v9  ;;  %v418_v9 = vld [vmem:[%s12111_s3 + $0x378] sm:$0xff] }
  0xc2   :  { %6850 = vmatprep.mubr.msk.f32.mxu0 %vm565_vm0, %v386_v10  ;;  %v464_v10 = vld [vmem:[%s12111_s3 + $0x4e8] sm:$0xff] }
  0xc3   :  { %6889 = vmatprep.mubr.msk.f32.mxu1 %vm565_vm0, %v464_v10  ;;  %v66_v10 = vld [vmem:[%s12110_s2 + $0x88] sm:$0xff] }
  0xc5   :  { %1190 = vmatmul.mubr.f32.gmra.mrb[78].mxu0 %v385_v11  ;;  %v463_v11 = vld [vmem:[%s12111_s3 + $0x4e0] sm:$0xff] }
  0xc6   :  { %6851 = vmatprep.mubr.msk.f32.mxu0 %vm565_vm0, %v388_v12  ;;  %v417_v12 = vld [vmem:[%s12111_s3 + $0x370] sm:$0xff]  ;;  %1385 = vmatmul.mubr.f32.gmra.mrb[30].mxu1 %v463_v11  ;;  %v496_v11 = vld [vmem:[%s12111_s3 + $0x5e8] sm:$0xff] }
  0xc7   :  { %6890 = vmatprep.mubr.msk.f32.mxu1 %vm565_vm0, %v466_v14  ;;  %v68_v14 = vld [vmem:[%s12110_s2 + $0x98] sm:$0xff] }
  0xc9   :  { %1195 = vmatmul.mubr.f32.gmra.mrb[80].mxu0 %v387_v15  ;;  %v465_v15 = vld [vmem:[%s12111_s3 + $0x4f0] sm:$0xff] }
  0xca   :  { %6852 = vmatprep.mubr.msk.f32.mxu0 %vm565_vm0, %v390_v16  ;;  %v419_v16 = vld [vmem:[%s12111_s3 + $0x380] sm:$0xff]  ;;  %1390 = vmatmul.mubr.f32.gmra.mrb[32].mxu1 %v465_v15  ;;  %v498_v15 = vld [vmem:[%s12111_s3 + $0x5f8] sm:$0xff] }
  0xcb   :  { %6891 = vmatprep.mubr.msk.f32.mxu1 %vm565_vm0, %v468_v18  ;;  %v70_v18 = vld [vmem:[%s12110_s2 + $0xa8] sm:$0xff] }
  0xcd   :  { %1200 = vmatmul.mubr.f32.gmra.mrb[82].mxu0 %v389_v19  ;;  %v467_v19 = vld [vmem:[%s12111_s3 + $0x500] sm:$0xff] }
  0xce   :  { %6853 = vmatprep.mubr.msk.f32.mxu0 %vm565_vm0, %v392_v20  ;;  %v421_v20 = vld [vmem:[%s12111_s3 + $0x390] sm:$0xff]  ;;  %1395 = vmatmul.mubr.f32.gmra.mrb[34].mxu1 %v467_v19  ;;  %v500_v19 = vld [vmem:[%s12111_s3 + $0x608] sm:$0xff] }
  0xcf   :  { %6892 = vmatprep.mubr.msk.f32.mxu1 %vm565_vm0, %v470_v22  ;;  %v72_v22 = vld [vmem:[%s12110_s2 + $0xb8] sm:$0xff] }
  0xd1   :  { %1205 = vmatmul.mubr.f32.gmra.mrb[84].mxu0 %v391_v23  ;;  %v469_v23 = vld [vmem:[%s12111_s3 + $0x510] sm:$0xff] }
  0xd2   :  { %6854 = vmatprep.mubr.msk.f32.mxu0 %vm565_vm0, %v394_v24  ;;  %v423_v24 = vld [vmem:[%s12111_s3 + $0x3a0] sm:$0xff]  ;;  %1400 = vmatmul.mubr.f32.gmra.mrb[36].mxu1 %v469_v23  ;;  %v502_v23 = vld [vmem:[%s12111_s3 + $0x618] sm:$0xff] }
  0xd3   :  { %6893 = vmatprep.mubr.msk.f32.mxu1 %vm565_vm0, %v472_v26  ;;  %v74_v26 = vld [vmem:[%s12110_s2 + $0xc8] sm:$0xff] }
  0xd5   :  { %1210 = vmatmul.mubr.f32.gmra.mrb[86].mxu0 %v393_v27  ;;  %v471_v27 = vld [vmem:[%s12111_s3 + $0x520] sm:$0xff] }
  0xd6   :  { %6855 = vmatprep.mubr.msk.f32.mxu0 %vm565_vm0, %v396_v28  ;;  %v425_v28 = vld [vmem:[%s12111_s3 + $0x3b0] sm:$0xff]  ;;  %1405 = vmatmul.mubr.f32.gmra.mrb[38].mxu1 %v471_v27  ;;  %v504_v27 = vld [vmem:[%s12111_s3 + $0x628] sm:$0xff] }
  0xd7   :  { %6894 = vmatprep.mubr.msk.f32.mxu1 %vm565_vm0, %v474_v30  ;;  %v76_v30 = vld [vmem:[%s12110_s2 + $0xd8] sm:$0xff] }
  0xd9   :  { %1215 = vmatmul.mubr.f32.gmra.mrb[88].mxu0 %v395_v32  ;;  %v473_v32 = vld [vmem:[%s12111_s3 + $0x530] sm:$0xff] }
  0xda   :  { %6856 = vmatprep.mubr.msk.f32.mxu0 %vm565_vm0, %v398_v33  ;;  %v427_v33 = vld [vmem:[%s12111_s3 + $0x3c0] sm:$0xff]  ;;  %1410 = vmatmul.mubr.f32.gmra.mrb[40].mxu1 %v473_v32  ;;  %v506_v32 = vld [vmem:[%s12111_s3 + $0x638] sm:$0xff] }
  0xdb   :  { %6895 = vmatprep.mubr.msk.f32.mxu1 %vm565_vm0, %v476_v35  ;;  %v78_v35 = vld [vmem:[%s12110_s2 + $0xe8] sm:$0xff] }
  0xdd   :  { %1220 = vmatmul.mubr.f32.gmra.mrb[90].mxu0 %v397_v36  ;;  %v475_v36 = vld [vmem:[%s12111_s3 + $0x540] sm:$0xff] }
  0xde   :  { %6857 = vmatprep.mubr.msk.f32.mxu0 %vm565_vm0, %v400_v37  ;;  %v429_v37 = vld [vmem:[%s12111_s3 + $0x3d0] sm:$0xff]  ;;  %1415 = vmatmul.mubr.f32.gmra.mrb[42].mxu1 %v475_v36  ;;  %v508_v36 = vld [vmem:[%s12111_s3 + $0x648] sm:$0xff] }
  0xdf   :  { %6896 = vmatprep.mubr.msk.f32.mxu1 %vm565_vm0, %v478_v39  ;;  %v80_v39 = vld [vmem:[%s12110_s2 + $0xf8] sm:$0xff] }
  0xe1   :  { %1225 = vmatmul.mubr.f32.gmra.mrb[92].mxu0 %v399_v40  ;;  %v477_v40 = vld [vmem:[%s12111_s3 + $0x550] sm:$0xff] }
  0xe2   :  { %6858 = vmatprep.mubr.msk.f32.mxu0 %vm565_vm0, %v402_v41  ;;  %v431_v41 = vld [vmem:[%s12111_s3 + $0x3e0] sm:$0xff]  ;;  %1420 = vmatmul.mubr.f32.gmra.mrb[44].mxu1 %v477_v40  ;;  %v510_v40 = vld [vmem:[%s12111_s3 + $0x658] sm:$0xff] }
  0xe3   :  { %6897 = vmatprep.mubr.msk.f32.mxu1 %vm565_vm0, %v480_v43  ;;  %v82_v43 = vld [vmem:[%s12110_s2 + $0x108] sm:$0xff] }
  0xe5   :  { %1230 = vmatmul.mubr.f32.gmra.mrb[94].mxu0 %v401_v44  ;;  %v479_v44 = vld [vmem:[%s12111_s3 + $0x560] sm:$0xff] }
  0xe6   :  { %6859 = vmatprep.mubr.msk.f32.mxu0 %vm565_vm0, %v404_v45  ;;  %v49_v45 = vld [vmem:[%s12110_s2] sm:$0xff]  ;;  %1425 = vmatmul.mubr.f32.gmra.mrb[46].mxu1 %v479_v44  ;;  %v512_v44 = vld [vmem:[%s12111_s3 + $0x668] sm:$0xff] }
  0xe7   :  { %6898 = vmatprep.mubr.msk.f32.mxu1 %vm565_vm0, %v482_v47  ;;  %v84_v47 = vld [vmem:[%s12110_s2 + $0x118] sm:$0xff] }
  0xe9   :  { %1235 = vmatmul.mubr.f32.gmra.mrb[96].mxu0 %v403_v48  ;;  %v481_v48 = vld [vmem:[%s12111_s3 + $0x570] sm:$0xff] }
  0xea   :  { %6860 = vmatprep.mubr.msk.f32.mxu0 %vm565_vm0, %v406_v49  ;;  %v51_v49 = vld [vmem:[%s12110_s2 + $0x10] sm:$0xff]  ;;  %1430 = vmatmul.mubr.f32.gmra.mrb[48].mxu1 %v481_v48  ;;  %v514_v48 = vld [vmem:[%s12111_s3 + $0x678] sm:$0xff] }
  0xeb   :  { %6899 = vmatprep.mubr.msk.f32.mxu1 %vm565_vm0, %v484_v51  ;;  %v86_v51 = vld [vmem:[%s12110_s2 + $0x128] sm:$0xff] }
  0xed   :  { %1240 = vmatmul.mubr.f32.gmra.mrb[98].mxu0 %v405_v31  ;;  %v483_v31 = vld [vmem:[%s12111_s3 + $0x580] sm:$0xff] }
  0xee   :  { %6861 = vmatprep.mubr.msk.f32.mxu0 %vm565_vm0, %v408_v52  ;;  %v53_v52 = vld [vmem:[%s12110_s2 + $0x20] sm:$0xff]  ;;  %1435 = vmatmul.mubr.f32.gmra.mrb[50].mxu1 %v483_v31  ;;  %v516_v31 = vld [vmem:[%s12111_s3 + $0x688] sm:$0xff] }
  0xef   :  { %6900 = vmatprep.mubr.msk.f32.mxu1 %vm565_vm0, %v486_v54  ;;  %v88_v54 = vld [vmem:[%s12110_s2 + $0x138] sm:$0xff] }
  0xf1   :  { %1245 = vmatmul.mubr.f32.gmra.mrb[100].mxu0 %v407_v55  ;;  %v485_v55 = vld [vmem:[%s12111_s3 + $0x590] sm:$0xff] }
  0xf2   :  { %6862 = vmatprep.mubr.msk.f32.mxu0 %vm565_vm0, %v410_v56  ;;  %v55_v56 = vld [vmem:[%s12110_s2 + $0x30] sm:$0xff]  ;;  %1440 = vmatmul.mubr.f32.gmra.mrb[52].mxu1 %v485_v55  ;;  %v518_v55 = vld [vmem:[%s12111_s3 + $0x698] sm:$0xff] }
  0xf3   :  { %6901 = vmatprep.mubr.msk.f32.mxu1 %vm565_vm0, %v488_v58  ;;  %v90_v58 = vld [vmem:[%s12110_s2 + $0x148] sm:$0xff] }
  0xf5   :  { %1250 = vmatmul.mubr.f32.gmra.mrb[102].mxu0 %v409_v59  ;;  %v487_v59 = vld [vmem:[%s12111_s3 + $0x5a0] sm:$0xff] }
  0xf6   :  { %6863 = vmatprep.mubr.msk.f32.mxu0 %vm565_vm0, %v412_v60  ;;  %v57_v60 = vld [vmem:[%s12110_s2 + $0x40] sm:$0xff]  ;;  %1445 = vmatmul.mubr.f32.gmra.mrb[54].mxu1 %v487_v59  ;;  %v520_v59 = vld [vmem:[%s12111_s3 + $0x6a8] sm:$0xff] }
  0xf7   :  { %6902 = vmatprep.mubr.msk.f32.mxu1 %vm565_vm0, %v490_v62  ;;  %v92_v62 = vld [vmem:[%s12110_s2 + $0x158] sm:$0xff] }
  0xf9   :  { %1255 = vmatmul.mubr.f32.gmra.mrb[104].mxu0 %v411_v63  ;;  %v489_v63 = vld [vmem:[%s12111_s3 + $0x5b0] sm:$0xff] }
  0xfa   :  { %6864 = vmatprep.mubr.msk.f32.mxu0 %vm565_vm0, %v414_v0  ;;  %v59_v0 = vld [vmem:[%s12110_s2 + $0x50] sm:$0xff]  ;;  %1450 = vmatmul.mubr.f32.gmra.mrb[56].mxu1 %v489_v63  ;;  %v522_v63 = vld [vmem:[%s12111_s3 + $0x6b8] sm:$0xff] }
  0xfb   :  { %6903 = vmatprep.mubr.msk.f32.mxu1 %vm565_vm0, %v492_v2  ;;  %v94_v2 = vld [vmem:[%s12110_s2 + $0x168] sm:$0xff] }
  0xfd   :  { %1260 = vmatmul.mubr.f32.gmra.mrb[106].mxu0 %v413_v3  ;;  %v491_v3 = vld [vmem:[%s12111_s3 + $0x5c0] sm:$0xff] }
  0xfe   :  { %6865 = vmatprep.mubr.msk.f32.mxu0 %vm565_vm0, %v416_v4  ;;  %v61_v4 = vld [vmem:[%s12110_s2 + $0x60] sm:$0xff]  ;;  %1455 = vmatmul.mubr.f32.gmra.mrb[58].mxu1 %v491_v3  ;;  %v524_v3 = vld [vmem:[%s12111_s3 + $0x6c8] sm:$0xff] }
  0xff   :  { %6904 = vmatprep.mubr.msk.f32.mxu1 %vm565_vm0, %v494_v7  ;;  %v96_v7 = vld [vmem:[%s12110_s2 + $0x178] sm:$0xff] }
 0x101   :  { %1265 = vmatmul.mubr.f32.gmra.mrb[108].mxu0 %v415_v8  ;;  %v493_v8 = vld [vmem:[%s12111_s3 + $0x5d0] sm:$0xff] }
 0x102   :  { %6866 = vmatprep.mubr.msk.f32.mxu0 %vm565_vm0, %v418_v9  ;;  %v63_v9 = vld [vmem:[%s12110_s2 + $0x70] sm:$0xff]  ;;  %1460 = vmatmul.mubr.f32.gmra.mrb[60].mxu1 %v493_v8  ;;  %v526_v8 = vld [vmem:[%s12111_s3 + $0x6d8] sm:$0xff] }
 0x103   :  { %6905 = vmatprep.mubr.msk.f32.mxu1 %vm565_vm0, %v496_v11  ;;  %v98_v11 = vld [vmem:[%s12110_s2 + $0x188] sm:$0xff] }
 0x105   :  { %1270 = vmatmul.mubr.f32.gmra.mrb[110].mxu0 %v417_v12  ;;  %v495_v12 = vld [vmem:[%s12111_s3 + $0x5e0] sm:$0xff] }
 0x106   :  { %6867 = vmatprep.mubr.msk.f32.mxu0 %vm565_vm0, %v420_v13  ;;  %v65_v13 = vld [vmem:[%s12110_s2 + $0x80] sm:$0xff]  ;;  %1465 = vmatmul.mubr.f32.gmra.mrb[62].mxu1 %v495_v12  ;;  %v528_v12 = vld [vmem:[%s12111_s3 + $0x6e8] sm:$0xff] }
 0x107   :  { %6906 = vmatprep.mubr.msk.f32.mxu1 %vm565_vm0, %v498_v15  ;;  %v100_v15 = vld [vmem:[%s12110_s2 + $0x198] sm:$0xff] }
 0x109   :  { %1275 = vmatmul.mubr.f32.gmra.mrb[112].mxu0 %v419_v16  ;;  %v497_v16 = vld [vmem:[%s12111_s3 + $0x5f0] sm:$0xff] }
 0x10a   :  { %6868 = vmatprep.mubr.msk.f32.mxu0 %vm565_vm0, %v422_v17  ;;  %v67_v17 = vld [vmem:[%s12110_s2 + $0x90] sm:$0xff]  ;;  %1470 = vmatmul.mubr.f32.gmra.mrb[64].mxu1 %v497_v16  ;;  %v530_v16 = vld [vmem:[%s12111_s3 + $0x6f8] sm:$0xff] }
 0x10b   :  { %6907 = vmatprep.mubr.msk.f32.mxu1 %vm565_vm0, %v500_v19  ;;  %v99_v19 = vld [vmem:[%s12110_s2 + $0x190] sm:$0xff] }
 0x10d   :  { %1280 = vmatmul.mubr.f32.gmra.mrb[114].mxu0 %v421_v20  ;;  %v499_v20 = vld [vmem:[%s12111_s3 + $0x600] sm:$0xff] }
 0x10e   :  { %6869 = vmatprep.mubr.msk.f32.mxu0 %vm565_vm0, %v424_v21  ;;  %v69_v21 = vld [vmem:[%s12110_s2 + $0xa0] sm:$0xff]  ;;  %1475 = vmatmul.mubr.f32.gmra.mrb[66].mxu1 %v499_v20 }
 0x10f   :  { %6908 = vmatprep.mubr.msk.f32.mxu1 %vm565_vm0, %v502_v23  ;;  %v532_v23 = vld [vmem:[%s12111_s3 + $0x708] sm:$0xff] }
 0x111   :  { %1285 = vmatmul.mubr.f32.gmra.mrb[116].mxu0 %v423_v24  ;;  %v501_v24 = vld [vmem:[%s12111_s3 + $0x610] sm:$0xff] }
 0x112   :  { %6870 = vmatprep.mubr.msk.f32.mxu0 %vm565_vm0, %v426_v25  ;;  %v71_v25 = vld [vmem:[%s12110_s2 + $0xb0] sm:$0xff]  ;;  %1480 = vmatmul.mubr.f32.gmra.mrb[68].mxu1 %v501_v24  ;;  %v531_v24 = vld [vmem:[%s12111_s3 + $0x700] sm:$0xff] }
 0x113   :  { %6909 = vmatprep.mubr.msk.f32.mxu1 %vm565_vm0, %v504_v27  ;;  %v534_v27 = vld [vmem:[%s12111_s3 + $0x718] sm:$0xff] }
 0x115   :  { %1290 = vmatmul.mubr.f32.gmra.mrb[118].mxu0 %v425_v28  ;;  %v503_v28 = vld [vmem:[%s12111_s3 + $0x620] sm:$0xff] }
 0x116   :  { %6871 = vmatprep.mubr.msk.f32.mxu0 %vm565_vm0, %v428_v29  ;;  %v73_v29 = vld [vmem:[%s12110_s2 + $0xc0] sm:$0xff]  ;;  %1485 = vmatmul.mubr.f32.gmra.mrb[70].mxu1 %v503_v28  ;;  %v533_v28 = vld [vmem:[%s12111_s3 + $0x710] sm:$0xff] }
 0x117   :  { %6910 = vmatprep.mubr.msk.f32.mxu1 %vm565_vm0, %v506_v32  ;;  %v536_v32 = vld [vmem:[%s12111_s3 + $0x728] sm:$0xff] }
 0x119   :  { %1295 = vmatmul.mubr.f32.gmra.mrb[120].mxu0 %v427_v33  ;;  %v505_v33 = vld [vmem:[%s12111_s3 + $0x630] sm:$0xff] }
 0x11a   :  { %6872 = vmatprep.mubr.msk.f32.mxu0 %vm565_vm0, %v430_v34  ;;  %v75_v34 = vld [vmem:[%s12110_s2 + $0xd0] sm:$0xff]  ;;  %1490 = vmatmul.mubr.f32.gmra.mrb[72].mxu1 %v505_v33  ;;  %v535_v33 = vld [vmem:[%s12111_s3 + $0x720] sm:$0xff] }
 0x11b   :  { %6911 = vmatprep.mubr.msk.f32.mxu1 %vm565_vm0, %v508_v36  ;;  %v538_v36 = vld [vmem:[%s12111_s3 + $0x738] sm:$0xff] }
 0x11d   :  { %1300 = vmatmul.mubr.f32.gmra.mrb[122].mxu0 %v429_v37  ;;  %v507_v37 = vld [vmem:[%s12111_s3 + $0x640] sm:$0xff] }
 0x11e   :  { %6873 = vmatprep.mubr.msk.f32.mxu0 %vm565_vm0, %v432_v38  ;;  %v77_v38 = vld [vmem:[%s12110_s2 + $0xe0] sm:$0xff]  ;;  %1495 = vmatmul.mubr.f32.gmra.mrb[74].mxu1 %v507_v37  ;;  %v537_v37 = vld [vmem:[%s12111_s3 + $0x730] sm:$0xff] }
 0x11f   :  { %6912 = vmatprep.mubr.msk.f32.mxu1 %vm565_vm0, %v510_v40  ;;  %v540_v40 = vld [vmem:[%s12111_s3 + $0x748] sm:$0xff] }
 0x121   :  { %1305 = vmatmul.mubr.f32.gmra.mrb[124].mxu0 %v431_v41  ;;  %v509_v41 = vld [vmem:[%s12111_s3 + $0x650] sm:$0xff] }
 0x122   :  { %6932 = vmatprep.mubr.msk.f32.mxu0 %vm565_vm0, %v50_v42  ;;  %v79_v42 = vld [vmem:[%s12110_s2 + $0xf0] sm:$0xff]  ;;  %1500 = vmatmul.mubr.f32.gmra.mrb[76].mxu1 %v509_v41  ;;  %v539_v41 = vld [vmem:[%s12111_s3 + $0x740] sm:$0xff] }
 0x123   :  { %6913 = vmatprep.mubr.msk.f32.mxu1 %vm565_vm0, %v512_v44  ;;  %v7054_v44 = vld [vmem:[%s12112_s4 + $0x58] sm:$0xff] }
 0x125   :  { %2023 = vmatmul.mubr.f32.vlgmr.msra.gmra.mrb[0].mxu0 %v49_v45  ;;  %v511_v45 = vld [vmem:[%s12111_s3 + $0x660] sm:$0xff] }
 0x126   :  { %6933 = vmatprep.mubr.msk.f32.mxu0 %vm565_vm0, %v52_v46  ;;  %v81_v46 = vld [vmem:[%s12110_s2 + $0x100] sm:$0xff]  ;;  %1505 = vmatmul.mubr.f32.gmra.mrb[78].mxu1 %v511_v45 }
 0x127   :  { %6914 = vmatprep.mubr.msk.f32.mxu1 %vm565_vm0, %v514_v48  ;;  %v7055_v45 = vld [vmem:[%s12112_s4 + $0x60] sm:$0xff]  ;;  %v541_v48 = vld [vmem:[%s12111_s3 + $0x750] sm:$0xff] }
 0x129   :  { %2028 = vmatmul.mubr.f32.gmra.mrb[2].mxu0 %v51_v49  ;;  %v513_v49 = vld [vmem:[%s12111_s3 + $0x670] sm:$0xff] }
 0x12a   :  { %6934 = vmatprep.mubr.msk.f32.mxu0 %vm565_vm0, %v54_v50  ;;  %v83_v50 = vld [vmem:[%s12110_s2 + $0x110] sm:$0xff]  ;;  %1510 = vmatmul.mubr.f32.gmra.mrb[80].mxu1 %v513_v49 }
 0x12b   :  { %6915 = vmatprep.mubr.msk.f32.mxu1 %vm565_vm0, %v516_v31  ;;  %v111_v49 = vld [vmem:[%s12110_s2 + $0x1f0] sm:$0xff] }
 0x12c   :  { %v7057_v31 = vld [vmem:[%s12112_s4 + $0x70] sm:$0xff] }
 0x12d   :  { %2033 = vmatmul.mubr.f32.gmra.mrb[4].mxu0 %v53_v52  ;;  %v515_v52 = vld [vmem:[%s12111_s3 + $0x680] sm:$0xff] }
 0x12e   :  { %6935 = vmatprep.mubr.msk.f32.mxu0 %vm565_vm0, %v56_v53  ;;  %v85_v53 = vld [vmem:[%s12110_s2 + $0x120] sm:$0xff]  ;;  %1515 = vmatmul.mubr.f32.gmra.mrb[82].mxu1 %v515_v52  ;;  %v544_v52 = vld [vmem:[%s12111_s3 + $0x768] sm:$0xff] }
 0x12f   :  { %6916 = vmatprep.mubr.msk.f32.mxu1 %vm565_vm0, %v518_v55  ;;  %v113_v55 = vld [vmem:[%s12110_s2 + $0x200] sm:$0xff] }
 0x131   :  { %2038 = vmatmul.mubr.f32.gmra.mrb[6].mxu0 %v55_v56  ;;  %v517_v56 = vld [vmem:[%s12111_s3 + $0x690] sm:$0xff] }
 0x132   :  { %6936 = vmatprep.mubr.msk.f32.mxu0 %vm565_vm0, %v58_v57  ;;  %v87_v57 = vld [vmem:[%s12110_s2 + $0x130] sm:$0xff]  ;;  %1520 = vmatmul.mubr.f32.gmra.mrb[84].mxu1 %v517_v56  ;;  %v116_v56 = vld [vmem:[%s12110_s2 + $0x218] sm:$0xff] }
 0x133   :  { %6917 = vmatprep.mubr.msk.f32.mxu1 %vm565_vm0, %v520_v59  ;;  %v546_v59 = vld [vmem:[%s12111_s3 + $0x778] sm:$0xff] }
 0x135   :  { %2043 = vmatmul.mubr.f32.gmra.mrb[8].mxu0 %v57_v60  ;;  %v519_v60 = vld [vmem:[%s12111_s3 + $0x6a0] sm:$0xff] }
 0x136   :  { %6937 = vmatprep.mubr.msk.f32.mxu0 %vm565_vm0, %v60_v61  ;;  %v89_v61 = vld [vmem:[%s12110_s2 + $0x140] sm:$0xff]  ;;  %1525 = vmatmul.mubr.f32.gmra.mrb[86].mxu1 %v519_v60 }
 0x137   :  { %6918 = vmatprep.mubr.msk.f32.mxu1 %vm565_vm0, %v522_v63  ;;  %v118_v63 = vld [vmem:[%s12110_s2 + $0x228] sm:$0xff] }
 0x139   :  { %2048 = vmatmul.mubr.f32.gmra.mrb[10].mxu0 %v59_v0  ;;  %v521_v0 = vld [vmem:[%s12111_s3 + $0x6b0] sm:$0xff] }
 0x13a   :  { %6938 = vmatprep.mubr.msk.f32.mxu0 %vm565_vm0, %v62_v1  ;;  %v91_v1 = vld [vmem:[%s12110_s2 + $0x150] sm:$0xff]  ;;  %1530 = vmatmul.mubr.f32.gmra.mrb[88].mxu1 %v521_v0  ;;  %v7060_v0 = vld [vmem:[%s12112_s4 + $0x88] sm:$0x3f] }
 0x13b   :  { %6919 = vmatprep.mubr.msk.f32.mxu1 %vm565_vm0, %v524_v3  ;;  %v119_v3 = vld [vmem:[%s12110_s2 + $0x230] sm:$0xff] }
 0x13d   :  { %2053 = vmatmul.mubr.f32.gmra.mrb[12].mxu0 %v61_v4  ;;  %v523_v4 = vld [vmem:[%s12111_s3 + $0x6c0] sm:$0xff] }
 0x13e   :  { %6939 = vmatprep.mubr.msk.f32.mxu0 %vm565_vm0, %v64_v6  ;;  %v93_v6 = vld [vmem:[%s12110_s2 + $0x160] sm:$0xff]  ;;  %1535 = vmatmul.mubr.f32.gmra.mrb[90].mxu1 %v523_v4  ;;  %v122_v4 = vld [vmem:[%s12110_s2 + $0x248] sm:$0xff] }
 0x13f   :  { %6920 = vmatprep.mubr.msk.f32.mxu1 %vm565_vm0, %v526_v8  ;;  %v123_v8 = vld [vmem:[%s12110_s2 + $0x250] sm:$0xff] }
 0x141   :  { %2058 = vmatmul.mubr.f32.gmra.mrb[14].mxu0 %v63_v9  ;;  %v525_v9 = vld [vmem:[%s12111_s3 + $0x6d0] sm:$0xff] }
 0x142   :  { %6940 = vmatprep.mubr.msk.f32.mxu0 %vm565_vm0, %v66_v10  ;;  %v95_v10 = vld [vmem:[%s12110_s2 + $0x170] sm:$0xff]  ;;  %1540 = vmatmul.mubr.f32.gmra.mrb[92].mxu1 %v525_v9  ;;  %v126_v9 = vld [vmem:[%s12110_s2 + $0x268] sm:$0xff] }
 0x143   :  { %6921 = vmatprep.mubr.msk.f32.mxu1 %vm565_vm0, %v528_v12  ;;  %v127_v12 = vld [vmem:[%s12110_s2 + $0x270] sm:$0xff] }
 0x145   :  { %2063 = vmatmul.mubr.f32.gmra.mrb[16].mxu0 %v65_v13  ;;  %v527_v13 = vld [vmem:[%s12111_s3 + $0x6e0] sm:$0xff] }
 0x146   :  { %6941 = vmatprep.mubr.msk.f32.mxu0 %vm565_vm0, %v68_v14  ;;  %v97_v14 = vld [vmem:[%s12110_s2 + $0x180] sm:$0xff]  ;;  %1545 = vmatmul.mubr.f32.gmra.mrb[94].mxu1 %v527_v13  ;;  %v130_v13 = vld [vmem:[%s12110_s2 + $0x288] sm:$0xff] }
 0x147   :  { %6922 = vmatprep.mubr.msk.f32.mxu1 %vm565_vm0, %v530_v16  ;;  %v2623_v16 = vld [vmem:[%s12112_s4] sm:$0xff] }
 0x149   :  { %2068 = vmatmul.mubr.f32.gmra.mrb[18].mxu0 %v67_v17  ;;  %v7052_v17 = vld [vmem:[%s12112_s4 + $0x48] sm:$0xff] }
 0x14a   :  { %6942 = vmatprep.mubr.msk.f32.mxu0 %vm565_vm0, %v70_v18  ;;  %v7053_v18 = vld [vmem:[%s12112_s4 + $0x50] sm:$0xff] }
 0x14b   :  { %v8498_v20 = vpack.c.bf16 %v7053_v18, %v7052_v17  ;;  %v2624_v17 = vld [vmem:[%s12112_s4 + $0x8] sm:$0xff] }
 0x14c   :  { %v10500_v18 = vpack.c.bf16 %v2624_v17, %v2623_v16  ;;  %v173_v16 = vld [vmem:[%s12110_s2 + $0x3e0] sm:$0xff]  ;;  %v176_v17 = vld [vmem:[%s12110_s2 + $0x3f8] sm:$0xff] }
 0x14d   :  { %2073 = vmatmul.mubr.f32.gmra.mrb[20].mxu0 %v69_v21  ;;  %v529_v21 = vld [vmem:[%s12111_s3 + $0x6f0] sm:$0xff]  ;;  %8499 = vmatprep.subr.bf16.mxu1 %v8498_v20 }
 0x14e   :  { %6943 = vmatprep.mubr.msk.f32.mxu0 %vm565_vm0, %v72_v22  ;;  %v102_v22 = vld [vmem:[%s12110_s2 + $0x1a8] sm:$0xff]  ;;  %1550 = vmatmul.mubr.f32.gmra.mrb[96].mxu1 %v529_v21  ;;  %v133_v21 = vld [vmem:[%s12110_s2 + $0x2a0] sm:$0xff] }
 0x14f   :  { %8501 = vmatpush3.bf16.msra.mxu1 %v8498_v20  ;;  %6923 = vmatprep.mubr.msk.f32.mxu1 %vm565_vm0, %v532_v23  ;;  %v134_v20 = vld [vmem:[%s12110_s2 + $0x2a8] sm:$0xff]  ;;  %v135_v23 = vld [vmem:[%s12110_s2 + $0x2b0] sm:$0xff] }
 0x151   :  { %2078 = vmatmul.mubr.f32.gmra.mrb[22].mxu0 %v71_v25  ;;  %v101_v25 = vld [vmem:[%s12110_s2 + $0x1a0] sm:$0xff] }
 0x152   :  { %6944 = vmatprep.mubr.msk.f32.mxu0 %vm565_vm0, %v74_v26  ;;  %v104_v26 = vld [vmem:[%s12110_s2 + $0x1b8] sm:$0xff]  ;;  %1555 = vmatmul.mubr.f32.gmra.mrb[98].mxu1 %v531_v24  ;;  %v138_v24 = vld [vmem:[%s12110_s2 + $0x2c8] sm:$0xff] }
 0x153   :  { %6924 = vmatprep.mubr.msk.f32.mxu1 %vm565_vm0, %v534_v27  ;;  %v139_v27 = vld [vmem:[%s12110_s2 + $0x2d0] sm:$0xff] }
 0x155   :  { %2083 = vmatmul.mubr.f32.gmra.mrb[24].mxu0 %v73_v29  ;;  %v103_v29 = vld [vmem:[%s12110_s2 + $0x1b0] sm:$0xff] }
 0x156   :  { %6945 = vmatprep.mubr.msk.f32.mxu0 %vm565_vm0, %v76_v30  ;;  %v106_v30 = vld [vmem:[%s12110_s2 + $0x1c8] sm:$0xff]  ;;  %1560 = vmatmul.mubr.f32.gmra.mrb[100].mxu1 %v533_v28 }
 0x157   :  { %6925 = vmatprep.mubr.msk.f32.mxu1 %vm565_vm0, %v536_v32  ;;  %v142_v28 = vld [vmem:[%s12110_s2 + $0x2e8] sm:$0xff]  ;;  %v143_v32 = vld [vmem:[%s12110_s2 + $0x2f0] sm:$0xff] }
 0x159   :  { %2088 = vmatmul.mubr.f32.gmra.mrb[26].mxu0 %v75_v34  ;;  %v105_v34 = vld [vmem:[%s12110_s2 + $0x1c0] sm:$0xff] }
 0x15a   :  { %6946 = vmatprep.mubr.msk.f32.mxu0 %vm565_vm0, %v78_v35  ;;  %v108_v35 = vld [vmem:[%s12110_s2 + $0x1d8] sm:$0xff]  ;;  %1565 = vmatmul.mubr.f32.gmra.mrb[102].mxu1 %v535_v33  ;;  %v146_v33 = vld [vmem:[%s12110_s2 + $0x308] sm:$0xff] }
 0x15b   :  { %6926 = vmatprep.mubr.msk.f32.mxu1 %vm565_vm0, %v538_v36  ;;  %v147_v36 = vld [vmem:[%s12110_s2 + $0x310] sm:$0xff] }
 0x15d   :  { %2093 = vmatmul.mubr.f32.gmra.mrb[28].mxu0 %v77_v38  ;;  %v107_v38 = vld [vmem:[%s12110_s2 + $0x1d0] sm:$0xff] }
 0x15e   :  { %6947 = vmatprep.mubr.msk.f32.mxu0 %vm565_vm0, %v80_v39  ;;  %v110_v39 = vld [vmem:[%s12110_s2 + $0x1e8] sm:$0xff]  ;;  %1570 = vmatmul.mubr.f32.gmra.mrb[104].mxu1 %v537_v37 }
 0x15f   :  { %6927 = vmatprep.mubr.msk.f32.mxu1 %vm565_vm0, %v540_v40  ;;  %v150_v37 = vld [vmem:[%s12110_s2 + $0x328] sm:$0xff]  ;;  %v151_v40 = vld [vmem:[%s12110_s2 + $0x330] sm:$0xff] }
 0x161   :  { %2098 = vmatmul.mubr.f32.gmra.mrb[30].mxu0 %v79_v42  ;;  %v109_v42 = vld [vmem:[%s12110_s2 + $0x1e0] sm:$0xff] }
 0x162   :  { %6948 = vmatprep.mubr.msk.f32.mxu0 %vm565_vm0, %v82_v43  ;;  %v112_v43 = vld [vmem:[%s12110_s2 + $0x1f8] sm:$0xff]  ;;  %1575 = vmatmul.mubr.f32.gmra.mrb[106].mxu1 %v539_v41  ;;  %v154_v41 = vld [vmem:[%s12110_s2 + $0x348] sm:$0xff] }
 0x165   :  { %2103 = vmatmul.mubr.f32.gmra.mrb[32].mxu0 %v81_v46  ;;  %v542_v46 = vld [vmem:[%s12111_s3 + $0x758] sm:$0xff] }
 0x166   :  { %6949 = vmatprep.mubr.msk.f32.mxu0 %vm565_vm0, %v84_v47  ;;  %v8502_v47 = vpack.c.bf16 %v7055_v45, %v7054_v44  ;;  %6928 = vmatprep.mubr.msk.f32.mxu1 %vm565_vm0, %v542_v46  ;;  %v155_v44 = vld [vmem:[%s12110_s2 + $0x350] sm:$0xff]  ;;  %v158_v45 = vld [vmem:[%s12110_s2 + $0x368] sm:$0xff] }
 0x167   :  { %1580 = vmatmul.mubr.f32.gmra.mrb[108].mxu1 %v541_v48  ;;  %v157_v48 = vld [vmem:[%s12110_s2 + $0x360] sm:$0xff] }
 0x168   :  { %8503 = vmatprep.subr.bf16.mxu1 %v8502_v47  ;;  %6929 = vmatprep.mubr.msk.f32.mxu1 %vm565_vm0, %v544_v52  ;;  %v162_v52 = vld [vmem:[%s12110_s2 + $0x388] sm:$0xff] }
 0x169   :  { %2108 = vmatmul.mubr.f32.gmra.mrb[34].mxu0 %v83_v50  ;;  %v114_v50 = vld [vmem:[%s12110_s2 + $0x208] sm:$0xff]  ;;  %8505 = vmatpush3.bf16.msra.mxu1 %v8502_v47 }
 0x16a   :  { %6950 = vmatprep.mubr.msk.f32.mxu0 %vm565_vm0, %v86_v51  ;;  %v7056_v51 = vld [vmem:[%s12112_s4 + $0x68] sm:$0xff] }
 0x16d   :  { %2113 = vmatmul.mubr.f32.gmra.mrb[36].mxu0 %v85_v53  ;;  %v8506_v53 = vpack.c.bf16 %v7057_v31, %v7056_v51  ;;  %v159_v31 = vld [vmem:[%s12110_s2 + $0x370] sm:$0xff] }
 0x16e   :  { %6951 = vmatprep.mubr.msk.f32.mxu0 %vm565_vm0, %v88_v54  ;;  %v543_v54 = vld [vmem:[%s12111_s3 + $0x760] sm:$0xff] }
 0x16f   :  { %8507 = vmatprep.subr.bf16.mxu1 %v8506_v53  ;;  %1585 = vmatmul.mubr.f32.gmra.mrb[110].mxu1 %v543_v54 }
 0x170   :  { %8509 = vmatpush3.bf16.msra.mxu1 %v8506_v53  ;;  %6930 = vmatprep.mubr.msk.f32.mxu1 %vm565_vm0, %v546_v59  ;;  %v163_v59 = vld [vmem:[%s12110_s2 + $0x390] sm:$0xff] }
 0x171   :  { %2118 = vmatmul.mubr.f32.gmra.mrb[38].mxu0 %v87_v57  ;;  %v7058_v57 = vld [vmem:[%s12112_s4 + $0x78] sm:$0xff] }
 0x172   :  { %6952 = vmatprep.mubr.msk.f32.mxu0 %vm565_vm0, %v90_v58  ;;  %v7059_v58 = vld [vmem:[%s12112_s4 + $0x80] sm:$0xff] }
 0x173   :  { %v8510_v60 = vpack.c.bf16 %v7059_v58, %v7058_v57 }
 0x175   :  { %2123 = vmatmul.mubr.f32.gmra.mrb[40].mxu0 %v89_v61  ;;  %v545_v61 = vld [vmem:[%s12111_s3 + $0x770] sm:$0xff]  ;;  %8511 = vmatprep.subr.bf16.mxu1 %v8510_v60 }
 0x176   :  { %6953 = vmatprep.mubr.msk.f32.mxu0 %vm565_vm0, %v92_v62  ;;  %v115_v62 = vld [vmem:[%s12110_s2 + $0x210] sm:$0xff]  ;;  %1590 = vmatmul.mubr.f32.gmra.mrb[112].mxu1 %v545_v61 }
 0x177   :  { %8513 = vmatpush3.bf16.msra.mxu1 %v8510_v60  ;;  %v166_v60 = vld [vmem:[%s12110_s2 + $0x3a8] sm:$0xff] }
 0x178   :  { %7813 = vmatprep.subr.msk.mxu1 %vm2679_vm4, %v7060_v0 }
 0x179   :  { %2128 = vmatmul.mubr.f32.gmra.mrb[42].mxu0 %v91_v1  ;;  %v117_v1 = vld [vmem:[%s12110_s2 + $0x220] sm:$0xff] }
 0x17a   :  { %6954 = vmatprep.mubr.msk.f32.mxu0 %vm565_vm0, %v94_v2  ;;  %v120_v2 = vld [vmem:[%s12110_s2 + $0x238] sm:$0xff] }
 0x17b   :  { %7814 = vmatpush3.msk.msra.mxu1 %vm2679_vm4, %v7060_v0  ;;  %v168_v0 = vld [vmem:[%s12110_s2 + $0x3b8] sm:$0xff] }
 0x17c   :  { %8515 = vmatprep.subr.bf16.mxu1 %v10500_v18 }
 0x17d   :  { %2133 = vmatmul.mubr.f32.gmra.mrb[44].mxu0 %v93_v6  ;;  %v121_v6 = vld [vmem:[%s12110_s2 + $0x240] sm:$0xff] }
 0x17e   :  { %6955 = vmatprep.mubr.msk.f32.mxu0 %vm565_vm0, %v96_v7  ;;  %v124_v7 = vld [vmem:[%s12110_s2 + $0x258] sm:$0xff] }
 0x181   :  { %2138 = vmatmul.mubr.f32.gmra.mrb[46].mxu0 %v95_v10  ;;  %v125_v10 = vld [vmem:[%s12110_s2 + $0x260] sm:$0xff] }
 0x182   :  { %6956 = vmatprep.mubr.msk.f32.mxu0 %vm565_vm0, %v98_v11  ;;  %v128_v11 = vld [vmem:[%s12110_s2 + $0x278] sm:$0xff] }
 0x185   :  { %2143 = vmatmul.mubr.f32.gmra.mrb[48].mxu0 %v97_v14  ;;  %v129_v14 = vld [vmem:[%s12110_s2 + $0x280] sm:$0xff] }
 0x186   :  { %6957 = vmatprep.mubr.msk.f32.mxu0 %vm565_vm0, %v100_v15  ;;  %v132_v15 = vld [vmem:[%s12110_s2 + $0x298] sm:$0xff] }
 0x189   :  { %2148 = vmatmul.mubr.f32.gmra.mrb[50].mxu0 %v99_v19  ;;  %v131_v19 = vld [vmem:[%s12110_s2 + $0x290] sm:$0xff] }
 0x18a   :  { %6958 = vmatprep.mubr.msk.f32.mxu0 %vm565_vm0, %v102_v22  ;;  %v136_v22 = vld [vmem:[%s12110_s2 + $0x2b8] sm:$0xff] }
 0x18d   :  { %2153 = vmatmul.mubr.f32.gmra.mrb[52].mxu0 %v101_v25  ;;  %v137_v25 = vld [vmem:[%s12110_s2 + $0x2c0] sm:$0xff] }
 0x18e   :  { %6959 = vmatprep.mubr.msk.f32.mxu0 %vm565_vm0, %v104_v26  ;;  %v140_v26 = vld [vmem:[%s12110_s2 + $0x2d8] sm:$0xff] }
 0x191   :  { %2158 = vmatmul.mubr.f32.gmra.mrb[54].mxu0 %v103_v29  ;;  %v141_v29 = vld [vmem:[%s12110_s2 + $0x2e0] sm:$0xff] }
 0x192   :  { %6960 = vmatprep.mubr.msk.f32.mxu0 %vm565_vm0, %v106_v30  ;;  %v144_v30 = vld [vmem:[%s12110_s2 + $0x2f8] sm:$0xff] }
 0x195   :  { %2163 = vmatmul.mubr.f32.gmra.mrb[56].mxu0 %v105_v34  ;;  %v145_v34 = vld [vmem:[%s12110_s2 + $0x300] sm:$0xff] }
 0x196   :  { %6961 = vmatprep.mubr.msk.f32.mxu0 %vm565_vm0, %v108_v35  ;;  %v148_v35 = vld [vmem:[%s12110_s2 + $0x318] sm:$0xff] }
 0x199   :  { %2168 = vmatmul.mubr.f32.gmra.mrb[58].mxu0 %v107_v38  ;;  %v149_v38 = vld [vmem:[%s12110_s2 + $0x320] sm:$0xff] }
 0x19a   :  { %6962 = vmatprep.mubr.msk.f32.mxu0 %vm565_vm0, %v110_v39  ;;  %v152_v39 = vld [vmem:[%s12110_s2 + $0x338] sm:$0xff] }
 0x19d   :  { %2173 = vmatmul.mubr.f32.gmra.mrb[60].mxu0 %v109_v42  ;;  %v153_v42 = vld [vmem:[%s12110_s2 + $0x340] sm:$0xff] }
 0x19e   :  { %6963 = vmatprep.mubr.msk.f32.mxu0 %vm565_vm0, %v112_v43  ;;  %v156_v43 = vld [vmem:[%s12110_s2 + $0x358] sm:$0xff] }
 0x1a1   :  { %2178 = vmatmul.mubr.f32.gmra.mrb[62].mxu0 %v111_v49  ;;  %v160_v49 = vld [vmem:[%s12110_s2 + $0x378] sm:$0xff] }
 0x1a2   :  { %6964 = vmatprep.mubr.msk.f32.mxu0 %vm565_vm0, %v114_v50 }
 0x1a5   :  { %2183 = vmatmul.mubr.f32.gmra.mrb[64].mxu0 %v113_v55  ;;  %v161_v55 = vld [vmem:[%s12110_s2 + $0x380] sm:$0xff] }
 0x1a6   :  { %6965 = vmatprep.mubr.msk.f32.mxu0 %vm565_vm0, %v116_v56  ;;  %v164_v56 = vld [vmem:[%s12110_s2 + $0x398] sm:$0xff] }
 0x1a9   :  { %2188 = vmatmul.mubr.f32.gmra.mrb[66].mxu0 %v115_v62 }
 0x1aa   :  { %6966 = vmatprep.mubr.msk.f32.mxu0 %vm565_vm0, %v118_v63  ;;  %v165_v63 = vld [vmem:[%s12110_s2 + $0x3a0] sm:$0xff] }
 0x1ad   :  { %2193 = vmatmul.mubr.f32.gmra.mrb[68].mxu0 %v117_v1 }
 0x1ae   :  { %6967 = vmatprep.mubr.msk.f32.mxu0 %vm565_vm0, %v120_v2 }
 0x1b1   :  { %2198 = vmatmul.mubr.f32.gmra.mrb[70].mxu0 %v119_v3  ;;  %v167_v3 = vld [vmem:[%s12110_s2 + $0x3b0] sm:$0xff] }
 0x1b2   :  { %6968 = vmatprep.mubr.msk.f32.mxu0 %vm565_vm0, %v122_v4  ;;  %v170_v4 = vld [vmem:[%s12110_s2 + $0x3c8] sm:$0xff] }
 0x1b5   :  { %2203 = vmatmul.mubr.f32.gmra.mrb[72].mxu0 %v121_v6 }
 0x1b6   :  { %6969 = vmatprep.mubr.msk.f32.mxu0 %vm565_vm0, %v124_v7 }
 0x1b9   :  { %2208 = vmatmul.mubr.f32.gmra.mrb[74].mxu0 %v123_v8  ;;  %v169_v8 = vld [vmem:[%s12110_s2 + $0x3c0] sm:$0xff] }
 0x1ba   :  { %6970 = vmatprep.mubr.msk.f32.mxu0 %vm565_vm0, %v126_v9  ;;  %v172_v9 = vld [vmem:[%s12110_s2 + $0x3d8] sm:$0xff] }
 0x1bd   :  { %2213 = vmatmul.mubr.f32.gmra.mrb[76].mxu0 %v125_v10 }
 0x1be   :  { %6971 = vmatprep.mubr.msk.f32.mxu0 %vm565_vm0, %v128_v11 }
 0x1c1   :  { %2218 = vmatmul.mubr.f32.gmra.mrb[78].mxu0 %v127_v12  ;;  %v171_v12 = vld [vmem:[%s12110_s2 + $0x3d0] sm:$0xff] }
 0x1c2   :  { %6972 = vmatprep.mubr.msk.f32.mxu0 %vm565_vm0, %v130_v13  ;;  %v174_v13 = vld [vmem:[%s12110_s2 + $0x3e8] sm:$0xff] }
 0x1c5   :  { %2223 = vmatmul.mubr.f32.gmra.mrb[80].mxu0 %v129_v14 }
 0x1c6   :  { %6973 = vmatprep.mubr.msk.f32.mxu0 %vm565_vm0, %v132_v15 }
 0x1c9   :  { %2228 = vmatmul.mubr.f32.gmra.mrb[82].mxu0 %v131_v19 }
 0x1ca   :  { %6974 = vmatprep.mubr.msk.f32.mxu0 %vm565_vm0, %v134_v20 }
 0x1cd   :  { %2233 = vmatmul.mubr.f32.gmra.mrb[84].mxu0 %v133_v21  ;;  %v175_v21 = vld [vmem:[%s12110_s2 + $0x3f0] sm:$0xff] }
 0x1ce   :  { %6975 = vmatprep.mubr.msk.f32.mxu0 %vm565_vm0, %v136_v22  ;;  %v178_v22 = vld [vmem:[%s12110_s2 + $0x408] sm:$0xff] }
 0x1d1   :  { %2238 = vmatmul.mubr.f32.gmra.mrb[86].mxu0 %v135_v23 }
 0x1d2   :  { %6976 = vmatprep.mubr.msk.f32.mxu0 %vm565_vm0, %v138_v24 }
 0x1d5   :  { %2243 = vmatmul.mubr.f32.gmra.mrb[88].mxu0 %v137_v25  ;;  %v177_v25 = vld [vmem:[%s12110_s2 + $0x400] sm:$0xff] }
 0x1d6   :  { %6977 = vmatprep.mubr.msk.f32.mxu0 %vm565_vm0, %v140_v26  ;;  %v180_v26 = vld [vmem:[%s12110_s2 + $0x418] sm:$0xff] }
 0x1d9   :  { %2248 = vmatmul.mubr.f32.gmra.mrb[90].mxu0 %v139_v27 }
 0x1da   :  { %6978 = vmatprep.mubr.msk.f32.mxu0 %vm565_vm0, %v142_v28 }
 0x1dd   :  { %2253 = vmatmul.mubr.f32.gmra.mrb[92].mxu0 %v141_v29  ;;  %v179_v29 = vld [vmem:[%s12110_s2 + $0x410] sm:$0xff] }
 0x1de   :  { %6979 = vmatprep.mubr.msk.f32.mxu0 %vm565_vm0, %v144_v30  ;;  %v182_v30 = vld [vmem:[%s12110_s2 + $0x428] sm:$0xff] }
 0x1e1   :  { %2258 = vmatmul.mubr.f32.gmra.mrb[94].mxu0 %v143_v32 }
 0x1e2   :  { %6980 = vmatprep.mubr.msk.f32.mxu0 %vm565_vm0, %v146_v33  ;;  %v2625_v33 = vld [vmem:[%s12112_s4 + $0x10] sm:$0xff] }
 0x1e5   :  { %2263 = vmatmul.mubr.f32.gmra.mrb[96].mxu0 %v145_v34  ;;  %v2626_v34 = vld [vmem:[%s12112_s4 + $0x18] sm:$0xff] }
 0x1e6   :  { %6981 = vmatprep.mubr.msk.f32.mxu0 %vm565_vm0, %v148_v35 }
 0x1e9   :  { %2268 = vmatmul.mubr.f32.gmra.mrb[98].mxu0 %v147_v36  ;;  %v181_v36 = vld [vmem:[%s12110_s2 + $0x420] sm:$0xff] }
 0x1ea   :  { %6982 = vmatprep.mubr.msk.f32.mxu0 %vm565_vm0, %v150_v37  ;;  %v184_v37 = vld [vmem:[%s12110_s2 + $0x438] sm:$0xff] }
 0x1ed   :  { %2273 = vmatmul.mubr.f32.gmra.mrb[100].mxu0 %v149_v38  ;;  %v8518_v38 = vpack.c.bf16 %v2626_v34, %v2625_v33  ;;  %v202_v33 = vld [vmem:[%s12110_s2 + $0x4c8] sm:$0xff] }
 0x1ee   :  { %6983 = vmatprep.mubr.msk.f32.mxu0 %vm565_vm0, %v152_v39 }
 0x1f1   :  { %2278 = vmatmul.mubr.f32.gmra.mrb[102].mxu0 %v151_v40  ;;  %v2627_v40 = vld [vmem:[%s12112_s4 + $0x20] sm:$0xff] }
 0x1f2   :  { %6984 = vmatprep.mubr.msk.f32.mxu0 %vm565_vm0, %v154_v41  ;;  %v2628_v41 = vld [vmem:[%s12112_s4 + $0x28] sm:$0xff] }
 0x1f5   :  { %2283 = vmatmul.mubr.f32.gmra.mrb[104].mxu0 %v153_v42 }
 0x1f6   :  { %6985 = vmatprep.mubr.msk.f32.mxu0 %vm565_vm0, %v156_v43  ;;  %v183_v43 = vld [vmem:[%s12110_s2 + $0x430] sm:$0xff] }
 0x1f8   :  { %v10594_v46 = vpop.f32.mrb[0].mxu0 }
 0x1f9   :  { %v2026_v47 = vpop.f32.mrb[1].mxu0  ;;  %2288 = vmatmul.mubr.f32.gmra.mrb[106].mxu0 %v155_v44  ;;  %v186_v44 = vld [vmem:[%s12110_s2 + $0x448] sm:$0xff] }
 0x1fa   :  { %6986 = vmatprep.mubr.msk.f32.mxu0 %vm565_vm0, %v158_v45  ;;  %v8522_v45 = vpack.c.bf16 %v2628_v41, %v2627_v40  ;;  %v7089_v40 = vld [vmem:[%s12112_s4 + $0xa0] sm:$0xff]  ;;  %v7090_v41 = vld [vmem:[%s12112_s4 + $0xa8] sm:$0xff] }
 0x1fc   :  { %v10603_v50 = vpop.f32.mrb[2].mxu0 }
 0x1fd   :  { %v2031_v51 = vpop.f32.mrb[3].mxu0  ;;  %2293 = vmatmul.mubr.f32.gmra.mrb[108].mxu0 %v157_v48  ;;  %v2629_v48 = vld [vmem:[%s12112_s4 + $0x30] sm:$0xff] }
 0x1fe   :  { %6987 = vmatprep.mubr.msk.f32.mxu0 %vm565_vm0, %v160_v49  ;;  %v2630_v49 = vld [vmem:[%s12112_s4 + $0x38] sm:$0xff] }
 0x200   :  { %v10612_v53 = vpop.f32.mrb[4].mxu0 }
 0x201   :  { %v2036_v54 = vpop.f32.mrb[5].mxu0  ;;  %2298 = vmatmul.mubr.f32.gmra.mrb[110].mxu0 %v159_v31  ;;  %v188_v31 = vld [vmem:[%s12110_s2 + $0x458] sm:$0xff] }
 0x202   :  { %6988 = vmatprep.mubr.msk.f32.mxu0 %vm565_vm0, %v162_v52  ;;  %v8526_v52 = vpack.c.bf16 %v2630_v49, %v2629_v48  ;;  %v7092_v49 = vld [vmem:[%s12112_s4 + $0xb8] sm:$0xff] }
 0x204   :  { %v10621_v57 = vpop.f32.mrb[6].mxu0 }
 0x205   :  { %v2041_v58 = vpop.f32.mrb[7].mxu0  ;;  %2303 = vmatmul.mubr.f32.gmra.mrb[112].mxu0 %v161_v55 }
 0x206   :  { %6989 = vmatprep.mubr.msk.f32.mxu0 %vm565_vm0, %v164_v56  ;;  %v187_v56 = vld [vmem:[%s12110_s2 + $0x450] sm:$0xff]  ;;  %v190_v58 = vld [vmem:[%s12110_s2 + $0x468] sm:$0xff] }
 0x208   :  { %v10630_v61 = vpop.f32.mrb[8].mxu0 }
 0x209   :  { %v2046_v62 = vpop.f32.mrb[9].mxu0  ;;  %2308 = vmatmul.mubr.f32.gmra.mrb[114].mxu0 %v163_v59 }
 0x20a   :  { %6990 = vmatprep.mubr.msk.f32.mxu0 %vm565_vm0, %v166_v60  ;;  %v2631_v60 = vld [vmem:[%s12112_s4 + $0x40] sm:$0x3f]  ;;  %v7087_v62 = vld [vmem:[%s12112_s4 + $0x90] sm:$0xff] }
 0x20c   :  { %v10639_v1 = vpop.f32.mrb[10].mxu0 }
 0x20d   :  { %v2051_v2 = vpop.f32.mrb[11].mxu0  ;;  %2313 = vmatmul.mubr.f32.gmra.mrb[116].mxu0 %v165_v63  ;;  %v7088_v63 = vld [vmem:[%s12112_s4 + $0x98] sm:$0xff] }
 0x20e   :  { %6991 = vmatprep.mubr.msk.f32.mxu0 %vm565_vm0, %v168_v0  ;;  %v189_v2 = vld [vmem:[%s12110_s2 + $0x460] sm:$0xff] }
 0x210   :  { %v10648_v6 = vpop.f32.mrb[12].mxu0 }
 0x211   :  { %v2056_v7 = vpop.f32.mrb[13].mxu0  ;;  %2318 = vmatmul.mubr.f32.gmra.mrb[118].mxu0 %v167_v3  ;;  %v192_v3 = vld [vmem:[%s12110_s2 + $0x478] sm:$0xff] }
 0x212   :  { %6992 = vmatprep.mubr.msk.f32.mxu0 %vm565_vm0, %v170_v4  ;;  %v10771_v4 = vpack.c.bf16 %v7088_v63, %v7087_v62 }
 0x214   :  { %v10657_v10 = vpop.f32.mrb[14].mxu0 }
 0x215   :  { %v2061_v11 = vpop.f32.mrb[15].mxu0  ;;  %2323 = vmatmul.mubr.f32.gmra.mrb[120].mxu0 %v169_v8 }
 0x216   :  { %6993 = vmatprep.mubr.msk.f32.mxu0 %vm565_vm0, %v172_v9  ;;  %v191_v9 = vld [vmem:[%s12110_s2 + $0x470] sm:$0xff]  ;;  %v194_v11 = vld [vmem:[%s12110_s2 + $0x488] sm:$0xff] }
 0x218   :  { %v10666_v14 = vpop.f32.mrb[16].mxu0 }
 0x219   :  { %v2066_v15 = vpop.f32.mrb[17].mxu0  ;;  %2328 = vmatmul.mubr.f32.gmra.mrb[122].mxu0 %v171_v12 }
 0x21a   :  { %6994 = vmatprep.mubr.msk.f32.mxu0 %vm565_vm0, %v174_v13  ;;  %v193_v15 = vld [vmem:[%s12110_s2 + $0x480] sm:$0xff] }
 0x21c   :  { %v10675_v19 = vpop.f32.mrb[18].mxu0 }
 0x21d   :  { %v2071_v20 = vpop.f32.mrb[19].mxu0  ;;  %2333 = vmatmul.mubr.f32.gmra.mrb[124].mxu0 %v173_v16  ;;  %v196_v16 = vld [vmem:[%s12110_s2 + $0x498] sm:$0xff] }
 0x21e   :  { %6995 = vmatprep.mubr.msk.f32.mxu0 %vm565_vm0, %v176_v17 }
 0x220   :  { %v10684_v23 = vpop.f32.mrb[20].mxu0 }
 0x221   :  { %v2076_v24 = vpop.f32.mrb[21].mxu0  ;;  %2338 = vmatmul.mubr.f32.gmra.mrb[126].mxu0 %v175_v21  ;;  %v195_v21 = vld [vmem:[%s12110_s2 + $0x490] sm:$0xff] }
 0x222   :  { %6996 = vmatprep.mubr.msk.f32.mxu0 %vm565_vm0, %v178_v22  ;;  %v198_v22 = vld [vmem:[%s12110_s2 + $0x4a8] sm:$0xff] }
 0x224   :  { %v10693_v27 = vpop.f32.mrb[22].mxu0 }
 0x225   :  { %v2081_v28 = vpop.f32.mrb[23].mxu0  ;;  %2343 = vmatmul.mubr.f32.gmra.mrb[128].mxu0 %v177_v25 }
 0x226   :  { %6997 = vmatprep.mubr.msk.f32.mxu0 %vm565_vm0, %v180_v26  ;;  %v197_v26 = vld [vmem:[%s12110_s2 + $0x4a0] sm:$0xff]  ;;  %v200_v28 = vld [vmem:[%s12110_s2 + $0x4b8] sm:$0xff] }
 0x228   :  { %v2084_v32 = vpop.f32.mrb[24].mxu0 }
 0x229   :  { %v2086_v35 = vpop.f32.mrb[25].mxu0  ;;  %2348 = vmatmul.mubr.f32.gmra.mrb[130].mxu0 %v179_v29  ;;  %7815 = vmatprep.mubr.msk.f32.mxu1 %vm2642_vm5, %v2084_v32  ;;  %v199_v32 = vld [vmem:[%s12110_s2 + $0x4b0] sm:$0xff] }
 0x22a   :  { %6998 = vmatprep.mubr.msk.f32.mxu0 %vm565_vm0, %v182_v30 }
 0x22c   :  { %v2089_v39 = vpop.f32.mrb[26].mxu0 }
 0x22d   :  { %v2091_v42 = vpop.f32.mrb[27].mxu0  ;;  %2353 = vmatmul.mubr.f32.gmra.mrb[132].mxu0 %v181_v36  ;;  %7816 = vmatmul.mubr.msk.f32.vlgmr.msra.gmra.mrb[114].mxu1 %vm2642_vm5, %v2089_v39  ;;  %v201_v36 = vld [vmem:[%s12110_s2 + $0x4c0] sm:$0xff] }
 0x22e   :  { %6999 = vmatprep.mubr.msk.f32.mxu0 %vm565_vm0, %v184_v37  ;;  %8517 = vmatpush3.bf16.msra.mxu1 %v10500_v18  ;;  %v185_v18 = vld [vmem:[%s12110_s2 + $0x440] sm:$0xff]  ;;  %v204_v37 = vld [vmem:[%s12110_s2 + $0x4d8] sm:$0xff]  ;;  %v203_v42 = vld [vmem:[%s12110_s2 + $0x4d0] sm:$0xff] }
 0x22f   :  { %8519 = vmatprep.subr.bf16.mxu1 %v8518_v38 }
 0x230   :  { %v2094_v47 = vpop.f32.mrb[28].mxu0 }
 0x231   :  { %v2096_v51 = vpop.f32.mrb[29].mxu0  ;;  %2358 = vmatmul.mubr.f32.gmra.mrb[134].mxu0 %v183_v43  ;;  %7818 = vmatprep.mubr.msk.f32.mxu1 %vm2642_vm5, %v2094_v47  ;;  %v206_v43 = vld [vmem:[%s12110_s2 + $0x4e8] sm:$0xff]  ;;  %v10841_v47 = vpop.f32.mrb[0].mxu1 }
 0x232   :  { %7000 = vmatprep.mubr.msk.f32.mxu0 %vm565_vm0, %v186_v44  ;;  %8521 = vmatpush3.bf16.msra.mxu1 %v8518_v38  ;;  %v1313_v51 = vpop.f32.mrb[1].mxu1 }
 0x233   :  { %8523 = vmatprep.subr.bf16.mxu1 %v8522_v45 }
 0x234   :  { %v2099_v54 = vpop.f32.mrb[30].mxu0 }
 0x235   :  { %v2101_v55 = vpop.f32.mrb[31].mxu0  ;;  %2363 = vmatmul.mubr.f32.gmra.mrb[136].mxu0 %v185_v18  ;;  %7819 = vmatmul.mubr.msk.f32.gmra.mrb[116].mxu1 %vm2642_vm5, %v2099_v54  ;;  %v205_v18 = vld [vmem:[%s12110_s2 + $0x4e0] sm:$0xff]  ;;  %v10863_v54 = vpop.f32.mrb[2].mxu1 }
 0x236   :  { %7001 = vmatprep.mubr.msk.f32.mxu0 %vm565_vm0, %v188_v31  ;;  %8525 = vmatpush3.bf16.msra.mxu1 %v8522_v45  ;;  %v8534_v45 = vpack.c.bf16 %v7090_v41, %v7089_v40 }
 0x237   :  { %8527 = vmatprep.subr.bf16.mxu1 %v8526_v52 }
 0x238   :  { %v2104_v59 = vpop.f32.mrb[32].mxu0 }
 0x239   :  { %v2106_v0 = vpop.f32.mrb[33].mxu0  ;;  %2368 = vmatmul.mubr.f32.gmra.mrb[138].mxu0 %v187_v56  ;;  %7821 = vmatprep.mubr.msk.f32.mxu1 %vm2642_vm5, %v2104_v59  ;;  %v7094_v56 = vld [vmem:[%s12112_s4 + $0xc8] sm:$0xff]  ;;  %v207_v59 = vld [vmem:[%s12110_s2 + $0x4f0] sm:$0xff] }
 0x23a   :  { %7002 = vmatprep.mubr.msk.f32.mxu0 %vm565_vm0, %v190_v58  ;;  %8529 = vmatpush3.bf16.msra.mxu1 %v8526_v52  ;;  %v1318_v58 = vpop.f32.mrb[3].mxu1 }
 0x23b   :  { %7849 = vmatprep.subr.msk.mxu1 %vm2679_vm4, %v2631_v60  ;;  %v10884_v63 = vpop.f32.mrb[4].mxu1  ;;  %v7117_v58 = vld [vmem:[%s12112_s4 + $0x118] sm:$0x3f] }
 0x23c   :  { %v2109_v7 = vpop.f32.mrb[34].mxu0 }
 0x23d   :  { %v2111_v8 = vpop.f32.mrb[35].mxu0  ;;  %2373 = vmatmul.mubr.f32.gmra.mrb[140].mxu0 %v189_v2  ;;  %7822 = vmatmul.mubr.msk.f32.gmra.mrb[118].mxu1 %vm2642_vm5, %v2109_v7  ;;  %v209_v2 = vld [vmem:[%s12110_s2 + $0x500] sm:$0xff] }
 0x23e   :  { %7003 = vmatprep.mubr.msk.f32.mxu0 %vm565_vm0, %v192_v3  ;;  %7850 = vmatpush3.msk.msra.mxu1 %vm2679_vm4, %v2631_v60  ;;  %v212_v3 = vld [vmem:[%s12110_s2 + $0x518] sm:$0xff] }
 0x23f   :  { %8531 = vmatprep.subr.bf16.mxu1 %v10771_v4  ;;  %v7109_v8 = vld [vmem:[%s12112_s4 + $0xd8] sm:$0xff] }
 0x240   :  { %v2114_v12 = vpop.f32.mrb[36].mxu0 }
 0x241   :  { %v2116_v13 = vpop.f32.mrb[37].mxu0  ;;  %2378 = vmatmul.mubr.f32.gmra.mrb[142].mxu0 %v191_v9  ;;  %7824 = vmatprep.mubr.msk.f32.mxu1 %vm2642_vm5, %v2114_v12  ;;  %v7110_v9 = vld [vmem:[%s12112_s4 + $0xe0] sm:$0xff]  ;;  %v214_v12 = vld [vmem:[%s12110_s2 + $0x528] sm:$0xff] }
 0x242   :  { %7004 = vmatprep.mubr.msk.f32.mxu0 %vm565_vm0, %v194_v11 }
 0x244   :  { %v2119_v17 = vpop.f32.mrb[38].mxu0 }
 0x245   :  { %v2121_v20 = vpop.f32.mrb[39].mxu0  ;;  %2383 = vmatmul.mubr.f32.gmra.mrb[144].mxu0 %v193_v15  ;;  %7825 = vmatmul.mubr.msk.f32.gmra.mrb[120].mxu1 %vm2642_vm5, %v2119_v17  ;;  %v8546_v15 = vpack.c.bf16 %v7110_v9, %v7109_v8  ;;  %v228_v9 = vld [vmem:[%s12110_s2 + $0x598] sm:$0xff] }
 0x246   :  { %7005 = vmatprep.mubr.msk.f32.mxu0 %vm565_vm0, %v196_v16  ;;  %v213_v20 = vld [vmem:[%s12110_s2 + $0x520] sm:$0xff] }
 0x248   :  { %v2124_v24 = vpop.f32.mrb[40].mxu0 }
 0x249   :  { %v2126_v25 = vpop.f32.mrb[41].mxu0  ;;  %2388 = vmatmul.mubr.f32.gmra.mrb[146].mxu0 %v195_v21  ;;  %7827 = vmatprep.mubr.msk.f32.mxu1 %vm2642_vm5, %v2124_v24  ;;  %v216_v21 = vld [vmem:[%s12110_s2 + $0x538] sm:$0xff] }
 0x24a   :  { %7006 = vmatprep.mubr.msk.f32.mxu0 %vm565_vm0, %v198_v22  ;;  %v7112_v25 = vld [vmem:[%s12112_s4 + $0xf0] sm:$0xff] }
 0x24c   :  { %v2129_v29 = vpop.f32.mrb[42].mxu0 }
 0x24d   :  { %v2131_v30 = vpop.f32.mrb[43].mxu0  ;;  %2393 = vmatmul.mubr.f32.gmra.mrb[148].mxu0 %v197_v26  ;;  %7828 = vmatmul.mubr.msk.f32.gmra.mrb[122].mxu1 %vm2642_vm5, %v2129_v29 }
 0x24e   :  { %7007 = vmatprep.mubr.msk.f32.mxu0 %vm565_vm0, %v200_v28  ;;  %v215_v28 = vld [vmem:[%s12110_s2 + $0x530] sm:$0xff] }
 0x250   :  { %v2134_v34 = vpop.f32.mrb[44].mxu0 }
 0x251   :  { %v2136_v35 = vpop.f32.mrb[45].mxu0  ;;  %2398 = vmatmul.mubr.f32.gmra.mrb[150].mxu0 %v199_v32  ;;  %7830 = vmatprep.mubr.msk.f32.mxu1 %vm2642_vm5, %v2134_v34  ;;  %v7113_v34 = vld [vmem:[%s12112_s4 + $0xf8] sm:$0xff] }
 0x252   :  { %7008 = vmatprep.mubr.msk.f32.mxu0 %vm565_vm0, %v202_v33  ;;  %v7114_v35 = vld [vmem:[%s12112_s4 + $0x100] sm:$0xff] }
 0x253   :  { %v8554_v40 = vpack.c.bf16 %v7114_v35, %v7113_v34  ;;  %v231_v35 = vld [vmem:[%s12110_s2 + $0x5b0] sm:$0xff] }
 0x254   :  { %v2139_v38 = vpop.f32.mrb[46].mxu0 }
 0x255   :  { %v2141_v39 = vpop.f32.mrb[47].mxu0  ;;  %2403 = vmatmul.mubr.f32.gmra.mrb[152].mxu0 %v201_v36  ;;  %7831 = vmatmul.mubr.msk.f32.gmra.mrb[124].mxu1 %vm2642_vm5, %v2139_v38  ;;  %v220_v38 = vld [vmem:[%s12110_s2 + $0x558] sm:$0xff] }
 0x256   :  { %7851 = vmatprep.mubr.msk.f32.mxu1 %vm2642_vm5, %v10594_v46  ;;  %7009 = vmatprep.mubr.msk.f32.mxu0 %vm565_vm0, %v204_v37  ;;  %v7091_v46 = vld [vmem:[%s12112_s4 + $0xb0] sm:$0xff]  ;;  %v217_v37 = vld [vmem:[%s12110_s2 + $0x540] sm:$0xff] }
 0x257   :  { %v8538_v52 = vpack.c.bf16 %v7092_v49, %v7091_v46  ;;  %v222_v46 = vld [vmem:[%s12110_s2 + $0x568] sm:$0xff] }
 0x258   :  { %v10839_v44 = vpop.f32.mrb[48].mxu0 }
 0x259   :  { %v2146_v48 = vpop.f32.mrb[49].mxu0  ;;  %2408 = vmatmul.mubr.f32.gmra.mrb[154].mxu0 %v203_v42  ;;  %7852 = vmatmul.mubr.msk.f32.vlgmr.msra.gmra.mrb[114].mxu1 %vm2642_vm5, %v10603_v50  ;;  %v208_v50 = vld [vmem:[%s12110_s2 + $0x4f8] sm:$0xff]  ;;  %v7115_v42 = vld [vmem:[%s12112_s4 + $0x108] sm:$0xff] }
 0x25a   :  { %7854 = vmatprep.mubr.msk.f32.mxu1 %vm2642_vm5, %v10612_v53  ;;  %7010 = vmatprep.mubr.msk.f32.mxu0 %vm565_vm0, %v206_v43  ;;  %v7093_v53 = vld [vmem:[%s12112_s4 + $0xc0] sm:$0xff]  ;;  %v7116_v43 = vld [vmem:[%s12112_s4 + $0x110] sm:$0xff] }
 0x25b   :  { %8533 = vmatpush3.bf16.msra.mxu1 %v10771_v4  ;;  %v8542_v62 = vpack.c.bf16 %v7094_v56, %v7093_v53  ;;  %v8558_v51 = vpack.c.bf16 %v7116_v43, %v7115_v42 }
 0x25c   :  { %v10861_v31 = vpop.f32.mrb[50].mxu0  ;;  %8535 = vmatprep.subr.bf16.mxu1 %v8534_v45 }
 0x25d   :  { %v2151_v55 = vpop.f32.mrb[51].mxu0  ;;  %2413 = vmatmul.mubr.f32.gmra.mrb[156].mxu0 %v205_v18  ;;  %7855 = vmatmul.mubr.msk.f32.gmra.mrb[116].mxu1 %vm2642_vm5, %v10621_v57  ;;  %v210_v57 = vld [vmem:[%s12110_s2 + $0x508] sm:$0xff] }
 0x25e   :  { %7857 = vmatprep.mubr.msk.f32.mxu1 %vm2642_vm5, %v10630_v61  ;;  %7011 = vmatprep.mubr.msk.f32.mxu0 %vm565_vm0, %v208_v50  ;;  %v1323_v61 = vpop.f32.mrb[5].mxu1  ;;  %v224_v55 = vld [vmem:[%s12110_s2 + $0x578] sm:$0xff] }
 0x25f   :  { %8537 = vmatpush3.bf16.msra.mxu1 %v8534_v45  ;;  %v10897_v7 = vpop.f32.mrb[6].mxu1  ;;  %v219_v45 = vld [vmem:[%s12110_s2 + $0x550] sm:$0xff]  ;;  %v226_v61 = vld [vmem:[%s12110_s2 + $0x588] sm:$0xff] }
 0x260   :  { %v10882_v60 = vpop.f32.mrb[52].mxu0  ;;  %8539 = vmatprep.subr.bf16.mxu1 %v8538_v52  ;;  %v1328_v11 = vpop.f32.mrb[7].mxu1 }
 0x261   :  { %v2156_v0 = vpop.f32.mrb[53].mxu0  ;;  %2418 = vmatmul.mubr.f32.gmra.mrb[158].mxu0 %v207_v59  ;;  %7858 = vmatmul.mubr.msk.f32.gmra.mrb[118].mxu1 %vm2642_vm5, %v10639_v1  ;;  %v10920_v16 = vpop.f32.mrb[8].mxu1  ;;  %v7131_v59 = vld [vmem:[%s12112_s4 + $0x120] sm:$0xff] }
 0x262   :  { %7860 = vmatprep.mubr.msk.f32.mxu1 %vm2642_vm5, %v10648_v6  ;;  %7012 = vmatprep.mubr.msk.f32.mxu0 %vm565_vm0, %v210_v57  ;;  %v7095_v6 = vld [vmem:[%s12112_s4 + $0xd0] sm:$0x3f]  ;;  %v7132_v57 = vld [vmem:[%s12112_s4 + $0x128] sm:$0xff] }
 0x263   :  { %8541 = vmatpush3.bf16.msra.mxu1 %v8538_v52 }
 0x264   :  { %v2159_v4 = vpop.f32.mrb[54].mxu0  ;;  %8543 = vmatprep.subr.bf16.mxu1 %v8542_v62 }
 0x265   :  { %v2161_v1 = vpop.f32.mrb[55].mxu0  ;;  %2423 = vmatmul.mubr.f32.gmra.mrb[160].mxu0 %v209_v2  ;;  %7861 = vmatmul.mubr.msk.f32.gmra.mrb[120].mxu1 %vm2642_vm5, %v10657_v10  ;;  %v211_v10 = vld [vmem:[%s12110_s2 + $0x510] sm:$0xff] }
 0x266   :  { %7863 = vmatprep.mubr.msk.f32.mxu1 %vm2642_vm5, %v10666_v14  ;;  %7013 = vmatprep.mubr.msk.f32.mxu0 %vm565_vm0, %v212_v3  ;;  %v1333_v14 = vpop.f32.mrb[9].mxu1  ;;  %v8562_v3 = vpack.c.bf16 %v7132_v57, %v7131_v59  ;;  %v7153_v59 = vld [vmem:[%s12112_s4 + $0x168] sm:$0xff]  ;;  %v7154_v57 = vld [vmem:[%s12112_s4 + $0x170] sm:$0xff] }
 0x267   :  { %8545 = vmatpush3.bf16.msra.mxu1 %v8542_v62  ;;  %v10934_v24 = vpop.f32.mrb[10].mxu1  ;;  %v223_v62 = vld [vmem:[%s12110_s2 + $0x570] sm:$0xff] }
 0x268   :  { %v2164_v13 = vpop.f32.mrb[56].mxu0  ;;  %7885 = vmatprep.subr.msk.mxu1 %vm2679_vm4, %v7095_v6  ;;  %v1338_v26 = vpop.f32.mrb[11].mxu1 }
 0x269   :  { %v2166_v17 = vpop.f32.mrb[57].mxu0  ;;  %2428 = vmatmul.mubr.f32.gmra.mrb[162].mxu0 %v211_v10  ;;  %7864 = vmatmul.mubr.msk.f32.gmra.mrb[122].mxu1 %vm2642_vm5, %v10675_v19  ;;  %v10953_v32 = vpop.f32.mrb[12].mxu1  ;;  %v232_v26 = vld [vmem:[%s12110_s2 + $0x5b8] sm:$0xff] }
 0x26a   :  { %7866 = vmatprep.mubr.msk.f32.mxu1 %vm2642_vm5, %v10684_v23  ;;  %7014 = vmatprep.mubr.msk.f32.mxu0 %vm565_vm0, %v214_v12  ;;  %v7111_v23 = vld [vmem:[%s12112_s4 + $0xe8] sm:$0xff]  ;;  %v1343_v36 = vpop.f32.mrb[13].mxu1 }
 0x26b   :  { %7886 = vmatpush3.msk.msra.mxu1 %vm2679_vm4, %v7095_v6  ;;  %v8550_v30 = vpack.c.bf16 %v7112_v25, %v7111_v23  ;;  %v225_v6 = vld [vmem:[%s12110_s2 + $0x580] sm:$0xff]  ;;  %v230_v17 = vld [vmem:[%s12110_s2 + $0x5a8] sm:$0xff] }
 0x26c   :  { %v2169_v22 = vpop.f32.mrb[58].mxu0  ;;  %8547 = vmatprep.subr.bf16.mxu1 %v8546_v15  ;;  %v229_v23 = vld [vmem:[%s12110_s2 + $0x5a0] sm:$0xff] }
 0x26d   :  { %v2171_v19 = vpop.f32.mrb[59].mxu0  ;;  %2433 = vmatmul.mubr.f32.gmra.mrb[164].mxu0 %v213_v20  ;;  %7867 = vmatmul.mubr.msk.f32.gmra.mrb[124].mxu1 %vm2642_vm5, %v10693_v27  ;;  %v218_v27 = vld [vmem:[%s12110_s2 + $0x548] sm:$0xff]  ;;  %v7133_v20 = vld [vmem:[%s12112_s4 + $0x130] sm:$0xff] }
 0x26e   :  { %7887 = vmatprep.mubr.msk.f32.mxu1 %vm2642_vm5, %v10839_v44  ;;  %7015 = vmatprep.mubr.msk.f32.mxu0 %vm565_vm0, %v216_v21  ;;  %v10979_v44 = vpop.f32.mrb[14].mxu1  ;;  %v7134_v21 = vld [vmem:[%s12112_s4 + $0x138] sm:$0xff] }
 0x26f   :  { %v1348_v48 = vpop.f32.mrb[15].mxu1 }
 0x270   :  { %v2174_v29 = vpop.f32.mrb[60].mxu0  ;;  %v10990_v50 = vpop.f32.mrb[16].mxu1 }
 0x271   :  { %v2176_v33 = vpop.f32.mrb[61].mxu0  ;;  %2438 = vmatmul.mubr.f32.gmra.mrb[166].mxu0 %v215_v28  ;;  %7888 = vmatmul.mubr.msk.f32.vlgmr.msra.gmra.mrb[114].mxu1 %vm2642_vm5, %v10861_v31  ;;  %v221_v31 = vld [vmem:[%s12110_s2 + $0x560] sm:$0xff]  ;;  %v1353_v52 = vpop.f32.mrb[17].mxu1  ;;  %v8566_v28 = vpack.c.bf16 %v7134_v21, %v7133_v20 }
 0x272   :  { %7890 = vmatprep.mubr.msk.f32.mxu1 %vm2642_vm5, %v10882_v60  ;;  %7016 = vmatprep.mubr.msk.f32.mxu0 %vm565_vm0, %v218_v27  ;;  %v11010_v60 = vpop.f32.mrb[18].mxu1  ;;  %v235_v52 = vld [vmem:[%s12110_s2 + $0x5d0] sm:$0xff]  ;;  %v241_v20 = vld [vmem:[%s12110_s2 + $0x600] sm:$0xff] }
 0x273   :  { %8549 = vmatpush3.bf16.msra.mxu1 %v8546_v15  ;;  %v1358_v0 = vpop.f32.mrb[19].mxu1 }
 0x274   :  { %v2179_v39 = vpop.f32.mrb[62].mxu0  ;;  %8551 = vmatprep.subr.bf16.mxu1 %v8550_v30  ;;  %v11022_v1 = vpop.f32.mrb[20].mxu1 }
 0x275   :  { %v2181_v41 = vpop.f32.mrb[63].mxu0  ;;  %2443 = vmatmul.mubr.f32.gmra.mrb[168].mxu0 %v217_v37  ;;  %7891 = vmatmul.mubr.msk.f32.gmra.mrb[116].mxu1 %vm2642_vm5, %v2159_v4  ;;  %v1363_v8 = vpop.f32.mrb[21].mxu1  ;;  %v234_v37 = vld [vmem:[%s12110_s2 + $0x5c8] sm:$0xff] }
 0x276   :  { %7893 = vmatprep.mubr.msk.f32.mxu1 %vm2642_vm5, %v2164_v13  ;;  %7017 = vmatprep.mubr.msk.f32.mxu0 %vm565_vm0, %v220_v38  ;;  %v11034_v12 = vpop.f32.mrb[22].mxu1  ;;  %v227_v13 = vld [vmem:[%s12110_s2 + $0x590] sm:$0xff]  ;;  %v7138_v41 = vld [vmem:[%s12112_s4 + $0x158] sm:$0xff] }
 0x277   :  { %8553 = vmatpush3.bf16.msra.mxu1 %v8550_v30  ;;  %v1368_v15 = vpop.f32.mrb[23].mxu1  ;;  %v7136_v30 = vld [vmem:[%s12112_s4 + $0x148] sm:$0xff] }
 0x278   :  { %v2184_v49 = vpop.f32.mrb[64].mxu0  ;;  %8555 = vmatprep.subr.bf16.mxu1 %v8554_v40  ;;  %v11050_v19 = vpop.f32.mrb[24].mxu1 }
 0x279   :  { %v2186_v18 = vpop.f32.mrb[65].mxu0  ;;  %2448 = vmatmul.mubr.f32.gmra.mrb[170].mxu0 %v219_v45  ;;  %7894 = vmatmul.mubr.msk.f32.gmra.mrb[118].mxu1 %vm2642_vm5, %v2169_v22  ;;  %v1373_v25 = vpop.f32.mrb[25].mxu1  ;;  %v233_v45 = vld [vmem:[%s12110_s2 + $0x5c0] sm:$0xff] }
 0x27a   :  { %7896 = vmatprep.mubr.msk.f32.mxu1 %vm2642_vm5, %v2174_v29  ;;  %7018 = vmatprep.mubr.msk.f32.mxu0 %vm565_vm0, %v222_v46  ;;  %v7135_v29 = vld [vmem:[%s12112_s4 + $0x140] sm:$0xff]  ;;  %v11066_v34 = vpop.f32.mrb[26].mxu1  ;;  %v236_v46 = vld [vmem:[%s12110_s2 + $0x5d8] sm:$0xff] }
 0x27b   :  { %8557 = vmatpush3.bf16.msra.mxu1 %v8554_v40  ;;  %v1378_v36 = vpop.f32.mrb[27].mxu1  ;;  %v8570_v38 = vpack.c.bf16 %v7136_v30, %v7135_v29  ;;  %v7137_v40 = vld [vmem:[%s12112_s4 + $0x150] sm:$0xff]  ;;  %v246_v29 = vld [vmem:[%s12110_s2 + $0x628] sm:$0xff] }
 0x27c   :  { %v2189_v53 = vpop.f32.mrb[66].mxu0  ;;  %8559 = vmatprep.subr.bf16.mxu1 %v8558_v51  ;;  %v11082_v43 = vpop.f32.mrb[28].mxu1  ;;  %v245_v36 = vld [vmem:[%s12110_s2 + $0x620] sm:$0xff] }
 0x27d   :  { %v2191_v56 = vpop.f32.mrb[67].mxu0  ;;  %2453 = vmatmul.mubr.f32.gmra.mrb[172].mxu0 %v221_v31  ;;  %7897 = vmatmul.mubr.msk.f32.gmra.mrb[120].mxu1 %vm2642_vm5, %v2179_v39  ;;  %v1383_v48 = vpop.f32.mrb[29].mxu1 }
 0x27e   :  { %7899 = vmatprep.mubr.msk.f32.mxu1 %vm2642_vm5, %v2184_v49  ;;  %7019 = vmatprep.mubr.msk.f32.mxu0 %vm565_vm0, %v224_v55  ;;  %v8574_v49 = vpack.c.bf16 %v7138_v41, %v7137_v40  ;;  %v11092_v31 = vpop.f32.mrb[30].mxu1  ;;  %v250_v48 = vld [vmem:[%s12110_s2 + $0x648] sm:$0xff] }
 0x27f   :  { %8561 = vmatpush3.bf16.msra.mxu1 %v8558_v51  ;;  %v1388_v55 = vpop.f32.mrb[31].mxu1 }
 0x280   :  { %v2194_v2 = vpop.f32.mrb[68].mxu0  ;;  %7921 = vmatprep.subr.msk.mxu1 %vm2679_vm4, %v7117_v58  ;;  %v11111_v0 = vpop.f32.mrb[32].mxu1  ;;  %v252_v55 = vld [vmem:[%s12110_s2 + $0x658] sm:$0xff] }
 0x281   :  { %v2196_v4 = vpop.f32.mrb[69].mxu0  ;;  %2458 = vmatmul.mubr.f32.gmra.mrb[174].mxu0 %v223_v62  ;;  %7900 = vmatmul.mubr.msk.f32.gmra.mrb[122].mxu1 %vm2642_vm5, %v2189_v53  ;;  %v238_v53 = vld [vmem:[%s12110_s2 + $0x5e8] sm:$0xff] }
 0x282   :  { %7902 = vmatprep.mubr.msk.f32.mxu1 %vm2642_vm5, %v2194_v2  ;;  %7020 = vmatprep.mubr.msk.f32.mxu0 %vm565_vm0, %v226_v61  ;;  %v237_v61 = vld [vmem:[%s12110_s2 + $0x5e0] sm:$0xff]  ;;  %v1393_v2 = vpop.f32.mrb[33].mxu1  ;;  %v11121_v4 = vpack.c.bf16 %v7154_v57, %v7153_v59  ;;  %v251_v59 = vld [vmem:[%s12110_s2 + $0x650] sm:$0xff] }
 0x283   :  { %7922 = vmatpush3.msk.msra.mxu1 %vm2679_vm4, %v7117_v58  ;;  %v7139_v58 = vld [vmem:[%s12112_s4 + $0x160] sm:$0x3f]  ;;  %v7155_v2 = vld [vmem:[%s12112_s4 + $0x178] sm:$0xff] }
 0x284   :  { %v2199_v11 = vpop.f32.mrb[70].mxu0  ;;  %8563 = vmatprep.subr.bf16.mxu1 %v8562_v3 }
 0x285   :  { %v2201_v10 = vpop.f32.mrb[71].mxu0  ;;  %2463 = vmatmul.mubr.f32.gmra.mrb[176].mxu0 %v225_v6  ;;  %7903 = vmatmul.mubr.msk.f32.gmra.mrb[124].mxu1 %vm2642_vm5, %v2199_v11  ;;  %v239_v11 = vld [vmem:[%s12110_s2 + $0x5f0] sm:$0xff] }
 0x286   :  { %7021 = vmatprep.mubr.msk.f32.mxu0 %vm565_vm0, %v228_v9  ;;  %v11124_v9 = vpop.f32.mrb[34].mxu1 }
 0x287   :  { %v1398_v10 = vpop.f32.mrb[35].mxu1 }
 0x288   :  { %v2204_v14 = vpop.f32.mrb[72].mxu0 }
 0x289   :  { %v2206_v22 = vpop.f32.mrb[73].mxu0  ;;  %2468 = vmatmul.mubr.f32.gmra.mrb[178].mxu0 %v227_v13  ;;  %7923 = vmatprep.mubr.msk.f32.mxu1 %vm2642_vm5, %v2204_v14  ;;  %v242_v13 = vld [vmem:[%s12110_s2 + $0x608] sm:$0xff]  ;;  %v11136_v14 = vpop.f32.mrb[36].mxu1 }
 0x28a   :  { %7022 = vmatprep.mubr.msk.f32.mxu0 %vm565_vm0, %v230_v17  ;;  %v1403_v21 = vpop.f32.mrb[37].mxu1  ;;  %v244_v22 = vld [vmem:[%s12110_s2 + $0x618] sm:$0xff] }
 0x28b   :  { %v7158_v21 = vld [vmem:[%s12112_s4 + $0x190] sm:$0xff] }
 0x28c   :  { %v2209_v27 = vpop.f32.mrb[74].mxu0 }
 0x28d   :  { %v2211_v33 = vpop.f32.mrb[75].mxu0  ;;  %2473 = vmatmul.mubr.f32.gmra.mrb[180].mxu0 %v229_v23  ;;  %7924 = vmatmul.mubr.msk.f32.vlgmr.msra.gmra.mrb[114].mxu1 %vm2642_vm5, %v2209_v27 }
 0x28e   :  { %7023 = vmatprep.mubr.msk.f32.mxu0 %vm565_vm0, %v232_v26  ;;  %8565 = vmatpush3.bf16.msra.mxu1 %v8562_v3  ;;  %v240_v3 = vld [vmem:[%s12110_s2 + $0x5f8] sm:$0xff]  ;;  %v11146_v26 = vpop.f32.mrb[38].mxu1 }
 0x28f   :  { %8567 = vmatprep.subr.bf16.mxu1 %v8566_v28  ;;  %v1408_v27 = vpop.f32.mrb[39].mxu1 }
 0x290   :  { %v2214_v39 = vpop.f32.mrb[76].mxu0  ;;  %v258_v27 = vld [vmem:[%s12110_s2 + $0x688] sm:$0xff] }
 0x291   :  { %v2216_v42 = vpop.f32.mrb[77].mxu0  ;;  %2478 = vmatmul.mubr.f32.gmra.mrb[182].mxu0 %v231_v35  ;;  %7926 = vmatprep.mubr.msk.f32.mxu1 %vm2642_vm5, %v2214_v39  ;;  %v11156_v35 = vpop.f32.mrb[40].mxu1 }
 0x292   :  { %7024 = vmatprep.mubr.msk.f32.mxu0 %vm565_vm0, %v234_v37  ;;  %8569 = vmatpush3.bf16.msra.mxu1 %v8566_v28  ;;  %v243_v28 = vld [vmem:[%s12110_s2 + $0x610] sm:$0xff]  ;;  %v1413_v37 = vpop.f32.mrb[41].mxu1 }
 0x293   :  { %8571 = vmatprep.subr.bf16.mxu1 %v8570_v38  ;;  %v11166_v41 = vpop.f32.mrb[42].mxu1  ;;  %v247_v42 = vld [vmem:[%s12110_s2 + $0x630] sm:$0xff] }
 0x294   :  { %v2219_v51 = vpop.f32.mrb[78].mxu0 }
 0x295   :  { %v2221_v18 = vpop.f32.mrb[79].mxu0  ;;  %2483 = vmatmul.mubr.f32.gmra.mrb[184].mxu0 %v233_v45  ;;  %7927 = vmatmul.mubr.msk.f32.gmra.mrb[116].mxu1 %vm2642_vm5, %v2219_v51  ;;  %v1418_v45 = vpop.f32.mrb[43].mxu1 }
 0x296   :  { %7025 = vmatprep.mubr.msk.f32.mxu0 %vm565_vm0, %v236_v46  ;;  %8573 = vmatpush3.bf16.msra.mxu1 %v8570_v38  ;;  %v248_v38 = vld [vmem:[%s12110_s2 + $0x638] sm:$0xff]  ;;  %v11176_v51 = vpop.f32.mrb[44].mxu1  ;;  %v249_v18 = vld [vmem:[%s12110_s2 + $0x640] sm:$0xff] }
 0x297   :  { %8575 = vmatprep.subr.bf16.mxu1 %v8574_v49 }
 0x298   :  { %v2224_v56 = vpop.f32.mrb[80].mxu0 }
 0x299   :  { %v2226_v62 = vpop.f32.mrb[81].mxu0  ;;  %2488 = vmatmul.mubr.f32.gmra.mrb[186].mxu0 %v235_v52  ;;  %7929 = vmatprep.mubr.msk.f32.mxu1 %vm2642_vm5, %v2224_v56  ;;  %v1423_v52 = vpop.f32.mrb[45].mxu1 }
 0x29a   :  { %7026 = vmatprep.mubr.msk.f32.mxu0 %vm565_vm0, %v238_v53  ;;  %8577 = vmatpush3.bf16.msra.mxu1 %v8574_v49  ;;  %v254_v62 = vld [vmem:[%s12110_s2 + $0x668] sm:$0xff] }
 0x29b   :  { %7957 = vmatprep.subr.msk.mxu1 %vm2679_vm4, %v7139_v58  ;;  %v262_v52 = vld [vmem:[%s12110_s2 + $0x6a8] sm:$0xff] }
 0x29c   :  { %v2229_v6 = vpop.f32.mrb[82].mxu0 }
 0x29d   :  { %v2231_v8 = vpop.f32.mrb[83].mxu0  ;;  %2493 = vmatmul.mubr.f32.gmra.mrb[188].mxu0 %v237_v61  ;;  %7930 = vmatmul.mubr.msk.f32.gmra.mrb[118].mxu1 %vm2642_vm5, %v2229_v6 }
 0x29e   :  { %7027 = vmatprep.mubr.msk.f32.mxu0 %vm565_vm0, %v240_v3  ;;  %7958 = vmatpush3.msk.msra.mxu1 %vm2679_vm4, %v7139_v58  ;;  %v11186_v58 = vpop.f32.mrb[46].mxu1  ;;  %v7156_v3 = vld [vmem:[%s12112_s4 + $0x180] sm:$0xff] }
 0x29f   :  { %8579 = vmatprep.subr.bf16.mxu1 %v11121_v4  ;;  %v1428_v57 = vpop.f32.mrb[47].mxu1 }
 0x2a0   :  { %v2234_v15 = vpop.f32.mrb[84].mxu0  ;;  %v11202_v8 = vpop.f32.mrb[48].mxu1 }
 0x2a1   :  { %v2236_v17 = vpop.f32.mrb[85].mxu0  ;;  %2498 = vmatmul.mubr.f32.gmra.mrb[190].mxu0 %v239_v11  ;;  %7932 = vmatprep.mubr.msk.f32.mxu1 %vm2642_vm5, %v2234_v15  ;;  %v253_v11 = vld [vmem:[%s12110_s2 + $0x660] sm:$0xff]  ;;  %v1433_v10 = vpop.f32.mrb[49].mxu1  ;;  %v8582_v15 = vpack.c.bf16 %v7156_v3, %v7155_v2  ;;  %v264_v3 = vld [vmem:[%s12110_s2 + $0x6b8] sm:$0xff] }
 0x2a2   :  { %7028 = vmatprep.mubr.msk.f32.mxu0 %vm565_vm0, %v242_v13  ;;  %v256_v13 = vld [vmem:[%s12110_s2 + $0x678] sm:$0xff] }
 0x2a4   :  { %v2239_v23 = vpop.f32.mrb[86].mxu0 }
 0x2a5   :  { %v2241_v25 = vpop.f32.mrb[87].mxu0  ;;  %2503 = vmatmul.mubr.f32.gmra.mrb[192].mxu0 %v241_v20  ;;  %7933 = vmatmul.mubr.msk.f32.gmra.mrb[120].mxu1 %vm2642_vm5, %v2239_v23  ;;  %v7157_v20 = vld [vmem:[%s12112_s4 + $0x188] sm:$0xff]  ;;  %v11218_v23 = vpop.f32.mrb[50].mxu1 }
 0x2a6   :  { %7029 = vmatprep.mubr.msk.f32.mxu0 %vm565_vm0, %v244_v22  ;;  %v255_v25 = vld [vmem:[%s12110_s2 + $0x670] sm:$0xff] }
 0x2a8   :  { %v2244_v30 = vpop.f32.mrb[88].mxu0 }
 0x2a9   :  { %v2246_v33 = vpop.f32.mrb[89].mxu0  ;;  %2508 = vmatmul.mubr.f32.gmra.mrb[194].mxu0 %v243_v28  ;;  %7935 = vmatprep.mubr.msk.f32.mxu1 %vm2642_vm5, %v2244_v30  ;;  %v1438_v28 = vpop.f32.mrb[51].mxu1 }
 0x2aa   :  { %7030 = vmatprep.mubr.msk.f32.mxu0 %vm565_vm0, %v246_v29  ;;  %v8586_v29 = vpack.c.bf16 %v7158_v21, %v7157_v20  ;;  %v7159_v33 = vld [vmem:[%s12112_s4 + $0x198] sm:$0xff]  ;;  %v266_v20 = vld [vmem:[%s12110_s2 + $0x6c8] sm:$0xff]  ;;  %v265_v28 = vld [vmem:[%s12110_s2 + $0x6c0] sm:$0xff] }
 0x2ac   :  { %v2249_v39 = vpop.f32.mrb[90].mxu0 }
 0x2ad   :  { %v2251_v40 = vpop.f32.mrb[91].mxu0  ;;  %2513 = vmatmul.mubr.f32.gmra.mrb[196].mxu0 %v245_v36  ;;  %7936 = vmatmul.mubr.msk.f32.gmra.mrb[122].mxu1 %vm2642_vm5, %v2249_v39  ;;  %v7160_v36 = vld [vmem:[%s12112_s4 + $0x1a0] sm:$0xff] }
 0x2ae   :  { %7031 = vmatprep.mubr.msk.f32.mxu0 %vm565_vm0, %v248_v38  ;;  %v257_v38 = vld [vmem:[%s12110_s2 + $0x680] sm:$0xff]  ;;  %v260_v40 = vld [vmem:[%s12110_s2 + $0x698] sm:$0xff] }
 0x2b0   :  { %v2254_v46 = vpop.f32.mrb[92].mxu0 }
 0x2b1   :  { %v2256_v49 = vpop.f32.mrb[93].mxu0  ;;  %2518 = vmatmul.mubr.f32.gmra.mrb[198].mxu0 %v247_v42  ;;  %7938 = vmatprep.mubr.msk.f32.mxu1 %vm2642_vm5, %v2254_v46  ;;  %v8590_v42 = vpack.c.bf16 %v7160_v36, %v7159_v33 }
 0x2b2   :  { %7032 = vmatprep.mubr.msk.f32.mxu0 %vm565_vm0, %v250_v48  ;;  %v259_v49 = vld [vmem:[%s12110_s2 + $0x690] sm:$0xff] }
 0x2b4   :  { %v2259_v53 = vpop.f32.mrb[94].mxu0 }
 0x2b5   :  { %v2261_v56 = vpop.f32.mrb[95].mxu0  ;;  %2523 = vmatmul.mubr.f32.gmra.mrb[200].mxu0 %v249_v18  ;;  %7939 = vmatmul.mubr.msk.f32.gmra.mrb[124].mxu1 %vm2642_vm5, %v2259_v53  ;;  %v7161_v53 = vld [vmem:[%s12112_s4 + $0x1a8] sm:$0x3f] }
 0x2b6   :  { %7033 = vmatprep.mubr.msk.f32.mxu0 %vm565_vm0, %v252_v55  ;;  %v7175_v56 = vld [vmem:[%s12112_s4 + $0x1b0] sm:$0xff] }
 0x2b8   :  { %v2264_v61 = vpop.f32.mrb[96].mxu0 }
 0x2b9   :  { %v2266_v6 = vpop.f32.mrb[97].mxu0  ;;  %2528 = vmatmul.mubr.f32.gmra.mrb[202].mxu0 %v251_v59  ;;  %7959 = vmatprep.mubr.msk.f32.mxu1 %vm2642_vm5, %v2264_v61  ;;  %v7176_v59 = vld [vmem:[%s12112_s4 + $0x1b8] sm:$0xff]  ;;  %v261_v61 = vld [vmem:[%s12110_s2 + $0x6a0] sm:$0xff] }
 0x2ba   :  { %7034 = vmatprep.mubr.msk.f32.mxu0 %vm565_vm0, %v254_v62  ;;  %v11274_v6 = vpack.c.bf16 %v7176_v59, %v7175_v56  ;;  %v271_v56 = vld [vmem:[%s12110_s2 + $0x6f0] sm:$0xff] }
 0x2bc   :  { %v2269_v17 = vpop.f32.mrb[98].mxu0 }
 0x2bd   :  { %v2271_v22 = vpop.f32.mrb[99].mxu0  ;;  %2533 = vmatmul.mubr.f32.gmra.mrb[204].mxu0 %v253_v11  ;;  %7960 = vmatmul.mubr.msk.f32.vlgmr.msra.gmra.mrb[114].mxu1 %vm2642_vm5, %v2269_v17 }
 0x2be   :  { %7035 = vmatprep.mubr.msk.f32.mxu0 %vm565_vm0, %v256_v13  ;;  %8581 = vmatpush3.bf16.msra.mxu1 %v11121_v4  ;;  %v11235_v4 = vpop.f32.mrb[52].mxu1 }
 0x2bf   :  { %8583 = vmatprep.subr.bf16.mxu1 %v8582_v15  ;;  %v1443_v39 = vpop.f32.mrb[53].mxu1 }
 0x2c0   :  { %v2274_v30 = vpop.f32.mrb[100].mxu0  ;;  %v11245_v46 = vpop.f32.mrb[54].mxu1  ;;  %v270_v39 = vld [vmem:[%s12110_s2 + $0x6e8] sm:$0xff] }
 0x2c1   :  { %v2276_v37 = vpop.f32.mrb[101].mxu0  ;;  %2538 = vmatmul.mubr.f32.gmra.mrb[206].mxu0 %v255_v25  ;;  %7962 = vmatprep.mubr.msk.f32.mxu1 %vm2642_vm5, %v2274_v30  ;;  %v1448_v18 = vpop.f32.mrb[55].mxu1 }
 0x2c2   :  { %7036 = vmatprep.mubr.msk.f32.mxu0 %vm565_vm0, %v258_v27  ;;  %8585 = vmatpush3.bf16.msra.mxu1 %v8582_v15  ;;  %v11264_v62 = vpop.f32.mrb[56].mxu1  ;;  %v263_v15 = vld [vmem:[%s12110_s2 + $0x6b0] sm:$0xff]  ;;  %v272_v18 = vld [vmem:[%s12110_s2 + $0x6f8] sm:$0xff] }
 0x2c3   :  { %8587 = vmatprep.subr.bf16.mxu1 %v8586_v29  ;;  %v1453_v2 = vpop.f32.mrb[57].mxu1  ;;  %v267_v37 = vld [vmem:[%s12110_s2 + $0x6d0] sm:$0xff] }
 0x2c4   :  { %v2279_v45 = vpop.f32.mrb[102].mxu0  ;;  %v11277_v13 = vpop.f32.mrb[58].mxu1 }
 0x2c5   :  { %v2281_v48 = vpop.f32.mrb[103].mxu0  ;;  %2543 = vmatmul.mubr.f32.gmra.mrb[208].mxu0 %v257_v38  ;;  %7963 = vmatmul.mubr.msk.f32.gmra.mrb[116].mxu1 %vm2642_vm5, %v2279_v45  ;;  %v1458_v17 = vpop.f32.mrb[59].mxu1 }
 0x2c6   :  { %7037 = vmatprep.mubr.msk.f32.mxu0 %vm565_vm0, %v260_v40  ;;  %8589 = vmatpush3.bf16.msra.mxu1 %v8586_v29  ;;  %v11289_v25 = vpop.f32.mrb[60].mxu1  ;;  %v268_v29 = vld [vmem:[%s12110_s2 + $0x6d8] sm:$0xff]  ;;  %v269_v48 = vld [vmem:[%s12110_s2 + $0x6e0] sm:$0xff] }
 0x2c7   :  { %8591 = vmatprep.subr.bf16.mxu1 %v8590_v42  ;;  %v1463_v27 = vpop.f32.mrb[61].mxu1 }
 0x2c8   :  { %v2284_v55 = vpop.f32.mrb[104].mxu0  ;;  %v11299_v36 = vpop.f32.mrb[62].mxu1  ;;  %v278_v27 = vld [vmem:[%s12110_s2 + $0x728] sm:$0xff] }
 0x2c9   :  { %v2286_v57 = vpop.f32.mrb[105].mxu0  ;;  %2548 = vmatmul.mubr.f32.gmra.mrb[210].mxu0 %v259_v49  ;;  %7965 = vmatprep.mubr.msk.f32.mxu1 %vm2642_vm5, %v2284_v55  ;;  %v1468_v38 = vpop.f32.mrb[63].mxu1 }
 0x2ca   :  { %7038 = vmatprep.mubr.msk.f32.mxu0 %vm565_vm0, %v262_v52  ;;  %8593 = vmatpush3.bf16.msra.mxu1 %v8590_v42  ;;  %v11309_v45 = vpop.f32.mrb[64].mxu1  ;;  %v274_v57 = vld [vmem:[%s12110_s2 + $0x708] sm:$0xff] }
 0x2cb   :  { %7993 = vmatprep.subr.msk.mxu1 %vm2679_vm4, %v7161_v53  ;;  %v1473_v49 = vpop.f32.mrb[65].mxu1 }
 0x2cc   :  { %v2289_v11 = vpop.f32.mrb[106].mxu0 }
 0x2cd   :  { %v2291_v10 = vpop.f32.mrb[107].mxu0  ;;  %2553 = vmatmul.mubr.f32.gmra.mrb[212].mxu0 %v261_v61  ;;  %7966 = vmatmul.mubr.msk.f32.gmra.mrb[118].mxu1 %vm2642_vm5, %v2289_v11  ;;  %v273_v11 = vld [vmem:[%s12110_s2 + $0x700] sm:$0xff] }
 0x2ce   :  { %7039 = vmatprep.mubr.msk.f32.mxu0 %vm565_vm0, %v264_v3  ;;  %7994 = vmatpush3.msk.msra.mxu1 %vm2679_vm4, %v7161_v53  ;;  %v11319_v53 = vpop.f32.mrb[66].mxu1 }
 0x2cf   :  { %8595 = vmatprep.subr.bf16.mxu1 %v11274_v6  ;;  %v1478_v59 = vpop.f32.mrb[67].mxu1 }
 0x2d0   :  { %v2294_v21 = vpop.f32.mrb[108].mxu0  ;;  %v11329_v3 = vpop.f32.mrb[68].mxu1  ;;  %v279_v59 = vld [vmem:[%s12110_s2 + $0x730] sm:$0xff] }
 0x2d1   :  { %v2296_v22 = vpop.f32.mrb[109].mxu0  ;;  %2558 = vmatmul.mubr.f32.gmra.mrb[214].mxu0 %v263_v15  ;;  %7968 = vmatprep.mubr.msk.f32.mxu1 %vm2642_vm5, %v2294_v21  ;;  %v1483_v10 = vpop.f32.mrb[69].mxu1  ;;  %v276_v15 = vld [vmem:[%s12110_s2 + $0x718] sm:$0xff] }
 0x2d2   :  { %7040 = vmatprep.mubr.msk.f32.mxu0 %vm565_vm0, %v266_v20  ;;  %v11339_v21 = vpop.f32.mrb[70].mxu1  ;;  %v275_v22 = vld [vmem:[%s12110_s2 + $0x710] sm:$0xff]  ;;  %v7181_v10 = vld [vmem:[%s12112_s4 + $0x1e0] sm:$0xff] }
 0x2d4   :  { %v2299_v30 = vpop.f32.mrb[110].mxu0 }
 0x2d5   :  { %v2301_v33 = vpop.f32.mrb[111].mxu0  ;;  %2563 = vmatmul.mubr.f32.gmra.mrb[216].mxu0 %v265_v28  ;;  %7969 = vmatmul.mubr.msk.f32.gmra.mrb[120].mxu1 %vm2642_vm5, %v2299_v30  ;;  %v1488_v28 = vpop.f32.mrb[71].mxu1  ;;  %v7177_v30 = vld [vmem:[%s12112_s4 + $0x1c0] sm:$0xff] }
 0x2d6   :  { %7041 = vmatprep.mubr.msk.f32.mxu0 %vm565_vm0, %v268_v29  ;;  %v7178_v33 = vld [vmem:[%s12112_s4 + $0x1c8] sm:$0xff]  ;;  %v11355_v38 = vpop.f32.mrb[72].mxu1  ;;  %v284_v28 = vld [vmem:[%s12110_s2 + $0x758] sm:$0xff] }
 0x2d8   :  { %v2304_v40 = vpop.f32.mrb[112].mxu0 }
 0x2d9   :  { %v2306_v42 = vpop.f32.mrb[113].mxu0  ;;  %2568 = vmatmul.mubr.f32.gmra.mrb[218].mxu0 %v267_v37  ;;  %7971 = vmatprep.mubr.msk.f32.mxu1 %vm2642_vm5, %v2304_v40  ;;  %v1493_v40 = vpop.f32.mrb[73].mxu1 }
 0x2da   :  { %7042 = vmatprep.mubr.msk.f32.mxu0 %vm565_vm0, %v270_v39  ;;  %v277_v39 = vld [vmem:[%s12110_s2 + $0x720] sm:$0xff]  ;;  %v280_v42 = vld [vmem:[%s12110_s2 + $0x738] sm:$0xff] }
 0x2dc   :  { %v2309_v52 = vpop.f32.mrb[114].mxu0 }
 0x2dd   :  { %v2311_v55 = vpop.f32.mrb[115].mxu0  ;;  %2573 = vmatmul.mubr.f32.gmra.mrb[220].mxu0 %v269_v48  ;;  %7972 = vmatmul.mubr.msk.f32.gmra.mrb[122].mxu1 %vm2642_vm5, %v2309_v52  ;;  %v8598_v48 = vpack.c.bf16 %v7178_v33, %v7177_v30  ;;  %v7180_v52 = vld [vmem:[%s12112_s4 + $0x1d8] sm:$0xff] }
 0x2de   :  { %7043 = vmatprep.mubr.msk.f32.mxu0 %vm565_vm0, %v272_v18  ;;  %v7179_v18 = vld [vmem:[%s12112_s4 + $0x1d0] sm:$0xff] }
 0x2e0   :  { %v2314_v61 = vpop.f32.mrb[116].mxu0 }
 0x2e1   :  { %v2316_v2 = vpop.f32.mrb[117].mxu0  ;;  %2578 = vmatmul.mubr.f32.gmra.mrb[222].mxu0 %v271_v56  ;;  %7974 = vmatprep.mubr.msk.f32.mxu1 %vm2642_vm5, %v2314_v61  ;;  %v11371_v56 = vpop.f32.mrb[74].mxu1  ;;  %v282_v61 = vld [vmem:[%s12110_s2 + $0x748] sm:$0xff] }
 0x2e2   :  { %7044 = vmatprep.mubr.msk.f32.mxu0 %vm565_vm0, %v274_v57  ;;  %v1498_v57 = vpop.f32.mrb[75].mxu1  ;;  %v8602_v2 = vpack.c.bf16 %v7180_v52, %v7179_v18  ;;  %v7198_v18 = vld [vmem:[%s12112_s4 + $0x200] sm:$0xff] }
 0x2e3   :  { %v285_v57 = vld [vmem:[%s12110_s2 + $0x760] sm:$0xff] }
 0x2e4   :  { %v2319_v17 = vpop.f32.mrb[118].mxu0 }
 0x2e5   :  { %v2321_v20 = vpop.f32.mrb[119].mxu0  ;;  %2583 = vmatmul.mubr.f32.gmra.mrb[224].mxu0 %v273_v11  ;;  %7975 = vmatmul.mubr.msk.f32.gmra.mrb[124].mxu1 %vm2642_vm5, %v2319_v17 }
 0x2e6   :  { %7045 = vmatprep.mubr.msk.f32.mxu0 %vm565_vm0, %v276_v15  ;;  %v7182_v15 = vld [vmem:[%s12112_s4 + $0x1e8] sm:$0xff]  ;;  %v281_v20 = vld [vmem:[%s12110_s2 + $0x740] sm:$0xff] }
 0x2e8   :  { %v2324_v29 = vpop.f32.mrb[120].mxu0 }
 0x2e9   :  { %v2326_v37 = vpop.f32.mrb[121].mxu0  ;;  %2588 = vmatmul.mubr.f32.gmra.mrb[226].mxu0 %v275_v22  ;;  %7995 = vmatprep.mubr.msk.f32.mxu1 %vm2642_vm5, %v2324_v29 }
 0x2ea   :  { %7046 = vmatprep.mubr.msk.f32.mxu0 %vm565_vm0, %v278_v27  ;;  %v8606_v27 = vpack.c.bf16 %v7182_v15, %v7181_v10 }
 0x2ec   :  { %v2329_v49 = vpop.f32.mrb[122].mxu0 }
 0x2ed   :  { %v2331_v55 = vpop.f32.mrb[123].mxu0  ;;  %2593 = vmatmul.mubr.f32.gmra.mrb[228].mxu0 %v277_v39  ;;  %7996 = vmatmul.mubr.msk.f32.vlgmr.msra.gmra.mrb[114].mxu1 %vm2642_vm5, %v2329_v49  ;;  %v283_v39 = vld [vmem:[%s12110_s2 + $0x750] sm:$0xff]  ;;  %v7197_v49 = vld [vmem:[%s12112_s4 + $0x1f8] sm:$0xff] }
 0x2ee   :  { %7047 = vmatprep.mubr.msk.f32.mxu0 %vm565_vm0, %v280_v42  ;;  %8597 = vmatpush3.bf16.msra.mxu1 %v11274_v6  ;;  %v11388_v6 = vpop.f32.mrb[76].mxu1  ;;  %v286_v42 = vld [vmem:[%s12110_s2 + $0x768] sm:$0xff] }
 0x2ef   :  { %8599 = vmatprep.subr.bf16.mxu1 %v8598_v48  ;;  %v1503_v22 = vpop.f32.mrb[77].mxu1 }
 0x2f0   :  { %v2334_v11 = vpop.f32.mrb[124].mxu0  ;;  %v11398_v37 = vpop.f32.mrb[78].mxu1 }
 0x2f1   :  { %v2336_v17 = vpop.f32.mrb[125].mxu0  ;;  %2598 = vmatmul.mubr.f32.gmra.mrb[230].mxu0 %v279_v59  ;;  %7998 = vmatprep.mubr.msk.f32.mxu1 %vm2642_vm5, %v2334_v11  ;;  %v1508_v40 = vpop.f32.mrb[79].mxu1 }
 0x2f2   :  { %7048 = vmatprep.mubr.msk.f32.mxu0 %vm565_vm0, %v282_v61  ;;  %8601 = vmatpush3.bf16.msra.mxu1 %v8598_v48  ;;  %v7183_v48 = vld [vmem:[%s12112_s4 + $0x1f0] sm:$0x3f]  ;;  %v11418_v59 = vpop.f32.mrb[80].mxu1 }
 0x2f3   :  { %8603 = vmatprep.subr.bf16.mxu1 %v8602_v2  ;;  %v1513_v61 = vpop.f32.mrb[81].mxu1 }
 0x2f4   :  { %v2339_v29 = vpop.f32.mrb[126].mxu0  ;;  %v11432_v17 = vpop.f32.mrb[82].mxu1 }
 0x2f5   :  { %v2340_v30 = vadd.f32 %v2339_v29, %v10841_v47  ;;  %v2341_v33 = vpop.f32.mrb[127].mxu0  ;;  %2603 = vmatmul.mubr.f32.gmra.mrb[232].mxu0 %v281_v20  ;;  %v287_v20 = vld [vmem:[%s12110_s2 + $0x770] sm:$0xff]  ;;  %v1518_v22 = vpop.f32.mrb[83].mxu1 }
 0x2f6   :  { %7049 = vmatprep.mubr.msk.f32.mxu0 %vm565_vm0, %v284_v28  ;;  %8605 = vmatpush3.bf16.msra.mxu1 %v8602_v2  ;;  %v288_v2 = vld [vmem:[%s12110_s2 + $0x778] sm:$0xff]  ;;  %v11442_v29 = vpop.f32.mrb[84].mxu1 }
 0x2f7   :  { %7999 = vmatmul.mubr.msk.f32.gmra.mrb[116].mxu1 %vm2642_vm5, %v2340_v30  ;;  %8607 = vmatprep.subr.bf16.mxu1 %v8606_v27  ;;  %v1523_v30 = vpop.f32.mrb[85].mxu1 }
 0x2f8   :  { %v2344_v47 = vpop.f32.mrb[128].mxu0 }
 0x2f9   :  { %v2345_v52 = vadd.f32 %v2344_v47, %v10863_v54  ;;  %v2346_v55 = vpop.f32.mrb[129].mxu0  ;;  %2608 = vmatmul.mubr.f32.gmra.mrb[234].mxu0 %v283_v39  ;;  %v11429_v54 = vpack.c.bf16 %v7198_v18, %v7197_v49 }
 0x2fa   :  { %7050 = vmatprep.mubr.msk.f32.mxu0 %vm565_vm0, %v286_v42  ;;  %8609 = vmatpush3.bf16.msra.mxu1 %v8606_v27  ;;  %v11446_v42 = vpop.f32.mrb[86].mxu1 }
 0x2fb   :  { %8001 = vmatprep.mubr.msk.f32.mxu1 %vm2642_vm5, %v2345_v52  ;;  %8029 = vmatprep.subr.msk.mxu1 %vm2679_vm4, %v7183_v48  ;;  %v1528_v47 = vpop.f32.mrb[87].mxu1 }
 0x2fc   :  { %v2349_v11 = vpop.f32.mrb[130].mxu0  ;;  %v11450_v18 = vpop.f32.mrb[88].mxu1 }
 0x2fd   :  { %v2350_v10 = vadd.f32 %v2349_v11, %v10884_v63  ;;  %v2351_v15 = vpop.f32.mrb[131].mxu0  ;;  %2613 = vmatmul.mubr.f32.gmra.mrb[236].mxu0 %v285_v57  ;;  %v1533_v52 = vpop.f32.mrb[89].mxu1 }
 0x2fe   :  { %7051 = vmatprep.mubr.msk.f32.mxu0 %vm565_vm0, %v288_v2  ;;  %8030 = vmatpush3.msk.msra.mxu1 %vm2679_vm4, %v7183_v48 }
 0x2ff   :  { %8002 = vmatmul.mubr.msk.f32.gmra.mrb[118].mxu1 %vm2642_vm5, %v2350_v10  ;;  %8611 = vmatprep.subr.bf16.mxu1 %v11429_v54 }
 0x300   :  { %v2354_v28 = vpop.f32.mrb[132].mxu0 }
 0x301   :  { %v2355_v63 = vadd.f32 %v2354_v28, %v10897_v7  ;;  %v2356_v27 = vpop.f32.mrb[133].mxu0  ;;  %2618 = vmatmul.mubr.f32.gmra.mrb[238].mxu0 %v287_v20 }
 0x303   :  { %8004 = vmatprep.mubr.msk.f32.mxu1 %vm2642_vm5, %v2355_v63 }
 0x304   :  { %v2359_v33 = vpop.f32.mrb[134].mxu0 }
 0x305   :  { %v2360_v39 = vadd.f32 %v2359_v33, %v10920_v16  ;;  %v2361_v40 = vpop.f32.mrb[135].mxu0  ;;  %v11454_v16 = vpop.f32.mrb[90].mxu1 }
 0x306   :  { %v1538_v2 = vpop.f32.mrb[91].mxu1  ;;  %v7199_v40 = vld [vmem:[%s12112_s4 + $0x208] sm:$0xff] }
 0x307   :  { %8005 = vmatmul.mubr.msk.f32.gmra.mrb[120].mxu1 %vm2642_vm5, %v2360_v39 }
 0x308   :  { %v2364_v48 = vpop.f32.mrb[136].mxu0 }
 0x309   :  { %v2365_v49 = vadd.f32 %v2364_v48, %v10934_v24  ;;  %v2366_v7 = vpop.f32.mrb[137].mxu0  ;;  %v11458_v24 = vpop.f32.mrb[92].mxu1 }
 0x30a   :  { %v1543_v20 = vpop.f32.mrb[93].mxu1 }
 0x30b   :  { %8007 = vmatprep.mubr.msk.f32.mxu1 %vm2642_vm5, %v2365_v49  ;;  %v7203_v20 = vld [vmem:[%s12112_s4 + $0x228] sm:$0xff] }
 0x30c   :  { %v2369_v55 = vpop.f32.mrb[138].mxu0 }
 0x30d   :  { %v2370_v57 = vadd.f32 %v2369_v55, %v10953_v32  ;;  %v2371_v61 = vpop.f32.mrb[139].mxu0  ;;  %v11462_v32 = vpop.f32.mrb[94].mxu1  ;;  %v7201_v55 = vld [vmem:[%s12112_s4 + $0x218] sm:$0xff] }
 0x30e   :  { %v1548_v27 = vpop.f32.mrb[95].mxu1 }
 0x30f   :  { %8008 = vmatmul.mubr.msk.f32.gmra.mrb[122].mxu1 %vm2642_vm5, %v2370_v57  ;;  %v7202_v57 = vld [vmem:[%s12112_s4 + $0x220] sm:$0xff] }
 0x310   :  { %v2374_v11 = vpop.f32.mrb[140].mxu0 }
 0x311   :  { %v2375_v10 = vadd.f32 %v2374_v11, %v10979_v44  ;;  %v2376_v15 = vpop.f32.mrb[141].mxu0  ;;  %v11466_v44 = vpop.f32.mrb[96].mxu1 }
 0x312   :  { %v1553_v47 = vpop.f32.mrb[97].mxu1 }
 0x313   :  { %8010 = vmatprep.mubr.msk.f32.mxu1 %vm2642_vm5, %v2375_v10  ;;  %v8618_v10 = vpack.c.bf16 %v7202_v57, %v7201_v55 }
 0x314   :  { %v2379_v22 = vpop.f32.mrb[142].mxu0 }
 0x315   :  { %v2380_v28 = vadd.f32 %v2379_v22, %v10990_v50  ;;  %v2381_v63 = vpop.f32.mrb[143].mxu0  ;;  %v7200_v50 = vld [vmem:[%s12112_s4 + $0x210] sm:$0xff] }
 0x316   :  { %v8614_v52 = vpack.c.bf16 %v7200_v50, %v7199_v40  ;;  %v7204_v22 = vld [vmem:[%s12112_s4 + $0x230] sm:$0xff] }
 0x317   :  { %8011 = vmatmul.mubr.msk.f32.gmra.mrb[124].mxu1 %vm2642_vm5, %v2380_v28  ;;  %v8622_v27 = vpack.c.bf16 %v7204_v22, %v7203_v20 }
 0x318   :  { %v2384_v30 = vpop.f32.mrb[144].mxu0 }
 0x319   :  { %v2385_v33 = vadd.f32 %v2384_v30, %v11010_v60  ;;  %v2386_v39 = vpop.f32.mrb[145].mxu0  ;;  %v11476_v60 = vpop.f32.mrb[98].mxu1 }
 0x31a   :  { %v1558_v61 = vpop.f32.mrb[99].mxu1 }
 0x31b   :  { %8031 = vmatprep.mubr.msk.f32.mxu1 %vm2642_vm5, %v2385_v33  ;;  %v11487_v15 = vpop.f32.mrb[100].mxu1 }
 0x31c   :  { %v2389_v48 = vpop.f32.mrb[146].mxu0  ;;  %v1563_v28 = vpop.f32.mrb[101].mxu1 }
 0x31d   :  { %v2390_v49 = vadd.f32 %v2389_v48, %v11022_v1  ;;  %v2391_v7 = vpop.f32.mrb[147].mxu0  ;;  %v11497_v30 = vpop.f32.mrb[102].mxu1  ;;  %v7219_v48 = vld [vmem:[%s12112_s4 + $0x240] sm:$0xff] }
 0x31e   :  { %v1568_v33 = vpop.f32.mrb[103].mxu1 }
 0x31f   :  { %8032 = vmatmul.mubr.msk.f32.vlgmr.msra.gmra.mrb[114].mxu1 %vm2642_vm5, %v2390_v49  ;;  %v11501_v47 = vpop.f32.mrb[104].mxu1  ;;  %v7220_v49 = vld [vmem:[%s12112_s4 + $0x248] sm:$0xff] }
 0x320   :  { %v2394_v2 = vpop.f32.mrb[148].mxu0  ;;  %8613 = vmatpush3.bf16.msra.mxu1 %v11429_v54  ;;  %v1573_v7 = vpop.f32.mrb[105].mxu1  ;;  %v8626_v57 = vpack.c.bf16 %v7220_v49, %v7219_v48 }
 0x321   :  { %v2395_v1 = vadd.f32 %v2394_v2, %v11034_v12  ;;  %v2396_v11 = vpop.f32.mrb[149].mxu0  ;;  %8615 = vmatprep.subr.bf16.mxu1 %v8614_v52  ;;  %v11515_v61 = vpop.f32.mrb[106].mxu1 }
 0x322   :  { %v1578_v2 = vpop.f32.mrb[107].mxu1 }
 0x323   :  { %8034 = vmatprep.mubr.msk.f32.mxu1 %vm2642_vm5, %v2395_v1  ;;  %v11520_v20 = vpop.f32.mrb[108].mxu1 }
 0x324   :  { %v2399_v63 = vpop.f32.mrb[150].mxu0  ;;  %8617 = vmatpush3.bf16.msra.mxu1 %v8614_v52  ;;  %v1583_v22 = vpop.f32.mrb[109].mxu1 }
 0x325   :  { %v2400_v12 = vadd.f32 %v2399_v63, %v11050_v19  ;;  %v2401_v54 = vpop.f32.mrb[151].mxu0  ;;  %8619 = vmatprep.subr.bf16.mxu1 %v8618_v10  ;;  %v7205_v19 = vld [vmem:[%s12112_s4 + $0x238] sm:$0x3f] }
 0x327   :  { %8035 = vmatmul.mubr.msk.f32.gmra.mrb[116].mxu1 %vm2642_vm5, %v2400_v12  ;;  %v11524_v12 = vpop.f32.mrb[110].mxu1 }
 0x328   :  { %v2404_v39 = vpop.f32.mrb[152].mxu0  ;;  %8621 = vmatpush3.bf16.msra.mxu1 %v8618_v10  ;;  %v1588_v54 = vpop.f32.mrb[111].mxu1 }
 0x329   :  { %v2405_v40 = vadd.f32 %v2404_v39, %v11066_v34  ;;  %v2406_v50 = vpop.f32.mrb[153].mxu0  ;;  %8623 = vmatprep.subr.bf16.mxu1 %v8622_v27  ;;  %v11528_v39 = vpop.f32.mrb[112].mxu1 }
 0x32b   :  { %8037 = vmatprep.mubr.msk.f32.mxu1 %vm2642_vm5, %v2405_v40  ;;  %v1593_v40 = vpop.f32.mrb[113].mxu1 }
 0x32c   :  { %v2409_v34 = vpop.f32.mrb[154].mxu0  ;;  %8625 = vmatpush3.bf16.msra.mxu1 %v8622_v27 }
 0x32d   :  { %v2410_v52 = vadd.f32 %v2409_v34, %v11082_v43  ;;  %v2411_v55 = vpop.f32.mrb[155].mxu0  ;;  %8065 = vmatprep.subr.msk.mxu1 %vm2679_vm4, %v7205_v19 }
 0x32f   :  { %8038 = vmatmul.mubr.msk.f32.gmra.mrb[118].mxu1 %vm2642_vm5, %v2410_v52 }
 0x330   :  { %v2414_v1 = vpop.f32.mrb[156].mxu0  ;;  %8066 = vmatpush3.msk.msra.mxu1 %vm2679_vm4, %v7205_v19 }
 0x331   :  { %v2415_v11 = vadd.f32 %v2414_v1, %v11092_v31  ;;  %v2416_v10 = vpop.f32.mrb[157].mxu0  ;;  %8627 = vmatprep.subr.bf16.mxu1 %v8626_v57 }
 0x333   :  { %8040 = vmatprep.mubr.msk.f32.mxu1 %vm2642_vm5, %v2415_v11 }
 0x334   :  { %v2419_v43 = vpop.f32.mrb[158].mxu0 }
 0x335   :  { %v2420_v28 = vadd.f32 %v2419_v43, %v11111_v0  ;;  %v2421_v63 = vpop.f32.mrb[159].mxu0  ;;  %v7224_v43 = vld [vmem:[%s12112_s4 + $0x268] sm:$0xff] }
 0x337   :  { %8041 = vmatmul.mubr.msk.f32.gmra.mrb[120].mxu1 %vm2642_vm5, %v2420_v28 }
 0x338   :  { %v2424_v27 = vpop.f32.mrb[160].mxu0 }
 0x339   :  { %v2425_v33 = vadd.f32 %v2424_v27, %v11124_v9  ;;  %v2426_v31 = vpop.f32.mrb[161].mxu0 }
 0x33b   :  { %8043 = vmatprep.mubr.msk.f32.mxu1 %vm2642_vm5, %v2425_v33  ;;  %v7226_v33 = vld [vmem:[%s12112_s4 + $0x278] sm:$0xff] }
 0x33c   :  { %v2429_v50 = vpop.f32.mrb[162].mxu0 }
 0x33d   :  { %v2430_v19 = vadd.f32 %v2429_v50, %v11136_v14  ;;  %v2431_v48 = vpop.f32.mrb[163].mxu0  ;;  %v7221_v14 = vld [vmem:[%s12112_s4 + $0x250] sm:$0xff]  ;;  %v7263_v50 = vld [vmem:[#allocation2] ss:$0 sm:$0xff] }
 0x33e   :  { %v9110_v48 = vmov 0  }
 0x33f   :  { %8044 = vmatmul.mubr.msk.f32.gmra.mrb[122].mxu1 %vm2642_vm5, %v2430_v19  ;;  %9079 = vset.pattern.permute.xlu0 %v9110_v48 }
 0x340   :  { %v2434_v0 = vpop.f32.mrb[164].mxu0  ;;  %4467 = vperm.xlu0 %9079, %v7263_v50  }
 0x341   :  { %v2435_v49 = vadd.f32 %v2434_v0, %v11146_v26  ;;  %v2436_v7 = vpop.f32.mrb[165].mxu0  ;;  %v7222_v26 = vld [vmem:[%s12112_s4 + $0x258] sm:$0xff] }
 0x342   :  { %v8630_v22 = vpack.c.bf16 %v7222_v26, %v7221_v14  ;;  %v7227_v7 = vld [vmem:[%s12112_s4 + $0x280] sm:$0x3f] }
 0x343   :  { %8046 = vmatprep.mubr.msk.f32.mxu1 %vm2642_vm5, %v2435_v49 }
 0x344   :  { %v2439_v34 = vpop.f32.mrb[166].mxu0 }
 0x345   :  { %v2440_v9 = vadd.f32 %v2439_v34, %v11156_v35  ;;  %v2441_v52 = vpop.f32.mrb[167].mxu0  ;;  %v7242_v34 = vld [vmem:[%s12112_s4 + $0x290] sm:$0xff] }
 0x347   :  { %8047 = vmatmul.mubr.msk.f32.gmra.mrb[124].mxu1 %vm2642_vm5, %v2440_v9  ;;  %v7401_v9 = vld [vmem:[#allocation3] ss:$0 sm:$0xff] }
 0x348   :  { %v2444_v55 = vpop.f32.mrb[168].mxu0  ;;  %6064 = vperm.xlu0 %9079, %v7401_v9  }
 0x349   :  { %v2445_v2 = vadd.f32 %v2444_v55, %v11166_v41  ;;  %v2446_v1 = vpop.f32.mrb[169].mxu0  ;;  %v7223_v41 = vld [vmem:[%s12112_s4 + $0x260] sm:$0xff] }
 0x34a   :  { %v8634_v27 = vpack.c.bf16 %v7224_v43, %v7223_v41 }
 0x34b   :  { %8067 = vmatprep.mubr.msk.f32.mxu1 %vm2642_vm5, %v2445_v2 }
 0x34c   :  { %v2449_v11 = vpop.f32.mrb[170].mxu0 }
 0x34d   :  { %v2450_v35 = vadd.f32 %v2449_v11, %v11176_v51  ;;  %v2451_v10 = vpop.f32.mrb[171].mxu0  ;;  %v7225_v51 = vld [vmem:[%s12112_s4 + $0x270] sm:$0xff] }
 0x34f   :  { %8068 = vmatmul.mubr.msk.f32.vlgmr.msra.gmra.mrb[114].mxu1 %vm2642_vm5, %v2450_v35 }
 0x350   :  { %v2454_v28 = vpop.f32.mrb[172].mxu0  ;;  %8629 = vmatpush3.bf16.msra.mxu1 %v8626_v57 }
 0x351   :  { %v2455_v63 = vadd.f32 %v2454_v28, %v11186_v58  ;;  %v2456_v54 = vpop.f32.mrb[173].mxu0  ;;  %8631 = vmatprep.subr.bf16.mxu1 %v8630_v22  ;;  %v8638_v58 = vpack.c.bf16 %v7226_v33, %v7225_v51 }
 0x353   :  { %8070 = vmatprep.mubr.msk.f32.mxu1 %vm2642_vm5, %v2455_v63 }
 0x354   :  { %v2459_v31 = vpop.f32.mrb[174].mxu0  ;;  %8633 = vmatpush3.bf16.msra.mxu1 %v8630_v22 }
 0x355   :  { %v2460_v40 = vadd.f32 %v2459_v31, %v11202_v8  ;;  %v2461_v57 = vpop.f32.mrb[175].mxu0  ;;  %8635 = vmatprep.subr.bf16.mxu1 %v8634_v27  ;;  %v7241_v8 = vld [vmem:[%s12112_s4 + $0x288] sm:$0xff] }
 0x356   :  { %v8642_v2 = vpack.c.bf16 %v7242_v34, %v7241_v8  ;;  %v7248_v8 = vld [vmem:[%s12112_s4 + $0x2c0] sm:$0xff] }
 0x357   :  { %8071 = vmatmul.mubr.msk.f32.gmra.mrb[116].mxu1 %vm2642_vm5, %v2460_v40 }
 0x358   :  { %v2464_v19 = vpop.f32.mrb[176].mxu0  ;;  %8637 = vmatpush3.bf16.msra.mxu1 %v8634_v27 }
 0x359   :  { %v2465_v0 = vadd.f32 %v2464_v19, %v11218_v23  ;;  %v2466_v49 = vpop.f32.mrb[177].mxu0  ;;  %8639 = vmatprep.subr.bf16.mxu1 %v8638_v58  ;;  %v7246_v19 = vld [vmem:[%s12112_s4 + $0x2b0] sm:$0xff] }
 0x35b   :  { %8073 = vmatprep.mubr.msk.f32.mxu1 %vm2642_vm5, %v2465_v0 }
 0x35c   :  { %v2469_v52 = vpop.f32.mrb[178].mxu0  ;;  %8641 = vmatpush3.bf16.msra.mxu1 %v8638_v58 }
 0x35d   :  { %v2470_v23 = vadd.f32 %v2469_v52, %v11235_v4  ;;  %v2471_v55 = vpop.f32.mrb[179].mxu0  ;;  %8101 = vmatprep.subr.msk.mxu1 %vm2679_vm4, %v7227_v7 }
 0x35f   :  { %8074 = vmatmul.mubr.msk.f32.gmra.mrb[118].mxu1 %vm2642_vm5, %v2470_v23 }
 0x360   :  { %v2474_v1 = vpop.f32.mrb[180].mxu0  ;;  %8102 = vmatpush3.msk.msra.mxu1 %vm2679_vm4, %v7227_v7 }
 0x361   :  { %v2475_v14 = vadd.f32 %v2474_v1, %v11245_v46  ;;  %v2476_v26 = vpop.f32.mrb[181].mxu0  ;;  %8643 = vmatprep.subr.bf16.mxu1 %v8642_v2  ;;  %v7249_v1 = vld [vmem:[%s12112_s4 + $0x2c8] sm:$0x3f] }
 0x363   :  { %8076 = vmatprep.mubr.msk.f32.mxu1 %vm2642_vm5, %v2475_v14 }
 0x364   :  { %v2479_v11 = vpop.f32.mrb[182].mxu0 }
 0x365   :  { %v2480_v35 = vadd.f32 %v2479_v11, %v11264_v62  ;;  %v2481_v4 = vpop.f32.mrb[183].mxu0 }
 0x367   :  { %8077 = vmatmul.mubr.msk.f32.gmra.mrb[120].mxu1 %vm2642_vm5, %v2480_v35 }
 0x368   :  { %v2484_v10 = vpop.f32.mrb[184].mxu0 }
 0x369   :  { %v2485_v22 = vadd.f32 %v2484_v10, %v11277_v13  ;;  %v2486_v41 = vpop.f32.mrb[185].mxu0 }
 0x36b   :  { %8079 = vmatprep.mubr.msk.f32.mxu1 %vm2642_vm5, %v2485_v22 }
 0x36c   :  { %v2489_v43 = vpop.f32.mrb[186].mxu0 }
 0x36d   :  { %v2490_v28 = vadd.f32 %v2489_v43, %v11289_v25  ;;  %v2491_v46 = vpop.f32.mrb[187].mxu0  ;;  %v7243_v25 = vld [vmem:[%s12112_s4 + $0x298] sm:$0xff] }
 0x36f   :  { %8080 = vmatmul.mubr.msk.f32.gmra.mrb[122].mxu1 %vm2642_vm5, %v2490_v28 }
 0x370   :  { %v2494_v63 = vpop.f32.mrb[188].mxu0 }
 0x371   :  { %v2495_v54 = vadd.f32 %v2494_v63, %v11299_v36  ;;  %v2496_v27 = vpop.f32.mrb[189].mxu0  ;;  %v7244_v36 = vld [vmem:[%s12112_s4 + $0x2a0] sm:$0xff] }
 0x372   :  { %v8646_v50 = vpack.c.bf16 %v7244_v36, %v7243_v25 }
 0x373   :  { %8082 = vmatprep.mubr.msk.f32.mxu1 %vm2642_vm5, %v2495_v54 }
 0x374   :  { %v2499_v62 = vpop.f32.mrb[190].mxu0 }
 0x375   :  { %v2500_v51 = vadd.f32 %v2499_v62, %v11309_v45  ;;  %v2501_v33 = vpop.f32.mrb[191].mxu0 }
 0x377   :  { %8083 = vmatmul.mubr.msk.f32.gmra.mrb[124].mxu1 %vm2642_vm5, %v2500_v51 }
 0x378   :  { %v2504_v13 = vpop.f32.mrb[192].mxu0 }
 0x379   :  { %v2505_v31 = vadd.f32 %v2504_v13, %v11319_v53  ;;  %v2506_v40 = vpop.f32.mrb[193].mxu0  ;;  %v7245_v53 = vld [vmem:[%s12112_s4 + $0x2a8] sm:$0xff] }
 0x37a   :  { %v8650_v7 = vpack.c.bf16 %v7246_v19, %v7245_v53 }
 0x37b   :  { %8103 = vmatprep.mubr.msk.f32.mxu1 %vm2642_vm5, %v2505_v31 }
 0x37c   :  { %v2509_v57 = vpop.f32.mrb[194].mxu0 }
 0x37d   :  { %v2510_v45 = vadd.f32 %v2509_v57, %v11329_v3  ;;  %v2511_v58 = vpop.f32.mrb[195].mxu0  ;;  %v7247_v3 = vld [vmem:[%s12112_s4 + $0x2b8] sm:$0xff] }
 0x37f   :  { %8104 = vmatmul.mubr.msk.f32.vlgmr.msra.gmra.mrb[114].mxu1 %vm2642_vm5, %v2510_v45 }
 0x380   :  { %v2514_v48 = vpop.f32.mrb[196].mxu0  ;;  %8645 = vmatpush3.bf16.msra.mxu1 %v8642_v2 }
 0x381   :  { %v2515_v0 = vadd.f32 %v2514_v48, %v11339_v21  ;;  %v2516_v49 = vpop.f32.mrb[197].mxu0  ;;  %8647 = vmatprep.subr.bf16.mxu1 %v8646_v50  ;;  %v8654_v21 = vpack.c.bf16 %v7248_v8, %v7247_v3 }
 0x383   :  { %8106 = vmatprep.mubr.msk.f32.mxu1 %vm2642_vm5, %v2515_v0 }
 0x384   :  { %v2519_v34 = vpop.f32.mrb[198].mxu0  ;;  %8649 = vmatpush3.bf16.msra.mxu1 %v8646_v50 }
 0x385   :  { %v2520_v9 = vadd.f32 %v2519_v34, %v11355_v38  ;;  %v2521_v52 = vpop.f32.mrb[199].mxu0  ;;  %8651 = vmatprep.subr.bf16.mxu1 %v8650_v7 }
 0x387   :  { %8107 = vmatmul.mubr.msk.f32.gmra.mrb[116].mxu1 %vm2642_vm5, %v2520_v9 }
 0x388   :  { %v2524_v23 = vpop.f32.mrb[200].mxu0  ;;  %8653 = vmatpush3.bf16.msra.mxu1 %v8650_v7 }
 0x389   :  { %v2525_v55 = vadd.f32 %v2524_v23, %v11371_v56  ;;  %v2526_v2 = vpop.f32.mrb[201].mxu0  ;;  %8655 = vmatprep.subr.bf16.mxu1 %v8654_v21 }
 0x38b   :  { %8109 = vmatprep.mubr.msk.f32.mxu1 %vm2642_vm5, %v2525_v55 }
 0x38c   :  { %v2529_v14 = vpop.f32.mrb[202].mxu0  ;;  %8657 = vmatpush3.bf16.msra.mxu1 %v8654_v21 }
 0x38d   :  { %v2530_v38 = vadd.f32 %v2529_v14, %v11388_v6  ;;  %v2531_v26 = vpop.f32.mrb[203].mxu0  ;;  %8137 = vmatprep.subr.msk.mxu1 %vm2679_vm4, %v7249_v1 }
 0x38f   :  { %8110 = vmatmul.mubr.msk.f32.gmra.mrb[118].mxu1 %vm2642_vm5, %v2530_v38 }
 0x390   :  { %v2534_v11 = vpop.f32.mrb[204].mxu0  ;;  %8138 = vmatpush3.msk.msra.mxu1 %vm2679_vm4, %v7249_v1 }
 0x391   :  { %v2535_v56 = vadd.f32 %v2534_v11, %v11398_v37  ;;  %v2536_v35 = vpop.f32.mrb[205].mxu0 }
 0x393   :  { %8112 = vmatprep.mubr.msk.f32.mxu1 %vm2642_vm5, %v2535_v56 }
 0x394   :  { %v2539_v4 = vpop.f32.mrb[206].mxu0 }
 0x395   :  { %v2540_v10 = vadd.f32 %v2539_v4, %v11418_v59  ;;  %v2541_v22 = vpop.f32.mrb[207].mxu0 }
 0x397   :  { %8113 = vmatmul.mubr.msk.f32.gmra.mrb[120].mxu1 %vm2642_vm5, %v2540_v10 }
 0x398   :  { %v2544_v6 = vpop.f32.mrb[208].mxu0 }
 0x399   :  { %v2545_v41 = vadd.f32 %v2544_v6, %v11432_v17  ;;  %v2546_v43 = vpop.f32.mrb[209].mxu0 }
 0x39b   :  { %8115 = vmatprep.mubr.msk.f32.mxu1 %vm2642_vm5, %v2545_v41 }
 0x39c   :  { %v2549_v28 = vpop.f32.mrb[210].mxu0 }
 0x39d   :  { %v2550_v46 = vadd.f32 %v2549_v28, %v11442_v29  ;;  %v2551_v63 = vpop.f32.mrb[211].mxu0 }
 0x39f   :  { %8116 = vmatmul.mubr.msk.f32.gmra.mrb[122].mxu1 %vm2642_vm5, %v2550_v46 }
 0x3a0   :  { %v2554_v37 = vpop.f32.mrb[212].mxu0 }
 0x3a1   :  { %v2555_v54 = vadd.f32 %v2554_v37, %v11446_v42  ;;  %v2556_v27 = vpop.f32.mrb[213].mxu0 }
 0x3a3   :  { %8118 = vmatprep.mubr.msk.f32.mxu1 %vm2642_vm5, %v2555_v54 }
 0x3a4   :  { %v2559_v59 = vpop.f32.mrb[214].mxu0 }
 0x3a5   :  { %v2560_v62 = vadd.f32 %v2559_v59, %v11450_v18  ;;  %v2561_v51 = vpop.f32.mrb[215].mxu0 }
 0x3a7   :  { %8119 = vmatmul.mubr.msk.f32.gmra.mrb[124].mxu1 %vm2642_vm5, %v2560_v62 }
 0x3a8   :  { %v2564_v17 = vpop.f32.mrb[216].mxu0 }
 0x3a9   :  { %v2565_v33 = vadd.f32 %v2564_v17, %v11454_v16  ;;  %v2566_v13 = vpop.f32.mrb[217].mxu0 }
 0x3ab   :  { %8139 = vmatprep.mubr.msk.f32.mxu1 %vm2642_vm5, %v2565_v33 }
 0x3ac   :  { %v2569_v29 = vpop.f32.mrb[218].mxu0 }
 0x3ad   :  { %v2570_v31 = vadd.f32 %v2569_v29, %v11458_v24  ;;  %v2571_v40 = vpop.f32.mrb[219].mxu0 }
 0x3af   :  { %8140 = vmatmul.mubr.msk.f32.vlgmr.msra.gmra.mrb[114].mxu1 %vm2642_vm5, %v2570_v31 }
 0x3b0   :  { %v2574_v42 = vpop.f32.mrb[220].mxu0 }
 0x3b1   :  { %v2575_v25 = vadd.f32 %v2574_v42, %v11462_v32  ;;  %v2576_v36 = vpop.f32.mrb[221].mxu0 }
 0x3b3   :  { %8142 = vmatprep.mubr.msk.f32.mxu1 %vm2642_vm5, %v2575_v25 }
 0x3b4   :  { %v2579_v18 = vpop.f32.mrb[222].mxu0 }
 0x3b5   :  { %v2580_v57 = vadd.f32 %v2579_v18, %v11466_v44  ;;  %v2581_v45 = vpop.f32.mrb[223].mxu0 }
 0x3b7   :  { %8143 = vmatmul.mubr.msk.f32.gmra.mrb[116].mxu1 %vm2642_vm5, %v2580_v57 }
 0x3b8   :  { %v2584_v16 = vpop.f32.mrb[224].mxu0 }
 0x3b9   :  { %v2585_v58 = vadd.f32 %v2584_v16, %v11476_v60  ;;  %v2586_v50 = vpop.f32.mrb[225].mxu0 }
 0x3bb   :  { %8145 = vmatprep.mubr.msk.f32.mxu1 %vm2642_vm5, %v2585_v58 }
 0x3bc   :  { %v2589_v24 = vpop.f32.mrb[226].mxu0 }
 0x3bd   :  { %v2590_v53 = vadd.f32 %v2589_v24, %v11487_v15  ;;  %v2591_v19 = vpop.f32.mrb[227].mxu0  ;;  %v7320_v24 = vld [vmem:[%s12115_s7 + $0x18] sm:$0xff] }
 0x3bf   :  { %8146 = vmatmul.mubr.msk.f32.gmra.mrb[118].mxu1 %vm2642_vm5, %v2590_v53  ;;  %v7321_v53 = vld [vmem:[%s12115_s7 + $0x20] sm:$0xff] }
 0x3c0   :  { %v2594_v32 = vpop.f32.mrb[228].mxu0 }
 0x3c1   :  { %v2595_v48 = vadd.f32 %v2594_v32, %v11497_v30  ;;  %v2596_v0 = vpop.f32.mrb[229].mxu0 }
 0x3c2   :  { %v4495_v0 = vld [vmem:[%s12114_s6 + $0x8] sm:$0xff] }
 0x3c3   :  { %8148 = vmatprep.mubr.msk.f32.mxu1 %vm2642_vm5, %v2595_v48  ;;  %v8682_v48 = vpack.c.bf16 %v7321_v53, %v7320_v24  ;;  %v4549_v24 = vld [vmem:[%s12114_s6 + $0x1b8] sm:$0xff] }
 0x3c4   :  { %v2599_v44 = vpop.f32.mrb[230].mxu0 }
 0x3c5   :  { %v2600_v49 = vadd.f32 %v2599_v44, %v11501_v47  ;;  %v2601_v7 = vpop.f32.mrb[231].mxu0  ;;  %v4496_v44 = vld [vmem:[%s12114_s6 + $0x10] sm:$0xff] }
 0x3c6   :  { %v4497_v7 = vld [vmem:[%s12114_s6 + $0x18] sm:$0xff] }
 0x3c7   :  { %8149 = vmatmul.mubr.msk.f32.gmra.mrb[120].mxu1 %vm2642_vm5, %v2600_v49  ;;  %v7322_v49 = vld [vmem:[%s12115_s7 + $0x28] sm:$0x1f] }
 0x3c8   :  { %v2604_v60 = vpop.f32.mrb[232].mxu0 }
 0x3c9   :  { %v2605_v3 = vadd.f32 %v2604_v60, %v11515_v61  ;;  %v2606_v8 = vpop.f32.mrb[233].mxu0  ;;  %v4494_v61 = vld [vmem:[%s12114_s6] sm:$0xff] }
 0x3ca   :  { %v4498_v60 = vld [vmem:[%s12114_s6 + $0x20] sm:$0xff]  ;;  %v4500_v8 = vld [vmem:[%s12114_s6 + $0x30] sm:$0xff] }
 0x3cb   :  { %8151 = vmatprep.mubr.msk.f32.mxu1 %vm2642_vm5, %v2605_v3  ;;  %v4499_v3 = vld [vmem:[%s12114_s6 + $0x28] sm:$0xff] }
 0x3cc   :  { %v2609_v15 = vpop.f32.mrb[234].mxu0 }
 0x3cd   :  { %v2610_v34 = vadd.f32 %v2609_v15, %v11520_v20  ;;  %v2611_v9 = vpop.f32.mrb[235].mxu0  ;;  %v4468_v20 = vpop.permute.xlu0 %4467  ;;  %v4501_v15 = vld [vmem:[%s12114_s6 + $0x38] sm:$0xff] }
 0x3ce   :  { %v4503_v9 = vld [vmem:[%s12114_s6 + $0x48] sm:$0xff] }
 0x3cf   :  { %8152 = vmatmul.mubr.msk.f32.gmra.mrb[122].mxu1 %vm2642_vm5, %v2610_v34  ;;  %v4502_v34 = vld [vmem:[%s12114_s6 + $0x40] sm:$0xff] }
 0x3d0   :  { %v2614_v30 = vpop.f32.mrb[236].mxu0 }
 0x3d1   :  { %v2615_v52 = vadd.f32 %v2614_v30, %v11524_v12  ;;  %v2616_v21 = vpop.f32.mrb[237].mxu0  ;;  %v4504_v30 = vld [vmem:[%s12114_s6 + $0x50] sm:$0xff] }
 0x3d2   :  { %v4506_v21 = vld [vmem:[%s12114_s6 + $0x60] sm:$0xff] }
 0x3d3   :  { %8154 = vmatprep.mubr.msk.f32.mxu1 %vm2642_vm5, %v2615_v52  ;;  %v4505_v52 = vld [vmem:[%s12114_s6 + $0x58] sm:$0xff] }
 0x3d4   :  { %v2619_v47 = vpop.f32.mrb[238].mxu0 }
 0x3d5   :  { %v2620_v23 = vadd.f32 %v2619_v47, %v11528_v39  ;;  %v2621_v55 = vpop.f32.mrb[239].mxu0  ;;  %v4507_v47 = vld [vmem:[%s12114_s6 + $0x68] sm:$0xff] }
 0x3d6   :  { %v4509_v55 = vld [vmem:[%s12114_s6 + $0x78] sm:$0xff] }
 0x3d7   :  { %8155 = vmatmul.mubr.msk.f32.gmra.mrb[124].mxu1 %vm2642_vm5, %v2620_v23  ;;  %v4508_v23 = vld [vmem:[%s12114_s6 + $0x70] sm:$0xff] }
 0x3d8   :  { %8181 = vmatprep.mubr.msk.f32.mxu1 %vm4550_vm6, %v4494_v61  ;;  %v4510_v61 = vld [vmem:[%s12114_s6 + $0x80] sm:$0xff] }
 0x482   :  { %v8141_v2 = vpop.f32.mrb[114].mxu1 }
 0x483   :  { %v4471_v1 = vadd.f32 %v8141_v2, %v4468_v20  ;;  %v4389_v12 = vpop.f32.mrb[115].mxu1  ;;  %v4512_v2 = vld [vmem:[%s12114_s6 + $0x90] sm:$0xff] }
 0x484   :  { %v4470_v14 = vadd.f32 %v4468_v20, %v4389_v12  ;;  %v4514_v12 = vld [vmem:[%s12114_s6 + $0xa0] sm:$0xff] }
 0x485   :  { %v4483_v38 = vmax.f32 %v4471_v1, 0.0  ;;  %v4513_v1 = vld [vmem:[%s12114_s6 + $0x98] sm:$0xff] }
 0x486   :  { %v4482_v26 = vmax.f32 %v4470_v14, 0.0  ;;  %v4515_v14 = vld [vmem:[%s12114_s6 + $0xa8] sm:$0xff] }
 0x488   :  { %v8658_v11 = vpack.c.bf16 %v4483_v38, %v4482_v26  ;;  %v4516_v38 = vld [vmem:[%s12114_s6 + $0xb0] sm:$0xff]  ;;  %v4517_v26 = vld [vmem:[%s12114_s6 + $0xb8] sm:$0xff] }
 0x48a   :  { %v8144_v56 = vpop.f32.mrb[116].mxu1  ;;  %8659 = vmatprep.subr.bf16.mxu1 %v8658_v11 }
 0x48b   :  { %v4473_v39 = vadd.f32 %v8144_v56, %v4468_v20  ;;  %v4399_v35 = vpop.f32.mrb[117].mxu1  ;;  %8661 = vmatpush3.bf16.msra.mxu1 %v8658_v11  ;;  %v4518_v11 = vld [vmem:[%s12114_s6 + $0xc0] sm:$0xff]  ;;  %v4519_v56 = vld [vmem:[%s12114_s6 + $0xc8] sm:$0xff] }
 0x48c   :  { %v4472_v4 = vadd.f32 %v4468_v20, %v4399_v35  ;;  %v4521_v35 = vld [vmem:[%s12114_s6 + $0xd8] sm:$0xff] }
 0x48d   :  { %v4485_v10 = vmax.f32 %v4473_v39, 0.0  ;;  %v4520_v39 = vld [vmem:[%s12114_s6 + $0xd0] sm:$0xff] }
 0x48e   :  { %v4484_v22 = vmax.f32 %v4472_v4, 0.0  ;;  %v4522_v4 = vld [vmem:[%s12114_s6 + $0xe0] sm:$0xff] }
 0x490   :  { %v8662_v6 = vpack.c.bf16 %v4485_v10, %v4484_v22  ;;  %v4523_v10 = vld [vmem:[%s12114_s6 + $0xe8] sm:$0xff]  ;;  %v4524_v22 = vld [vmem:[%s12114_s6 + $0xf0] sm:$0xff] }
 0x492   :  { %v8147_v41 = vpop.f32.mrb[118].mxu1  ;;  %8663 = vmatprep.subr.bf16.mxu1 %v8662_v6 }
 0x493   :  { %v4475_v43 = vadd.f32 %v8147_v41, %v4468_v20  ;;  %v4409_v28 = vpop.f32.mrb[119].mxu1  ;;  %8665 = vmatpush3.bf16.msra.mxu1 %v8662_v6  ;;  %v4525_v6 = vld [vmem:[%s12114_s6 + $0xf8] sm:$0xff]  ;;  %v4526_v41 = vld [vmem:[%s12114_s6 + $0x100] sm:$0xff] }
 0x494   :  { %v4474_v46 = vadd.f32 %v4468_v20, %v4409_v28  ;;  %v4528_v28 = vld [vmem:[%s12114_s6 + $0x110] sm:$0xff] }
 0x495   :  { %v4487_v63 = vmax.f32 %v4475_v43, 0.0  ;;  %v4527_v43 = vld [vmem:[%s12114_s6 + $0x108] sm:$0xff] }
 0x496   :  { %v4486_v37 = vmax.f32 %v4474_v46, 0.0  ;;  %v4529_v46 = vld [vmem:[%s12114_s6 + $0x118] sm:$0xff] }
 0x498   :  { %v8666_v54 = vpack.c.bf16 %v4487_v63, %v4486_v37  ;;  %v4530_v63 = vld [vmem:[%s12114_s6 + $0x120] sm:$0xff]  ;;  %v4531_v37 = vld [vmem:[%s12114_s6 + $0x128] sm:$0xff] }
 0x49a   :  { %v8150_v27 = vpop.f32.mrb[120].mxu1  ;;  %8667 = vmatprep.subr.bf16.mxu1 %v8666_v54 }
 0x49b   :  { %v4477_v59 = vadd.f32 %v8150_v27, %v4468_v20  ;;  %v4419_v62 = vpop.f32.mrb[121].mxu1  ;;  %8669 = vmatpush3.bf16.msra.mxu1 %v8666_v54  ;;  %v4532_v54 = vld [vmem:[%s12114_s6 + $0x130] sm:$0xff]  ;;  %v4533_v27 = vld [vmem:[%s12114_s6 + $0x138] sm:$0xff] }
 0x49c   :  { %v4476_v51 = vadd.f32 %v4468_v20, %v4419_v62  ;;  %v4535_v62 = vld [vmem:[%s12114_s6 + $0x148] sm:$0xff] }
 0x49d   :  { %v4489_v17 = vmax.f32 %v4477_v59, 0.0  ;;  %v4534_v59 = vld [vmem:[%s12114_s6 + $0x140] sm:$0xff] }
 0x49e   :  { %v4488_v33 = vmax.f32 %v4476_v51, 0.0  ;;  %v4536_v51 = vld [vmem:[%s12114_s6 + $0x150] sm:$0xff] }
 0x4a0   :  { %v8670_v13 = vpack.c.bf16 %v4489_v17, %v4488_v33  ;;  %v4537_v17 = vld [vmem:[%s12114_s6 + $0x158] sm:$0xff]  ;;  %v4538_v33 = vld [vmem:[%s12114_s6 + $0x160] sm:$0xff] }
 0x4a2   :  { %v8153_v29 = vpop.f32.mrb[122].mxu1  ;;  %8671 = vmatprep.subr.bf16.mxu1 %v8670_v13 }
 0x4a3   :  { %v4479_v31 = vadd.f32 %v8153_v29, %v4468_v20  ;;  %v4429_v40 = vpop.f32.mrb[123].mxu1  ;;  %8673 = vmatpush3.bf16.msra.mxu1 %v8670_v13  ;;  %v4539_v13 = vld [vmem:[%s12114_s6 + $0x168] sm:$0xff]  ;;  %v4540_v29 = vld [vmem:[%s12114_s6 + $0x170] sm:$0xff] }
 0x4a4   :  { %v4478_v42 = vadd.f32 %v4468_v20, %v4429_v40  ;;  %v4542_v40 = vld [vmem:[%s12114_s6 + $0x180] sm:$0xff] }
 0x4a5   :  { %v4491_v25 = vmax.f32 %v4479_v31, 0.0  ;;  %v4541_v31 = vld [vmem:[%s12114_s6 + $0x178] sm:$0xff] }
 0x4a6   :  { %v4490_v36 = vmax.f32 %v4478_v42, 0.0  ;;  %v4543_v42 = vld [vmem:[%s12114_s6 + $0x188] sm:$0xff] }
 0x4a8   :  { %v8674_v18 = vpack.c.bf16 %v4491_v25, %v4490_v36  ;;  %v4544_v25 = vld [vmem:[%s12114_s6 + $0x190] sm:$0xff]  ;;  %v4545_v36 = vld [vmem:[%s12114_s6 + $0x198] sm:$0xff] }
 0x4aa   :  { %v8156_v57 = vpop.f32.mrb[124].mxu1  ;;  %8675 = vmatprep.subr.bf16.mxu1 %v8674_v18 }
 0x4ab   :  { %v4481_v45 = vadd.f32 %v8156_v57, %v4468_v20  ;;  %v4439_v16 = vpop.f32.mrb[125].mxu1  ;;  %8677 = vmatpush3.bf16.msra.mxu1 %v8674_v18  ;;  %v4546_v18 = vld [vmem:[%s12114_s6 + $0x1a0] sm:$0xff]  ;;  %v4547_v57 = vld [vmem:[%s12114_s6 + $0x1a8] sm:$0xff] }
 0x4ac   :  { %v4480_v58 = vadd.f32 %v4468_v20, %v4439_v16  ;;  %v4511_v20 = vld [vmem:[%s12114_s6 + $0x88] sm:$0xff]  ;;  %v5064_v16 = vld [vmem:[%s12115_s7] sm:$0xff] }
 0x4ad   :  { %v4493_v50 = vmax.f32 %v4481_v45, 0.0  ;;  %v4548_v45 = vld [vmem:[%s12114_s6 + $0x1b0] sm:$0xff] }
 0x4ae   :  { %v4492_v19 = vmax.f32 %v4480_v58, 0.0  ;;  %v5065_v58 = vld [vmem:[%s12115_s7 + $0x8] sm:$0xff] }
 0x4b0   :  { %v8678_v32 = vpack.c.bf16 %v4493_v50, %v4492_v19  ;;  %v8686_v50 = vpack.c.bf16 %v5065_v58, %v5064_v16  ;;  %v7389_v16 = vld [vmem:[%s12115_s7 + $0x90] sm:$0xff]  ;;  %v7390_v58 = vld [vmem:[%s12115_s7 + $0x98] sm:$0xff] }
 0x4b2   :  { %8679 = vmatprep.subr.bf16.mxu1 %v8678_v32 }
 0x4b3   :  { %8681 = vmatpush3.bf16.msra.mxu1 %v8678_v32 }
 0x4b4   :  { %8683 = vmatprep.subr.bf16.mxu1 %v8682_v48 }
 0x4b6   :  { %8182 = vmatmul.mubr.msk.f32.vlgmr.msra.gmra.mrb[126].mxu1 %vm4550_vm6, %v4495_v0 }
 0x4b7   :  { %8184 = vmatprep.mubr.msk.f32.mxu1 %vm4550_vm6, %v4496_v44  ;;  %8685 = vmatpush3.bf16.msra.mxu1 %v8682_v48 }
 0x4b8   :  { %8269 = vmatprep.subr.msk.mxu1 %vm5096_vm7, %v7322_v49 }
 0x4ba   :  { %8185 = vmatmul.mubr.msk.f32.gmra.mrb[128].mxu1 %vm4550_vm6, %v4497_v7 }
 0x4bb   :  { %8187 = vmatprep.mubr.msk.f32.mxu1 %vm4550_vm6, %v4498_v60  ;;  %8270 = vmatpush3.msk.msra.mxu1 %vm5096_vm7, %v7322_v49 }
 0x4bc   :  { %8687 = vmatprep.subr.bf16.mxu1 %v8686_v50 }
 0x4be   :  { %8188 = vmatmul.mubr.msk.f32.gmra.mrb[130].mxu1 %vm4550_vm6, %v4499_v3 }
 0x4bf   :  { %8190 = vmatprep.mubr.msk.f32.mxu1 %vm4550_vm6, %v4500_v8  ;;  %v5066_v8 = vld [vmem:[%s12115_s7 + $0x10] sm:$0x1f] }
 0x4c2   :  { %8191 = vmatmul.mubr.msk.f32.gmra.mrb[132].mxu1 %vm4550_vm6, %v4501_v15  ;;  %v7341_v15 = vld [vmem:[%s12115_s7 + $0x30] sm:$0xff] }
 0x4c3   :  { %8193 = vmatprep.mubr.msk.f32.mxu1 %vm4550_vm6, %v4502_v34  ;;  %v7342_v34 = vld [vmem:[%s12115_s7 + $0x38] sm:$0xff] }
 0x4c6   :  { %8194 = vmatmul.mubr.msk.f32.gmra.mrb[134].mxu1 %vm4550_vm6, %v4503_v9 }
 0x4c7   :  { %8196 = vmatprep.mubr.msk.f32.mxu1 %vm4550_vm6, %v4504_v30 }
 0x4ca   :  { %8197 = vmatmul.mubr.msk.f32.gmra.mrb[136].mxu1 %vm4550_vm6, %v4505_v52  ;;  %v8690_v52 = vpack.c.bf16 %v7342_v34, %v7341_v15  ;;  %v9111_v34 = vmov 0.0  }
 0x4cb   :  { %8199 = vmatprep.mubr.msk.f32.mxu1 %vm4550_vm6, %v4506_v21 }
 0x4ce   :  { %8200 = vmatmul.mubr.msk.f32.gmra.mrb[138].mxu1 %vm4550_vm6, %v4507_v47 }
 0x4cf   :  { %8202 = vmatprep.mubr.msk.f32.mxu1 %vm4550_vm6, %v4508_v23 }
 0x4d2   :  { %8203 = vmatmul.mubr.msk.f32.gmra.mrb[140].mxu1 %vm4550_vm6, %v4509_v55 }
 0x4d3   :  { %8205 = vmatprep.mubr.msk.f32.mxu1 %vm4550_vm6, %v4510_v61 }
 0x4d6   :  { %8206 = vmatmul.mubr.msk.f32.gmra.mrb[142].mxu1 %vm4550_vm6, %v4511_v20 }
 0x4d7   :  { %8208 = vmatprep.mubr.msk.f32.mxu1 %vm4550_vm6, %v4512_v2  ;;  %v7343_v2 = vld [vmem:[%s12115_s7 + $0x40] sm:$0x1f] }
 0x4da   :  { %8209 = vmatmul.mubr.msk.f32.gmra.mrb[144].mxu1 %vm4550_vm6, %v4513_v1  ;;  %v7353_v1 = vld [vmem:[%s12115_s7 + $0x48] sm:$0xff] }
 0x4db   :  { %8211 = vmatprep.mubr.msk.f32.mxu1 %vm4550_vm6, %v4514_v12  ;;  %v7354_v12 = vld [vmem:[%s12115_s7 + $0x50] sm:$0xff] }
 0x4de   :  { %8212 = vmatmul.mubr.msk.f32.gmra.mrb[146].mxu1 %vm4550_vm6, %v4515_v14 }
 0x4df   :  { %8214 = vmatprep.mubr.msk.f32.mxu1 %vm4550_vm6, %v4516_v38  ;;  %v8694_v38 = vpack.c.bf16 %v7354_v12, %v7353_v1 }
 0x4e2   :  { %8215 = vmatmul.mubr.msk.f32.gmra.mrb[148].mxu1 %vm4550_vm6, %v4517_v26 }
 0x4e3   :  { %8217 = vmatprep.mubr.msk.f32.mxu1 %vm4550_vm6, %v4518_v11 }
 0x4e6   :  { %8218 = vmatmul.mubr.msk.f32.gmra.mrb[150].mxu1 %vm4550_vm6, %v4519_v56 }
 0x4e7   :  { %8220 = vmatprep.mubr.msk.f32.mxu1 %vm4550_vm6, %v4520_v39 }
 0x4ea   :  { %8221 = vmatmul.mubr.msk.f32.gmra.mrb[152].mxu1 %vm4550_vm6, %v4521_v35 }
 0x4eb   :  { %8223 = vmatprep.mubr.msk.f32.mxu1 %vm4550_vm6, %v4522_v4 }
 0x4ee   :  { %8224 = vmatmul.mubr.msk.f32.gmra.mrb[154].mxu1 %vm4550_vm6, %v4523_v10 }
 0x4ef   :  { %8226 = vmatprep.mubr.msk.f32.mxu1 %vm4550_vm6, %v4524_v22  ;;  %v7355_v22 = vld [vmem:[%s12115_s7 + $0x58] sm:$0x1f] }
 0x4f2   :  { %8227 = vmatmul.mubr.msk.f32.gmra.mrb[156].mxu1 %vm4550_vm6, %v4525_v6  ;;  %v7365_v6 = vld [vmem:[%s12115_s7 + $0x60] sm:$0xff] }
 0x4f3   :  { %8229 = vmatprep.mubr.msk.f32.mxu1 %vm4550_vm6, %v4526_v41  ;;  %v7366_v41 = vld [vmem:[%s12115_s7 + $0x68] sm:$0xff] }
 0x4f6   :  { %8230 = vmatmul.mubr.msk.f32.gmra.mrb[158].mxu1 %vm4550_vm6, %v4527_v43 }
 0x4f7   :  { %8232 = vmatprep.mubr.msk.f32.mxu1 %vm4550_vm6, %v4528_v28  ;;  %v8698_v28 = vpack.c.bf16 %v7366_v41, %v7365_v6 }
 0x4fa   :  { %8233 = vmatmul.mubr.msk.f32.gmra.mrb[160].mxu1 %vm4550_vm6, %v4529_v46 }
 0x4fb   :  { %8235 = vmatprep.mubr.msk.f32.mxu1 %vm4550_vm6, %v4530_v63 }
 0x4fe   :  { %8236 = vmatmul.mubr.msk.f32.gmra.mrb[162].mxu1 %vm4550_vm6, %v4531_v37 }
 0x4ff   :  { %8238 = vmatprep.mubr.msk.f32.mxu1 %vm4550_vm6, %v4532_v54 }
 0x502   :  { %8239 = vmatmul.mubr.msk.f32.gmra.mrb[164].mxu1 %vm4550_vm6, %v4533_v27 }
 0x503   :  { %8241 = vmatprep.mubr.msk.f32.mxu1 %vm4550_vm6, %v4534_v59 }
 0x506   :  { %8242 = vmatmul.mubr.msk.f32.gmra.mrb[166].mxu1 %vm4550_vm6, %v4535_v62 }
 0x507   :  { %8244 = vmatprep.mubr.msk.f32.mxu1 %vm4550_vm6, %v4536_v51  ;;  %v7367_v51 = vld [vmem:[%s12115_s7 + $0x70] sm:$0x1f] }
 0x50a   :  { %8245 = vmatmul.mubr.msk.f32.gmra.mrb[168].mxu1 %vm4550_vm6, %v4537_v17  ;;  %v7377_v17 = vld [vmem:[%s12115_s7 + $0x78] sm:$0xff] }
 0x50b   :  { %8247 = vmatprep.mubr.msk.f32.mxu1 %vm4550_vm6, %v4538_v33  ;;  %v7378_v33 = vld [vmem:[%s12115_s7 + $0x80] sm:$0xff] }
 0x50e   :  { %8248 = vmatmul.mubr.msk.f32.gmra.mrb[170].mxu1 %vm4550_vm6, %v4539_v13 }
 0x50f   :  { %8250 = vmatprep.mubr.msk.f32.mxu1 %vm4550_vm6, %v4540_v29  ;;  %v8702_v29 = vpack.c.bf16 %v7378_v33, %v7377_v17  ;;  %v6703_v33 = vld [vmem:[%s12118_s11] sm:$0xff] }
 0x512   :  { %8251 = vmatmul.mubr.msk.f32.gmra.mrb[172].mxu1 %vm4550_vm6, %v4541_v31 }
 0x513   :  { %8253 = vmatprep.mubr.msk.f32.mxu1 %vm4550_vm6, %v4542_v40 }
 0x516   :  { %8254 = vmatmul.mubr.msk.f32.gmra.mrb[174].mxu1 %vm4550_vm6, %v4543_v42 }
 0x517   :  { %8256 = vmatprep.mubr.msk.f32.mxu1 %vm4550_vm6, %v4544_v25 }
 0x51a   :  { %8257 = vmatmul.mubr.msk.f32.gmra.mrb[176].mxu1 %vm4550_vm6, %v4545_v36 }
 0x51b   :  { %8259 = vmatprep.mubr.msk.f32.mxu1 %vm4550_vm6, %v4546_v18 }
 0x51e   :  { %8260 = vmatmul.mubr.msk.f32.gmra.mrb[178].mxu1 %vm4550_vm6, %v4547_v57 }
 0x51f   :  { %8262 = vmatprep.mubr.msk.f32.mxu1 %vm4550_vm6, %v4548_v45  ;;  %v7379_v45 = vld [vmem:[%s12115_s7 + $0x88] sm:$0x1f] }
 0x522   :  { %8263 = vmatmul.mubr.msk.f32.gmra.mrb[180].mxu1 %vm4550_vm6, %v4549_v24  ;;  %v8706_v24 = vpack.c.bf16 %v7390_v58, %v7389_v16 }
 0x589   :  { %v8183_v53 = vpop.f32.mrb[126].mxu1 }
 0x58a   :  { %v4785_v19 = vpop.f32.mrb[127].mxu1 }
 0x58d   :  { %v8186_v32 = vpop.f32.mrb[128].mxu1 }
 0x58e   :  { %v4795_v48 = vpop.f32.mrb[129].mxu1 }
 0x591   :  { %v8189_v0 = vpop.f32.mrb[130].mxu1 }
 0x592   :  { %v4805_v44 = vpop.f32.mrb[131].mxu1 }
 0x595   :  { %v8192_v49 = vpop.f32.mrb[132].mxu1 }
 0x596   :  { %v4815_v7 = vpop.f32.mrb[133].mxu1 }
 0x599   :  { %v8195_v60 = vpop.f32.mrb[134].mxu1 }
 0x59a   :  { %v4825_v3 = vpop.f32.mrb[135].mxu1 }
 0x59b   :  { %8271 = vmatprep.mubr.msk.f32.mxu1 %vm5071_vm8, %v4825_v3 }
 0x59c   :  { %8272 = vmatmul.mubr.msk.f32.vlgmr.msra.gmra.mrb[182].mxu1 %vm5071_vm8, %v8195_v60 }
 0x59d   :  { %v8198_v9 = vpop.f32.mrb[136].mxu1  ;;  %8689 = vmatpush3.bf16.msra.mxu1 %v8686_v50 }
 0x59e   :  { %v4835_v30 = vpop.f32.mrb[137].mxu1  ;;  %8287 = vmatprep.subr.msk.mxu1 %vm5096_vm7, %v5066_v8 }
 0x59f   :  { %8274 = vmatprep.mubr.msk.f32.mxu1 %vm5071_vm8, %v4835_v30 }
 0x5a0   :  { %8275 = vmatmul.mubr.msk.f32.gmra.mrb[184].mxu1 %vm5071_vm8, %v8198_v9 }
 0x5a1   :  { %v8201_v21 = vpop.f32.mrb[138].mxu1  ;;  %8288 = vmatpush3.msk.msra.mxu1 %vm5096_vm7, %v5066_v8 }
 0x5a2   :  { %v4845_v47 = vpop.f32.mrb[139].mxu1  ;;  %8691 = vmatprep.subr.bf16.mxu1 %v8690_v52 }
 0x5a3   :  { %8277 = vmatprep.mubr.msk.f32.mxu1 %vm5071_vm8, %v4845_v47 }
 0x5a4   :  { %8278 = vmatmul.mubr.msk.f32.gmra.mrb[186].mxu1 %vm5071_vm8, %v8201_v21  ;;  %v6065_v21 = vpop.permute.xlu0 %6064 }
 0x5a5   :  { %v8204_v23 = vpop.f32.mrb[140].mxu1 }
 0x5a6   :  { %v4855_v55 = vpop.f32.mrb[141].mxu1 }
 0x5a7   :  { %8280 = vmatprep.mubr.msk.f32.mxu1 %vm5071_vm8, %v4855_v55 }
 0x5a8   :  { %8281 = vmatmul.mubr.msk.f32.gmra.mrb[188].mxu1 %vm5071_vm8, %v8204_v23 }
 0x5a9   :  { %8289 = vmatprep.mubr.msk.f32.mxu1 %vm5071_vm8, %v4785_v19  ;;  %v8207_v61 = vpop.f32.mrb[142].mxu1 }
 0x5aa   :  { %v4865_v20 = vpop.f32.mrb[143].mxu1 }
 0x5ac   :  { %8290 = vmatmul.mubr.msk.f32.vlgmr.msra.gmra.mrb[182].mxu1 %vm5071_vm8, %v8183_v53 }
 0x5ad   :  { %8292 = vmatprep.mubr.msk.f32.mxu1 %vm5071_vm8, %v4795_v48  ;;  %8693 = vmatpush3.bf16.msra.mxu1 %v8690_v52  ;;  %v8210_v14 = vpop.f32.mrb[144].mxu1  ;;  %v7402_v52 = vld [vmem:[%s12116_s9 + $0x8] sm:$0xff] }
 0x5ae   :  { %8305 = vmatprep.subr.msk.mxu1 %vm5096_vm7, %v7343_v2  ;;  %v4875_v26 = vpop.f32.mrb[145].mxu1 }
 0x5b0   :  { %8293 = vmatmul.mubr.msk.f32.gmra.mrb[184].mxu1 %vm5071_vm8, %v8186_v32 }
 0x5b1   :  { %8295 = vmatprep.mubr.msk.f32.mxu1 %vm5071_vm8, %v4805_v44  ;;  %8306 = vmatpush3.msk.msra.mxu1 %vm5096_vm7, %v7343_v2  ;;  %v8213_v11 = vpop.f32.mrb[146].mxu1  ;;  %v6083_v2 = vld [vmem:[%s12116_s9] sm:$0xff] }
 0x5b2   :  { %8695 = vmatprep.subr.bf16.mxu1 %v8694_v38  ;;  %v4885_v56 = vpop.f32.mrb[147].mxu1 }
 0x5b4   :  { %8296 = vmatmul.mubr.msk.f32.gmra.mrb[186].mxu1 %vm5071_vm8, %v8189_v0 }
 0x5b5   :  { %8298 = vmatprep.mubr.msk.f32.mxu1 %vm5071_vm8, %v4815_v7  ;;  %v8216_v39 = vpop.f32.mrb[148].mxu1  ;;  %v7391_v7 = vld [vmem:[%s12115_s7 + $0xa0] sm:$0x1f] }
 0x5b6   :  { %v4895_v35 = vpop.f32.mrb[149].mxu1 }
 0x5b8   :  { %8299 = vmatmul.mubr.msk.f32.gmra.mrb[188].mxu1 %vm5071_vm8, %v8192_v49 }
 0x5b9   :  { %8307 = vmatprep.mubr.msk.f32.mxu1 %vm5071_vm8, %v4865_v20  ;;  %v8219_v4 = vpop.f32.mrb[150].mxu1 }
 0x5ba   :  { %v4905_v10 = vpop.f32.mrb[151].mxu1 }
 0x5bc   :  { %8308 = vmatmul.mubr.msk.f32.vlgmr.msra.gmra.mrb[182].mxu1 %vm5071_vm8, %v8207_v61 }
 0x5bd   :  { %8697 = vmatpush3.bf16.msra.mxu1 %v8694_v38  ;;  %8310 = vmatprep.mubr.msk.f32.mxu1 %vm5071_vm8, %v4875_v26  ;;  %v8222_v43 = vpop.f32.mrb[152].mxu1  ;;  %v7405_v26 = vld [vmem:[%s12116_s9 + $0x10] sm:$0xff] }
 0x5be   :  { %8323 = vmatprep.subr.msk.mxu1 %vm5096_vm7, %v7355_v22  ;;  %v4915_v46 = vpop.f32.mrb[153].mxu1 }
 0x5c0   :  { %8311 = vmatmul.mubr.msk.f32.gmra.mrb[184].mxu1 %vm5071_vm8, %v8210_v14 }
 0x5c1   :  { %8313 = vmatprep.mubr.msk.f32.mxu1 %vm5071_vm8, %v4885_v56  ;;  %8324 = vmatpush3.msk.msra.mxu1 %vm5096_vm7, %v7355_v22  ;;  %v8225_v63 = vpop.f32.mrb[154].mxu1 }
 0x5c2   :  { %8699 = vmatprep.subr.bf16.mxu1 %v8698_v28  ;;  %v4925_v37 = vpop.f32.mrb[155].mxu1 }
 0x5c4   :  { %8314 = vmatmul.mubr.msk.f32.gmra.mrb[186].mxu1 %vm5071_vm8, %v8213_v11 }
 0x5c5   :  { %8316 = vmatprep.mubr.msk.f32.mxu1 %vm5071_vm8, %v4895_v35  ;;  %v8228_v54 = vpop.f32.mrb[156].mxu1 }
 0x5c6   :  { %v4935_v27 = vpop.f32.mrb[157].mxu1 }
 0x5c8   :  { %8317 = vmatmul.mubr.msk.f32.gmra.mrb[188].mxu1 %vm5071_vm8, %v8216_v39 }
 0x5c9   :  { %8325 = vmatprep.mubr.msk.f32.mxu1 %vm5071_vm8, %v4905_v10  ;;  %v8231_v59 = vpop.f32.mrb[158].mxu1 }
 0x5ca   :  { %v4945_v62 = vpop.f32.mrb[159].mxu1 }
 0x5cc   :  { %8326 = vmatmul.mubr.msk.f32.vlgmr.msra.gmra.mrb[182].mxu1 %vm5071_vm8, %v8219_v4  ;;  %v7407_v4 = vld [vmem:[%s12116_s9 + $0x18] sm:$0xff] }
 0x5cd   :  { %8701 = vmatpush3.bf16.msra.mxu1 %v8698_v28  ;;  %8328 = vmatprep.mubr.msk.f32.mxu1 %vm5071_vm8, %v4915_v46  ;;  %v8234_v13 = vpop.f32.mrb[160].mxu1 }
 0x5ce   :  { %8341 = vmatprep.subr.msk.mxu1 %vm5096_vm7, %v7367_v51  ;;  %v4955_v31 = vpop.f32.mrb[161].mxu1 }
 0x5d0   :  { %8329 = vmatmul.mubr.msk.f32.gmra.mrb[184].mxu1 %vm5071_vm8, %v8222_v43  ;;  %v7409_v43 = vld [vmem:[%s12116_s9 + $0x20] sm:$0xff] }
 0x5d1   :  { %8331 = vmatprep.mubr.msk.f32.mxu1 %vm5071_vm8, %v4925_v37  ;;  %8342 = vmatpush3.msk.msra.mxu1 %vm5096_vm7, %v7367_v51  ;;  %v8237_v40 = vpop.f32.mrb[162].mxu1  ;;  %v7415_v51 = vld [vmem:[%s12116_s9 + $0x38] sm:$0xff] }
 0x5d2   :  { %8703 = vmatprep.subr.bf16.mxu1 %v8702_v29  ;;  %v4965_v42 = vpop.f32.mrb[163].mxu1 }
 0x5d4   :  { %8332 = vmatmul.mubr.msk.f32.gmra.mrb[186].mxu1 %vm5071_vm8, %v8225_v63  ;;  %v7411_v63 = vld [vmem:[%s12116_s9 + $0x28] sm:$0xff] }
 0x5d5   :  { %8334 = vmatprep.mubr.msk.f32.mxu1 %vm5071_vm8, %v4935_v27  ;;  %v8240_v25 = vpop.f32.mrb[164].mxu1  ;;  %v7413_v27 = vld [vmem:[%s12116_s9 + $0x30] sm:$0xff] }
 0x5d6   :  { %v4975_v36 = vpop.f32.mrb[165].mxu1 }
 0x5d8   :  { %8335 = vmatmul.mubr.msk.f32.gmra.mrb[188].mxu1 %vm5071_vm8, %v8228_v54 }
 0x5d9   :  { %8343 = vmatprep.mubr.msk.f32.mxu1 %vm5071_vm8, %v4945_v62  ;;  %v8243_v18 = vpop.f32.mrb[166].mxu1 }
 0x5da   :  { %v4985_v57 = vpop.f32.mrb[167].mxu1 }
 0x5dc   :  { %8344 = vmatmul.mubr.msk.f32.vlgmr.msra.gmra.mrb[182].mxu1 %vm5071_vm8, %v8231_v59 }
 0x5dd   :  { %8705 = vmatpush3.bf16.msra.mxu1 %v8702_v29  ;;  %8346 = vmatprep.mubr.msk.f32.mxu1 %vm5071_vm8, %v4955_v31  ;;  %v8246_v50 = vpop.f32.mrb[168].mxu1  ;;  %v6705_v31 = vld [vmem:[%s12118_s11 + $0x10] sm:$0xff] }
 0x5de   :  { %8359 = vmatprep.subr.msk.mxu1 %vm5096_vm7, %v7379_v45  ;;  %v4995_v53 = vpop.f32.mrb[169].mxu1 }
 0x5e0   :  { %8347 = vmatmul.mubr.msk.f32.gmra.mrb[184].mxu1 %vm5071_vm8, %v8234_v13  ;;  %v6704_v13 = vld [vmem:[%s12118_s11 + $0x8] sm:$0xff] }
 0x5e1   :  { %8349 = vmatprep.mubr.msk.f32.mxu1 %vm5071_vm8, %v4965_v42  ;;  %8360 = vmatpush3.msk.msra.mxu1 %vm5096_vm7, %v7379_v45  ;;  %v8249_v19 = vpop.f32.mrb[170].mxu1  ;;  %v8711_v29 = vpack.c.bf16 %v6704_v13, %v6703_v33 }
 0x5e2   :  { %8707 = vmatprep.subr.bf16.mxu1 %v8706_v24  ;;  %v5005_v32 = vpop.f32.mrb[171].mxu1 }
 0x5e4   :  { %8350 = vmatmul.mubr.msk.f32.gmra.mrb[186].mxu1 %vm5071_vm8, %v8237_v40  ;;  %v6706_v40 = vld [vmem:[%s12118_s11 + $0x18] sm:$0xff] }
 0x5e5   :  { %8352 = vmatprep.mubr.msk.f32.mxu1 %vm5071_vm8, %v4975_v36  ;;  %v8252_v48 = vpop.f32.mrb[172].mxu1  ;;  %v8714_v42 = vpack.c.bf16 %v6706_v40, %v6705_v31 }
 0x5e6   :  { %v5015_v0 = vpop.f32.mrb[173].mxu1 }
 0x5e8   :  { %8353 = vmatmul.mubr.msk.f32.gmra.mrb[188].mxu1 %vm5071_vm8, %v8240_v25 }
 0x5e9   :  { %8361 = vmatprep.mubr.msk.f32.mxu1 %vm5071_vm8, %v4985_v57  ;;  %v8255_v44 = vpop.f32.mrb[174].mxu1 }
 0x5ea   :  { %v5025_v49 = vpop.f32.mrb[175].mxu1 }
 0x5ec   :  { %8362 = vmatmul.mubr.msk.f32.vlgmr.msra.gmra.mrb[182].mxu1 %vm5071_vm8, %v8243_v18 }
 0x5ed   :  { %8709 = vmatpush3.bf16.msra.mxu1 %v8706_v24  ;;  %8364 = vmatprep.mubr.msk.f32.mxu1 %vm5071_vm8, %v4995_v53  ;;  %v8258_v60 = vpop.f32.mrb[176].mxu1 }
 0x5ee   :  { %8377 = vmatprep.subr.msk.mxu1 %vm5096_vm7, %v7391_v7  ;;  %v5035_v3 = vpop.f32.mrb[177].mxu1 }
 0x5f0   :  { %8365 = vmatmul.mubr.msk.f32.gmra.mrb[184].mxu1 %vm5071_vm8, %v8246_v50 }
 0x5f1   :  { %8367 = vmatprep.mubr.msk.f32.mxu1 %vm5071_vm8, %v5005_v32  ;;  %8378 = vmatpush3.msk.msra.mxu1 %vm5096_vm7, %v7391_v7  ;;  %v8261_v8 = vpop.f32.mrb[178].mxu1 }
 0x5f2   :  { %v5045_v15 = vpop.f32.mrb[179].mxu1  ;;  %8391 = vmatprep.subr.mxu1 %v9111_v34 }
 0x5f4   :  { %8368 = vmatmul.mubr.msk.f32.gmra.mrb[186].mxu1 %vm5071_vm8, %v8249_v19 }
 0x5f5   :  { %8370 = vmatprep.mubr.msk.f32.mxu1 %vm5071_vm8, %v5015_v0  ;;  %v8264_v9 = vpop.f32.mrb[180].mxu1 }
 0x5f6   :  { %v5055_v30 = vpop.f32.mrb[181].mxu1 }
 0x5f8   :  { %8371 = vmatmul.mubr.msk.f32.gmra.mrb[188].mxu1 %vm5071_vm8, %v8252_v48 }
 0x5f9   :  { %8379 = vmatprep.mubr.msk.f32.mxu1 %vm5071_vm8, %v5025_v49 }
 0x5fc   :  { %8380 = vmatmul.mubr.msk.f32.vlgmr.msra.gmra.mrb[182].mxu1 %vm5071_vm8, %v8255_v44 }
 0x5fd   :  { %8382 = vmatprep.mubr.msk.f32.mxu1 %vm5071_vm8, %v5035_v3  ;;  %8392 = vmatpush3.msra.mxu1 %v7402_v52 }
 0x5fe   :  { %8396 = vmatprep.subr.mxu1 %v9111_v34 }
 0x600   :  { %8383 = vmatmul.mubr.msk.f32.gmra.mrb[184].mxu1 %vm5071_vm8, %v8258_v60 }
 0x601   :  { %8385 = vmatprep.mubr.msk.f32.mxu1 %vm5071_vm8, %v5045_v15  ;;  %v7417_v15 = vld [vmem:[%s12117_s10] ss:$0 sm:$0xff]  ;;  %s9113_s10 = smov [#allocation4]  }
 0x602   :  { %s6802_s7 = sshll.u32 %s9113_s10, 4  ;;  %s6803_s7 = int_to_ptr.vmem [resolvable:$true] %s6802_s7 }
 0x603   :  { %s9084_s16 = scalar_lea.vmem %s6803_s7, 32  ;;  %p9089_p1 = scmp.lt.s32.totalorder %s6803_s7, %s6803_s7 }
 0x604   :  { %8386 = vmatmul.mubr.msk.f32.gmra.mrb[186].mxu1 %vm5071_vm8, %v8261_v8  ;;  %p9085_p0 = scmp.ne.s32.totalorder %s6803_s7, %s9084_s16  ;;  %p9090_p2 = scmp.lt.s32.totalorder %s9084_s16, %s9084_s16 }
 0x605   :  { %8388 = vmatprep.mubr.msk.f32.mxu1 %vm5071_vm8, %v5055_v30 }
 0x606   :  { %p9091_p3 = por %p9090_p2, %p9089_p1 }
 0x608   :  { %8389 = vmatmul.mubr.msk.f32.gmra.mrb[188].mxu1 %vm5071_vm8, %v8264_v9  ;;  %p9092_p4 = pnand %p9091_p3, %p9085_p0 }
 0x609   :  { %8393 = vmatprep.mubr.msk.f32.mxu1 %vm9112_vm9, %v9111_v34 }
 0x6cf   :  { %v8381_v47 = vpop.f32.mrb[182].mxu1 }
 0x6d0   :  { %v6068_v23 = vadd.f32 %v8381_v47, %v6065_v21  ;;  %v6010_v55 = vpop.f32.mrb[183].mxu1 }
 0x6d1   :  { %v6067_v20 = vadd.f32 %v6065_v21, %v6010_v55  ;;  %v7418_v55 = vld [vmem:[%s12119_s12] ss:$0 sm:$0xff] }
 0x6d2   :  { %v6076_v61 = vmax.f32 %v6068_v23, 0.0 }
 0x6d3   :  { %v8384_v1 = vpop.f32.mrb[184].mxu1  ;;  %v6075_v14 = vmax.f32 %v6067_v20, 0.0 }
 0x6d4   :  { %v6020_v12 = vpop.f32.mrb[185].mxu1  ;;  %8394 = vmatmul.mubr.msk.f32.vlgmr.msra.gmra.mrb[190].mxu1 %vm6086_vm10, %v6076_v61  ;;  %v6070_v39 = vadd.f32 %v8384_v1, %v6065_v21 }
 0x6d5   :  { %8397 = vmatpush3.msra.mxu1 %v6083_v2  ;;  %8398 = vmatprep.mubr.msk.f32.mxu1 %vm9112_vm9, %v9111_v34  ;;  %v6069_v38 = vadd.f32 %v6065_v21, %v6020_v12 }
 0x6d6   :  { %8401 = vmatprep.subr.mxu1 %v9111_v34  ;;  %v6078_v6 = vmax.f32 %v6070_v39, 0.0 }
 0x6d7   :  { %v8387_v11 = vpop.f32.mrb[186].mxu1  ;;  %v6077_v35 = vmax.f32 %v6069_v38, 0.0 }
 0x6d8   :  { %v6030_v56 = vpop.f32.mrb[187].mxu1  ;;  %8399 = vmatmul.mubr.msk.f32.vlgmr.msra.gmra.mrb[192].mxu1 %vm6086_vm10, %v6075_v14  ;;  %v6072_v28 = vadd.f32 %v8387_v11, %v6065_v21 }
 0x6d9   :  { %8402 = vmatpush3.msra.mxu1 %v7405_v26  ;;  %8403 = vmatprep.mubr.msk.f32.mxu1 %vm9112_vm9, %v9111_v34  ;;  %v6071_v41 = vadd.f32 %v6065_v21, %v6030_v56 }
 0x6da   :  { %8406 = vmatprep.subr.mxu1 %v9111_v34  ;;  %v6080_v37 = vmax.f32 %v6072_v28, 0.0 }
 0x6db   :  { %v8390_v10 = vpop.f32.mrb[188].mxu1  ;;  %v6079_v46 = vmax.f32 %v6071_v41, 0.0 }
 0x6dc   :  { %v6040_v22 = vpop.f32.mrb[189].mxu1  ;;  %8404 = vmatmul.mubr.msk.f32.vlgmr.msra.gmra.mrb[194].mxu1 %vm6086_vm10, %v6077_v35  ;;  %v6074_v59 = vadd.f32 %v8390_v10, %v6065_v21 }
 0x6dd   :  { %8407 = vmatpush3.msra.mxu1 %v7407_v4  ;;  %8408 = vmatprep.mubr.msk.f32.mxu1 %vm9112_vm9, %v9111_v34  ;;  %v6073_v54 = vadd.f32 %v6065_v21, %v6040_v22 }
 0x6de   :  { %8411 = vmatprep.subr.mxu1 %v9111_v34  ;;  %v6082_v17 = vmax.f32 %v6074_v59, 0.0 }
 0x6df   :  { %v6081_v62 = vmax.f32 %v6073_v54, 0.0 }
 0x6e0   :  { %8409 = vmatmul.mubr.msk.f32.vlgmr.msra.gmra.mrb[196].mxu1 %vm6086_vm10, %v6078_v6 }
 0x6e1   :  { %8412 = vmatpush3.msra.mxu1 %v7409_v43  ;;  %8413 = vmatprep.mubr.msk.f32.mxu1 %vm9112_vm9, %v9111_v34 }
 0x6e2   :  { %8416 = vmatprep.subr.mxu1 %v9111_v34 }
 0x6e4   :  { %8414 = vmatmul.mubr.msk.f32.vlgmr.msra.gmra.mrb[198].mxu1 %vm6086_vm10, %v6079_v46 }
 0x6e5   :  { %8417 = vmatpush3.msra.mxu1 %v7411_v63  ;;  %8418 = vmatprep.mubr.msk.f32.mxu1 %vm9112_vm9, %v9111_v34 }
 0x6e6   :  { %8421 = vmatprep.subr.mxu1 %v9111_v34 }
 0x6e8   :  { %8419 = vmatmul.mubr.msk.f32.vlgmr.msra.gmra.mrb[200].mxu1 %vm6086_vm10, %v6080_v37 }
 0x6e9   :  { %8422 = vmatpush3.msra.mxu1 %v7413_v27  ;;  %8423 = vmatprep.mubr.msk.f32.mxu1 %vm9112_vm9, %v9111_v34 }
 0x6ea   :  { %8426 = vmatprep.subr.mxu1 %v9111_v34 }
 0x6ec   :  { %8424 = vmatmul.mubr.msk.f32.vlgmr.msra.gmra.mrb[202].mxu1 %vm6086_vm10, %v6081_v62 }
 0x6ed   :  { %8427 = vmatpush3.msra.mxu1 %v7415_v51  ;;  %8428 = vmatprep.mubr.msk.f32.mxu1 %vm9112_vm9, %v9111_v34 }
 0x6ee   :  { %8710 = vmatprep.subr.bf16.mxu1 %v9108_v5 }
 0x6f0   :  { %8429 = vmatmul.mubr.msk.f32.vlgmr.msra.gmra.mrb[204].mxu1 %vm6086_vm10, %v6082_v17 }
 0x6f1   :  { %8439 = vmatprep.mubr.msk.f32.mxu1 %vm9112_vm9, %v9111_v34  ;;  %8712 = vmatpush3.bf16.msra.mxu1 %v8711_v29 }
 0x6f2   :  { %8713 = vmatprep.subr.bf16.mxu1 %v9108_v5 }
 0x6f5   :  { %8715 = vmatpush3.bf16.msra.mxu1 %v8714_v42 }
 0x7a7   :  { %v6156_v25 = vpop.f32.mrb[190].mxu1 }
 0x7a8   :  { %v8395_v36 = vpop.f32.mrb[191].mxu1 }
 0x7ab   :  { %v6229_v18 = vpop.f32.mrb[192].mxu1 }
 0x7ac   :  { %v6230_v57 = vadd.f32 %v6229_v18, %v6156_v25  ;;  %v8400_v45 = vpop.f32.mrb[193].mxu1 }
 0x7af   :  { %v6304_v16 = vpop.f32.mrb[194].mxu1 }
 0x7b0   :  { %v6308_v58 = vadd.f32 %v6304_v16, %v6230_v57  ;;  %v8405_v50 = vpop.f32.mrb[195].mxu1 }
 0x7b3   :  { %v6380_v24 = vpop.f32.mrb[196].mxu1 }
 0x7b4   :  { %v6384_v5 = vadd.f32 %v6380_v24, %v6308_v58  ;;  %v8410_v53 = vpop.f32.mrb[197].mxu1 }
 0x7b7   :  { %v6456_v19 = vpop.f32.mrb[198].mxu1 }
 0x7b8   :  { %v6460_v32 = vadd.f32 %v6456_v19, %v6384_v5  ;;  %v8415_v48 = vpop.f32.mrb[199].mxu1 }
 0x7bb   :  { %v6532_v0 = vpop.f32.mrb[200].mxu1 }
 0x7bc   :  { %v6536_v44 = vadd.f32 %v6532_v0, %v6460_v32  ;;  %v8420_v49 = vpop.f32.mrb[201].mxu1 }
 0x7bf   :  { %v6608_v7 = vpop.f32.mrb[202].mxu1 }
 0x7c0   :  { %v6612_v60 = vadd.f32 %v6608_v7, %v6536_v44  ;;  %v8425_v3 = vpop.f32.mrb[203].mxu1 }
 0x7c3   :  { %v6684_v8 = vpop.f32.mrb[204].mxu1 }
 0x7c4   :  { %v6688_v34 = vadd.f32 %v6684_v8, %v6612_v60  ;;  %v8430_v9 = vpop.f32.mrb[205].mxu1 }
 0x7c6   :  { %v6696_v30 = vadd.f32 %v7417_v15, %v6688_v34 }
 0x7c8   :  { %v6697_v52 = vmax.f32 %v6696_v30, 0.0 }
 0x7ca   :  { %v6699_v21 = vrot.slane %v6697_v52, 2 }
 0x7cc   :  { %v6701_v47 = vsub.f32 %v6697_v52, %v6699_v21 }
 0x7ce   :  { %v6702_v23 = vand.u32 2147483647, %v6701_v47 }
 0x7d0   :  { %8440 = vmatmul.mubr.msk.f32.vlgmr.msra.gmra.mrb[206].mxu1 %vm6714_vm11, %v6702_v23 }
 0x8a3   :  { %v6784_v61 = vpop.f32.mrb[206].mxu1 }
 0x8a4   :  { %v6785_v20 = vadd.f32 %v7418_v55, %v6784_v61  ;;  %v8441_v2 = vpop.f32.mrb[207].mxu1 }
 0x8a6   :  { %v7420_v1 = vmul.f32 -1.442695, %v6785_v20 }
 0x8a8   :  { %9080 = vpow2.f32 %v7420_v1 }
 0x8b2   :  { %v9081_v12 = vpop.eup %9080 }
 0x8b3   :  { %v6791_v14 = vadd.f32 1.0, %v9081_v12 }
 0x8b5   :  { %9082 = vrcp.f32 %v6791_v14 }
 0x8bf   :  { %v9083_v38 = vpop.eup %9082 }
 0x8c0   :  { %6795 = vst.msk [vmem:[#allocation4] sm:$0x3] %vm6794_vm12, %v9083_v38 }
 0x8c1   :  { %9095 = shalt.err (!%p9092_p4)
}
 0x8c2   :  { %s9096_s5 = scalar_lea.hbm %s12120_s13, 32 }
 0x8c3   :  { %p9097_p5 = scmp.ne.s32.totalorder %s12120_s13, %s9096_s5  ;;  %p9100_p6 = scmp.lt.u32.totalorder %s9096_s5, %s12120_s13 }
 0x8c5   :  { %p9102_p7 = pnand %p9100_p6, %p9097_p5 }
 0x8c7   :  { %9105 = shalt.err (!%p9102_p7)
}
 0x8c8   :  { %6805 = dma.vmem_to_hbm [thread:$0]  %s6803_s7, 32, %s12120_s13, [#allocation5]  }
 0x8c9   :  { %9106 = dma.done.wait [#allocation5], 32  }
 0x8ca   :  { %9107 = vsyncadd [#allocation5], 4294967264 }
 0x8cb   :  { %6809 = vsyncpa [#allocation5], 1 }

</bundles_post_ra>
